<compile_context>
chip_gen: v7x
topology: tpu7x:2x2x1
jax: 0.10.0
libtpu: 0.0.40
codegen_flags: <defaults>
</compile_context>

<pallas_src>
import jax
import jax.numpy as jnp
from jax.experimental import pallas as pl
from jax.experimental.pallas import tpu as pltpu

BN_EPS = 1e-5
COORD_PAD = 8     # 3 input coords zero-padded to 8 sublanes
OUT_PAD = 128     # k*k = 9 output columns padded to one full lane group


# ----------------------------------------------------------------------------
# Kernel
# ----------------------------------------------------------------------------
def stn3d_kernel(x_ref,
                 w1, t1, w2, t2, w3, t3,
                 fw1, t4, fw2, t5, fw3, fb3,
                 out_ref, g_acc):
    tb, _, tn = x_ref.shape                   # x block: (TB, 8, TN) channel-major
    c3 = w3.shape[-1]                         # 1024
    ni = pl.program_id(1)
    n_last = pl.num_programs(1) - 1

    # conv1 (Conv2d(1, 64, (1, 3))) == per-point matmul 3->64.
    # The tile is channel-major; transpose each (8, TN) slab to point-major.
    parts = []
    for b in range(tb):
        xb = jnp.transpose(x_ref[b])                                  # (TN, 8) f32
        parts.append(jnp.dot(xb.astype(jnp.bfloat16), w1[...],
                             preferred_element_type=jnp.float32))     # (TN, 64)
    h = jnp.concatenate(parts, axis=0) if tb > 1 else parts[0]        # (TB*TN, 64)
    h = jnp.maximum(h + t1[...], 0.0)

    # conv2 (1x1) == matmul 64 -> 128  (+ folded BN/bias, ReLU)
    h = jnp.dot(h.astype(jnp.bfloat16), w2[...],
                preferred_element_type=jnp.float32)
    h = jnp.maximum(h + t2[...], 0.0)                                 # (TB*TN, 128)

    # conv3 (1x1) == matmul 128 -> 1024
    h = jnp.dot(h.astype(jnp.bfloat16), w3[...],
                preferred_element_type=jnp.float32)
    h = jnp.maximum(h + t3[...], 0.0)                                 # (TB*TN, 1024)

    # MaxPool2d((num_points, 1)): per-tile max + running max across point tiles.
    tile_max = jnp.max(h.reshape(tb, tn, c3), axis=1)                 # (TB, 1024)

    @pl.when(ni == 0)
    def _():
        g_acc[...] = jnp.full(g_acc.shape, -jnp.inf, dtype=g_acc.dtype)

    g_acc[...] = jnp.maximum(g_acc[...], tile_max)

    # FC head, once per batch tile.
    @pl.when(ni == n_last)
    def _():
        f = jnp.dot(g_acc[...].astype(jnp.bfloat16), fw1[...],
                    preferred_element_type=jnp.float32)
        f = jnp.maximum(f + t4[...], 0.0)                             # (TB, 512)
        f = jnp.dot(f.astype(jnp.bfloat16), fw2[...],
                    preferred_element_type=jnp.float32)
        f = jnp.maximum(f + t5[...], 0.0)                             # (TB, 256)
        f = jnp.dot(f.astype(jnp.bfloat16), fw3[...],
                    preferred_element_type=jnp.float32) + fb3[...]    # (TB, 128)
        out_ref[0] = f


# ----------------------------------------------------------------------------
# Parameters
# ----------------------------------------------------------------------------
def init_params(key, k=3, zero_fc3=True):
    """Module-faithful params (k=3).  Conv/FC weights stored as (in, out)."""
    assert k == 3
    ks = jax.random.split(key, 12)

    def u(kk, shape, fan_in):
        bound = 1.0 / jnp.sqrt(jnp.float32(fan_in))
        return jax.random.uniform(kk, shape, jnp.float32, -bound, bound)

    p = {}
    p["w1"], p["b1"] = u(ks[0], (3, 64), 3), u(ks[1], (64,), 3)
    p["w2"], p["b2"] = u(ks[2], (64, 128), 64), u(ks[3], (128,), 64)
    p["w3"], p["b3"] = u(ks[4], (128, 1024), 128), u(ks[5], (1024,), 128)
    p["fw1"], p["fb1"] = u(ks[6], (1024, 512), 1024), u(ks[7], (512,), 1024)
    p["fw2"], p["fb2"] = u(ks[8], (512, 256), 512), u(ks[9], (256,), 512)
    if zero_fc3:   # STN3d zero-initializes fc3
        p["fw3"] = jnp.zeros((256, k * k), jnp.float32)
        p["fb3"] = jnp.zeros((k * k,), jnp.float32)
    else:          # nonzero fc3 so the correctness check exercises everything
        p["fw3"] = u(ks[10], (256, k * k), 256)
        p["fb3"] = u(ks[11], (k * k,), 256)
    # BatchNorm (eval mode, default init): gamma=1, beta=0, mean=0, var=1
    for name, c in (("1", 64), ("2", 128), ("3", 1024), ("4", 512), ("5", 256)):
        p[f"bn{name}_gamma"] = jnp.ones((c,), jnp.float32)
        p[f"bn{name}_beta"] = jnp.zeros((c,), jnp.float32)
        p[f"bn{name}_mean"] = jnp.zeros((c,), jnp.float32)
        p[f"bn{name}_var"] = jnp.ones((c,), jnp.float32)
    return p


def prepare_params(params, k=3):
    """Fold eval-mode BN + biases into (bf16 weights, f32 shift) per layer."""
    def fold(w, b, name):
        gamma, beta = params[f"bn{name}_gamma"], params[f"bn{name}_beta"]
        mean, var = params[f"bn{name}_mean"], params[f"bn{name}_var"]
        scale = gamma / jnp.sqrt(var + BN_EPS)
        shift = beta - mean * scale
        w_f = (w * scale[None, :]).astype(jnp.bfloat16)
        t_f = (b * scale + shift).reshape(1, -1).astype(jnp.float32)
        return w_f, t_f

    prep = {}
    w1, prep["t1"] = fold(params["w1"], params["b1"], "1")
    prep["w1"] = jnp.pad(w1, ((0, COORD_PAD - w1.shape[0]), (0, 0)))  # 3 -> 8 coords
    prep["w2"], prep["t2"] = fold(params["w2"], params["b2"], "2")
    prep["w3"], prep["t3"] = fold(params["w3"], params["b3"], "3")
    prep["fw1"], prep["t4"] = fold(params["fw1"], params["fb1"], "4")
    prep["fw2"], prep["t5"] = fold(params["fw2"], params["fb2"], "5")
    # fc3 has no BN; pad k*k -> 128 columns for lane-dense output stores.
    prep["fw3"] = jnp.pad(params["fw3"],
                          ((0, 0), (0, OUT_PAD - k * k))).astype(jnp.bfloat16)
    prep["fb3"] = jnp.pad(params["fb3"],
                          ((0, OUT_PAD - k * k),)).reshape(1, OUT_PAD)
    return prep


# ----------------------------------------------------------------------------
# Wrapper
# ----------------------------------------------------------------------------
def _pick_batch_tile(b, desired):
    t = max(1, min(desired, b))
    while b % t:
        t -= 1
    return t


def _pick_point_tile(n, desired):
    best, m = None, 128
    while m <= min(n, desired):
        if n % m == 0:
            best = m
        m += 128
    return best if best is not None else n


def stn3d_forward(x_nchw, params, k=3, tb=4, tn=512):
    """x_nchw: (B, 1, N, 3) float32, as in the PyTorch module (k=3)."""
    B, C, N, K = x_nchw.shape
    assert C == 1 and K == 3 and k == 3, "Pallas kernel implements the k==3 path"

    prep = prepare_params(params, k=k)
    tb = _pick_batch_tile(B, tb)
    tn = _pick_point_tile(N, tn)
    nb, nn = B // tb, N // tn

    # Lane-dense, channel-major input: (B, 3, N) zero-padded to (B, 8, N).
    x = jnp.swapaxes(x_nchw.reshape(B, N, K), 1, 2)          # (B, 3, N)
    x = jnp.pad(x, ((0, 0), (0, COORD_PAD - K), (0, 0)))     # (B, 8, N)

    names = ("w1", "t1", "w2", "t2", "w3", "t3",
             "fw1", "t4", "fw2", "t5", "fw3", "fb3")
    ordered = [prep[n] for n in names]
    param_specs = [pl.BlockSpec(p.shape, lambda bi, ni: (0, 0)) for p in ordered]
    c3 = prep["w3"].shape[-1]

    out = pl.pallas_call(
        stn3d_kernel,
        out_shape=jax.ShapeDtypeStruct((nb, tb, OUT_PAD), jnp.float32),
        grid_spec=pltpu.PrefetchScalarGridSpec(
            num_scalar_prefetch=0,
            grid=(nb, nn),
            in_specs=[pl.BlockSpec((tb, COORD_PAD, tn),
                                   lambda bi, ni: (bi, 0, ni))] + param_specs,
            out_specs=pl.BlockSpec((1, tb, OUT_PAD), lambda bi, ni: (bi, 0, 0)),
            scratch_shapes=[pltpu.VMEM((tb, c3), jnp.float32)],
        ),
        compiler_params=pltpu.CompilerParams(
            dimension_semantics=("parallel", "arbitrary"),
            vmem_limit_bytes=48 * 1024 * 1024,
        ),
    )(x, *ordered)

    out = out.reshape(B, OUT_PAD)[:, : k * k]
    iden = jnp.eye(k, dtype=jnp.float32).reshape(1, k * k)
    return (out + iden).reshape(B, k, k)


# ----------------------------------------------------------------------------
# Plain-JAX reference (same folded params + same bf16 casts)
# ----------------------------------------------------------------------------
def stn3d_reference(x_nchw, params, k=3):
    prep = prepare_params(params, k=k)
    B, _, N, K = x_nchw.shape
    f32, bf16 = jnp.float32, jnp.bfloat16
    x = jnp.pad(x_nchw.reshape(B, N, K), ((0, 0), (0, 0), (0, COORD_PAD - K)))
    h = jnp.einsum("bnk,kc->bnc", x.astype(bf16), prep["w1"],
                   preferred_element_type=f32)
    h = jnp.maximum(h + prep["t1"], 0.0)
    h = jnp.einsum("bnc,cd->bnd", h.astype(bf16), prep["w2"],
                   preferred_element_type=f32)
    h = jnp.maximum(h + prep["t2"], 0.0)
    h = jnp.einsum("bnc,cd->bnd", h.astype(bf16), prep["w3"],
                   preferred_element_type=f32)
    h = jnp.maximum(h + prep["t3"], 0.0)
    g = jnp.max(h, axis=1)                                          # (B, 1024)
    f = jnp.maximum(jnp.dot(g.astype(bf16), prep["fw1"],
                            preferred_element_type=f32) + prep["t4"], 0.0)
    f = jnp.maximum(jnp.dot(f.astype(bf16), prep["fw2"],
                            preferred_element_type=f32) + prep["t5"], 0.0)
    f = jnp.dot(f.astype(bf16), prep["fw3"],
                preferred_element_type=f32) + prep["fb3"]
    out = f[:, : k * k]
    iden = jnp.eye(k, dtype=f32).reshape(1, k * k)
    return (out + iden).reshape(B, k, k)


if __name__ == "__main__":
    B, N, k = 4, 256, 3   # small num_points for the demo (module default is 2500)
    key = jax.random.PRNGKey(0)
    k_x, k_p = jax.random.split(key)
    x = jax.random.normal(k_x, (B, 1, N, 3), jnp.float32)   # NCHW, like PyTorch

    # 1) Correctness check with nonzero fc3 so the whole pipeline is validated
    #    (module-faithful zero fc3 would make the output identity regardless).
    params_val = init_params(k_p, k=k, zero_fc3=False)
    out = jax.block_until_ready(stn3d_forward(x, params_val, k=k, tb=2, tn=128))
    ref = stn3d_reference(x, params_val, k=k)
    assert out.shape == (B, k, k), out.shape
    assert jnp.allclose(out, ref, atol=2e-2, rtol=2e-2), (out, ref)

    # 2) Module-faithful params (fc3 zero-initialized as in STN3d.__init__):
    #    output must be the identity transform for every sample.
    params = init_params(k_p, k=k, zero_fc3=True)
    out2 = jax.block_until_ready(stn3d_forward(x, params, k=k, tb=2, tn=128))
    assert jnp.allclose(out2, jnp.broadcast_to(jnp.eye(k, dtype=jnp.float32),
                                               (B, k, k)), atol=1e-4)

    print("KERNEL_OK")
</pallas_src>

<mosaic_0001>
module attributes {stable_mosaic.version = 11 : i64} {
  func.func @stn3d_kernel(%arg0: i32, %arg1: i32, %arg2: memref<2x8x128xf32, #tpu.memory_space<vmem>>, %arg3: memref<8x64xbf16, #tpu.memory_space<vmem>>, %arg4: memref<1x64xf32, #tpu.memory_space<vmem>>, %arg5: memref<64x128xbf16, #tpu.memory_space<vmem>>, %arg6: memref<1x128xf32, #tpu.memory_space<vmem>>, %arg7: memref<128x1024xbf16, #tpu.memory_space<vmem>>, %arg8: memref<1x1024xf32, #tpu.memory_space<vmem>>, %arg9: memref<1024x512xbf16, #tpu.memory_space<vmem>>, %arg10: memref<1x512xf32, #tpu.memory_space<vmem>>, %arg11: memref<512x256xbf16, #tpu.memory_space<vmem>>, %arg12: memref<1x256xf32, #tpu.memory_space<vmem>>, %arg13: memref<256x128xbf16, #tpu.memory_space<vmem>>, %arg14: memref<1x128xf32, #tpu.memory_space<vmem>>, %arg15: memref<1x2x128xf32, #tpu.memory_space<vmem>>, %arg16: memref<2x1024xf32, #tpu.memory_space<vmem>>) attributes {dimension_semantics = [#tpu.dimension_semantics<parallel>, #tpu.dimension_semantics<arbitrary>], iteration_bounds = array<i64: 2, 2>, scalar_prefetch = 0 : i64, scratch_operands = 1 : i64, tpu.core_type = #tpu.core_type<tc>, window_params = [{transform_indices = @transform_0, window_bounds = array<i64: 2, 8, 128>}, {pipeline_mode = #tpu.pipeline_mode<synchronous>, transform_indices = @transform_1, window_bounds = array<i64: 8, 64>}, {pipeline_mode = #tpu.pipeline_mode<synchronous>, transform_indices = @transform_2, window_bounds = array<i64: 1, 64>}, {pipeline_mode = #tpu.pipeline_mode<synchronous>, transform_indices = @transform_3, window_bounds = array<i64: 64, 128>}, {pipeline_mode = #tpu.pipeline_mode<synchronous>, transform_indices = @transform_4, window_bounds = array<i64: 1, 128>}, {pipeline_mode = #tpu.pipeline_mode<synchronous>, transform_indices = @transform_5, window_bounds = array<i64: 128, 1024>}, {pipeline_mode = #tpu.pipeline_mode<synchronous>, transform_indices = @transform_6, window_bounds = array<i64: 1, 1024>}, {pipeline_mode = #tpu.pipeline_mode<synchronous>, transform_indices = @transform_7, window_bounds = array<i64: 1024, 512>}, {pipeline_mode = #tpu.pipeline_mode<synchronous>, transform_indices = @transform_8, window_bounds = array<i64: 1, 512>}, {pipeline_mode = #tpu.pipeline_mode<synchronous>, transform_indices = @transform_9, window_bounds = array<i64: 512, 256>}, {pipeline_mode = #tpu.pipeline_mode<synchronous>, transform_indices = @transform_10, window_bounds = array<i64: 1, 256>}, {pipeline_mode = #tpu.pipeline_mode<synchronous>, transform_indices = @transform_11, window_bounds = array<i64: 256, 128>}, {pipeline_mode = #tpu.pipeline_mode<synchronous>, transform_indices = @transform_12, window_bounds = array<i64: 1, 128>}, {transform_indices = @transform_13, window_bounds = array<i64: 1, 2, 128>}]} {
    %c0 = arith.constant 0 : index
    %c0_0 = arith.constant 0 : index
    %c0_1 = arith.constant 0 : index
    %0 = vector.load %arg2[%c0, %c0_0, %c0_1] : memref<2x8x128xf32, #tpu.memory_space<vmem>>, vector<1x8x128xf32>
    %1 = vector.shape_cast %0 : vector<1x8x128xf32> to vector<8x128xf32>
    %2 = tpu.transpose %1, [1, 0] : vector<8x128xf32> -> vector<128x8xf32>
    %3 = arith.truncf %2 : vector<128x8xf32> to vector<128x8xbf16>
    %c0_2 = arith.constant 0 : index
    %c0_3 = arith.constant 0 : index
    %4 = vector.load %arg3[%c0_2, %c0_3] : memref<8x64xbf16, #tpu.memory_space<vmem>>, vector<8x64xbf16>
    %cst = arith.constant dense<0.000000e+00> : vector<128x64xf32>
    %5 = tpu.matmul %3, %4, %cst {dimension_numbers = #tpu.dot_dimension_numbers<[1], [0], [0], [1], [0, 0, 1, 1], [], []>} : vector<128x8xbf16>, vector<8x64xbf16>, vector<128x64xf32> -> vector<128x64xf32>
    %c1 = arith.constant 1 : index
    %c0_4 = arith.constant 0 : index
    %c0_5 = arith.constant 0 : index
    %6 = vector.load %arg2[%c1, %c0_4, %c0_5] : memref<2x8x128xf32, #tpu.memory_space<vmem>>, vector<1x8x128xf32>
    %7 = vector.shape_cast %6 : vector<1x8x128xf32> to vector<8x128xf32>
    %8 = tpu.transpose %7, [1, 0] : vector<8x128xf32> -> vector<128x8xf32>
    %9 = arith.truncf %8 : vector<128x8xf32> to vector<128x8xbf16>
    %c0_6 = arith.constant 0 : index
    %c0_7 = arith.constant 0 : index
    %10 = vector.load %arg3[%c0_6, %c0_7] : memref<8x64xbf16, #tpu.memory_space<vmem>>, vector<8x64xbf16>
    %cst_8 = arith.constant dense<0.000000e+00> : vector<128x64xf32>
    %11 = tpu.matmul %9, %10, %cst_8 {dimension_numbers = #tpu.dot_dimension_numbers<[1], [0], [0], [1], [0, 0, 1, 1], [], []>} : vector<128x8xbf16>, vector<8x64xbf16>, vector<128x64xf32> -> vector<128x64xf32>
    %12 = tpu.concatenate %5, %11 in 0 : vector<128x64xf32>, vector<128x64xf32> -> vector<256x64xf32>
    %c0_9 = arith.constant 0 : index
    %c0_10 = arith.constant 0 : index
    %13 = vector.load %arg4[%c0_9, %c0_10] : memref<1x64xf32, #tpu.memory_space<vmem>>, vector<1x64xf32>
    %14 = vector.broadcast %13 : vector<1x64xf32> to vector<256x64xf32>
    %15 = arith.addf %12, %14 : vector<256x64xf32>
    %cst_11 = arith.constant 0.000000e+00 : f32
    %16 = vector.broadcast %cst_11 : f32 to vector<256x64xf32>
    %17 = arith.maximumf %15, %16 : vector<256x64xf32>
    %18 = arith.truncf %17 : vector<256x64xf32> to vector<256x64xbf16>
    %c0_12 = arith.constant 0 : index
    %c0_13 = arith.constant 0 : index
    %19 = vector.load %arg5[%c0_12, %c0_13] : memref<64x128xbf16, #tpu.memory_space<vmem>>, vector<64x128xbf16>
    %cst_14 = arith.constant dense<0.000000e+00> : vector<256x128xf32>
    %20 = tpu.matmul %18, %19, %cst_14 {dimension_numbers = #tpu.dot_dimension_numbers<[1], [0], [0], [1], [0, 0, 1, 1], [], []>} : vector<256x64xbf16>, vector<64x128xbf16>, vector<256x128xf32> -> vector<256x128xf32>
    %c0_15 = arith.constant 0 : index
    %c0_16 = arith.constant 0 : index
    %21 = vector.load %arg6[%c0_15, %c0_16] : memref<1x128xf32, #tpu.memory_space<vmem>>, vector<1x128xf32>
    %22 = vector.broadcast %21 : vector<1x128xf32> to vector<256x128xf32>
    %23 = arith.addf %20, %22 : vector<256x128xf32>
    %cst_17 = arith.constant 0.000000e+00 : f32
    %24 = vector.broadcast %cst_17 : f32 to vector<256x128xf32>
    %25 = arith.maximumf %23, %24 : vector<256x128xf32>
    %26 = arith.truncf %25 : vector<256x128xf32> to vector<256x128xbf16>
    %c0_18 = arith.constant 0 : index
    %c0_19 = arith.constant 0 : index
    %27 = vector.load %arg7[%c0_18, %c0_19] : memref<128x1024xbf16, #tpu.memory_space<vmem>>, vector<128x1024xbf16>
    %cst_20 = arith.constant dense<0.000000e+00> : vector<256x1024xf32>
    %28 = tpu.matmul %26, %27, %cst_20 {dimension_numbers = #tpu.dot_dimension_numbers<[1], [0], [0], [1], [0, 0, 1, 1], [], []>} : vector<256x128xbf16>, vector<128x1024xbf16>, vector<256x1024xf32> -> vector<256x1024xf32>
    %c0_21 = arith.constant 0 : index
    %c0_22 = arith.constant 0 : index
    %29 = vector.load %arg8[%c0_21, %c0_22] : memref<1x1024xf32, #tpu.memory_space<vmem>>, vector<1x1024xf32>
    %30 = vector.broadcast %29 : vector<1x1024xf32> to vector<256x1024xf32>
    %31 = arith.addf %28, %30 : vector<256x1024xf32>
    %cst_23 = arith.constant 0.000000e+00 : f32
    %32 = vector.broadcast %cst_23 : f32 to vector<256x1024xf32>
    %33 = arith.maximumf %31, %32 : vector<256x1024xf32>
    %34 = vector.shape_cast %33 : vector<256x1024xf32> to vector<2x128x1024xf32>
    %cst_24 = arith.constant dense<0xFF800000> : vector<2x1024xf32>
    %35 = vector.multi_reduction <maximumf>, %34, %cst_24 [1] : vector<2x128x1024xf32> to vector<2x1024xf32>
    %c0_i32 = arith.constant 0 : i32
    %36 = arith.cmpi eq, %arg1, %c0_i32 : i32
    %37 = arith.extui %36 : i1 to i32
    %c0_i32_25 = arith.constant 0 : i32
    %38 = arith.cmpi ne, %37, %c0_i32_25 : i32
    scf.if %38 {
      %cst_31 = arith.constant 0xFF800000 : f32
      %45 = vector.broadcast %cst_31 : f32 to vector<2x1024xf32>
      %c0_32 = arith.constant 0 : index
      %c0_33 = arith.constant 0 : index
      %46 = vector.load %arg16[%c0_32, %c0_33] : memref<2x1024xf32, #tpu.memory_space<vmem>>, vector<2x1024xf32>
      tpu.vector_store %arg16[%c0_32, %c0_33], %45 {strides = array<i32>} : memref<2x1024xf32, #tpu.memory_space<vmem>>, vector<2x1024xf32>,
    } else {
    }
    %c0_26 = arith.constant 0 : index
    %c0_27 = arith.constant 0 : index
    %39 = vector.load %arg16[%c0_26, %c0_27] : memref<2x1024xf32, #tpu.memory_space<vmem>>, vector<2x1024xf32>
    %40 = arith.maximumf %39, %35 : vector<2x1024xf32>
    %c0_28 = arith.constant 0 : index
    %c0_29 = arith.constant 0 : index
    %41 = vector.load %arg16[%c0_28, %c0_29] : memref<2x1024xf32, #tpu.memory_space<vmem>>, vector<2x1024xf32>
    tpu.vector_store %arg16[%c0_28, %c0_29], %40 {strides = array<i32>} : memref<2x1024xf32, #tpu.memory_space<vmem>>, vector<2x1024xf32>,
    %c1_i32 = arith.constant 1 : i32
    %42 = arith.cmpi eq, %arg1, %c1_i32 : i32
    %43 = arith.extui %42 : i1 to i32
    %c0_i32_30 = arith.constant 0 : i32
    %44 = arith.cmpi ne, %43, %c0_i32_30 : i32
    scf.if %44 {
      %c0_31 = arith.constant 0 : index
      %c0_32 = arith.constant 0 : index
      %45 = vector.load %arg16[%c0_31, %c0_32] : memref<2x1024xf32, #tpu.memory_space<vmem>>, vector<2x1024xf32>
      %46 = arith.truncf %45 : vector<2x1024xf32> to vector<2x1024xbf16>
      %c0_33 = arith.constant 0 : index
      %c0_34 = arith.constant 0 : index
      %47 = vector.load %arg9[%c0_33, %c0_34] : memref<1024x512xbf16, #tpu.memory_space<vmem>>, vector<1024x512xbf16>
      %cst_35 = arith.constant dense<0.000000e+00> : vector<2x512xf32>
      %48 = tpu.matmul %46, %47, %cst_35 {dimension_numbers = #tpu.dot_dimension_numbers<[1], [0], [0], [1], [0, 0, 1, 1], [], []>} : vector<2x1024xbf16>, vector<1024x512xbf16>, vector<2x512xf32> -> vector<2x512xf32>
      %c0_36 = arith.constant 0 : index
      %c0_37 = arith.constant 0 : index
      %49 = vector.load %arg10[%c0_36, %c0_37] : memref<1x512xf32, #tpu.memory_space<vmem>>, vector<1x512xf32>
      %50 = vector.broadcast %49 : vector<1x512xf32> to vector<2x512xf32>
      %51 = arith.addf %48, %50 : vector<2x512xf32>
      %cst_38 = arith.constant 0.000000e+00 : f32
      %52 = vector.broadcast %cst_38 : f32 to vector<2x512xf32>
      %53 = arith.maximumf %51, %52 : vector<2x512xf32>
      %54 = arith.truncf %53 : vector<2x512xf32> to vector<2x512xbf16>
      %c0_39 = arith.constant 0 : index
      %c0_40 = arith.constant 0 : index
      %55 = vector.load %arg11[%c0_39, %c0_40] : memref<512x256xbf16, #tpu.memory_space<vmem>>, vector<512x256xbf16>
      %cst_41 = arith.constant dense<0.000000e+00> : vector<2x256xf32>
      %56 = tpu.matmul %54, %55, %cst_41 {dimension_numbers = #tpu.dot_dimension_numbers<[1], [0], [0], [1], [0, 0, 1, 1], [], []>} : vector<2x512xbf16>, vector<512x256xbf16>, vector<2x256xf32> -> vector<2x256xf32>
      %c0_42 = arith.constant 0 : index
      %c0_43 = arith.constant 0 : index
      %57 = vector.load %arg12[%c0_42, %c0_43] : memref<1x256xf32, #tpu.memory_space<vmem>>, vector<1x256xf32>
      %58 = vector.broadcast %57 : vector<1x256xf32> to vector<2x256xf32>
      %59 = arith.addf %56, %58 : vector<2x256xf32>
      %cst_44 = arith.constant 0.000000e+00 : f32
      %60 = vector.broadcast %cst_44 : f32 to vector<2x256xf32>
      %61 = arith.maximumf %59, %60 : vector<2x256xf32>
      %62 = arith.truncf %61 : vector<2x256xf32> to vector<2x256xbf16>
      %c0_45 = arith.constant 0 : index
      %c0_46 = arith.constant 0 : index
      %63 = vector.load %arg13[%c0_45, %c0_46] : memref<256x128xbf16, #tpu.memory_space<vmem>>, vector<256x128xbf16>
      %cst_47 = arith.constant dense<0.000000e+00> : vector<2x128xf32>
      %64 = tpu.matmul %62, %63, %cst_47 {dimension_numbers = #tpu.dot_dimension_numbers<[1], [0], [0], [1], [0, 0, 1, 1], [], []>} : vector<2x256xbf16>, vector<256x128xbf16>, vector<2x128xf32> -> vector<2x128xf32>
      %c0_48 = arith.constant 0 : index
      %c0_49 = arith.constant 0 : index
      %65 = vector.load %arg14[%c0_48, %c0_49] : memref<1x128xf32, #tpu.memory_space<vmem>>, vector<1x128xf32>
      %66 = vector.broadcast %65 : vector<1x128xf32> to vector<2x128xf32>
      %67 = arith.addf %64, %66 : vector<2x128xf32>
      %c0_50 = arith.constant 0 : index
      %c0_51 = arith.constant 0 : index
      %c0_52 = arith.constant 0 : index
      %68 = vector.load %arg15[%c0_50, %c0_51, %c0_52] : memref<1x2x128xf32, #tpu.memory_space<vmem>>, vector<1x2x128xf32>
      %69 = vector.shape_cast %68 : vector<1x2x128xf32> to vector<2x128xf32>
      %70 = vector.shape_cast %67 : vector<2x128xf32> to vector<1x2x128xf32>
      tpu.vector_store %arg15[%c0_50, %c0_51, %c0_52], %70 {strides = array<i32>} : memref<1x2x128xf32, #tpu.memory_space<vmem>>, vector<1x2x128xf32>,
    } else {
    }
    return
  }
  func.func @transform_0(%arg0: i32, %arg1: i32) -> (i32, i32, i32) {
    %c0_i32 = arith.constant 0 : i32
    %c0_i32_0 = arith.constant 0 : i32
    return %arg0, %c0_i32, %arg1 : i32, i32, i32
  }
  func.func @transform_1(%arg0: i32, %arg1: i32) -> (i32, i32) {
    %c0_i32 = arith.constant 0 : i32
    %c0_i32_0 = arith.constant 0 : i32
    %c0_i32_1 = arith.constant 0 : i32
    return %c0_i32, %c0_i32_0 : i32, i32
  }
  func.func @transform_2(%arg0: i32, %arg1: i32) -> (i32, i32) {
    %c0_i32 = arith.constant 0 : i32
    %c0_i32_0 = arith.constant 0 : i32
    %c0_i32_1 = arith.constant 0 : i32
    return %c0_i32, %c0_i32_0 : i32, i32
  }
  func.func @transform_3(%arg0: i32, %arg1: i32) -> (i32, i32) {
    %c0_i32 = arith.constant 0 : i32
    %c0_i32_0 = arith.constant 0 : i32
    %c0_i32_1 = arith.constant 0 : i32
    return %c0_i32, %c0_i32_0 : i32, i32
  }
  func.func @transform_4(%arg0: i32, %arg1: i32) -> (i32, i32) {
    %c0_i32 = arith.constant 0 : i32
    %c0_i32_0 = arith.constant 0 : i32
    %c0_i32_1 = arith.constant 0 : i32
    return %c0_i32, %c0_i32_0 : i32, i32
  }
  func.func @transform_5(%arg0: i32, %arg1: i32) -> (i32, i32) {
    %c0_i32 = arith.constant 0 : i32
    %c0_i32_0 = arith.constant 0 : i32
    %c0_i32_1 = arith.constant 0 : i32
    return %c0_i32, %c0_i32_0 : i32, i32
  }
  func.func @transform_6(%arg0: i32, %arg1: i32) -> (i32, i32) {
    %c0_i32 = arith.constant 0 : i32
    %c0_i32_0 = arith.constant 0 : i32
    %c0_i32_1 = arith.constant 0 : i32
    return %c0_i32, %c0_i32_0 : i32, i32
  }
  func.func @transform_7(%arg0: i32, %arg1: i32) -> (i32, i32) {
    %c0_i32 = arith.constant 0 : i32
    %c0_i32_0 = arith.constant 0 : i32
    %c0_i32_1 = arith.constant 0 : i32
    return %c0_i32, %c0_i32_0 : i32, i32
  }
  func.func @transform_8(%arg0: i32, %arg1: i32) -> (i32, i32) {
    %c0_i32 = arith.constant 0 : i32
    %c0_i32_0 = arith.constant 0 : i32
    %c0_i32_1 = arith.constant 0 : i32
    return %c0_i32, %c0_i32_0 : i32, i32
  }
  func.func @transform_9(%arg0: i32, %arg1: i32) -> (i32, i32) {
    %c0_i32 = arith.constant 0 : i32
    %c0_i32_0 = arith.constant 0 : i32
    %c0_i32_1 = arith.constant 0 : i32
    return %c0_i32, %c0_i32_0 : i32, i32
  }
  func.func @transform_10(%arg0: i32, %arg1: i32) -> (i32, i32) {
    %c0_i32 = arith.constant 0 : i32
    %c0_i32_0 = arith.constant 0 : i32
    %c0_i32_1 = arith.constant 0 : i32
    return %c0_i32, %c0_i32_0 : i32, i32
  }
  func.func @transform_11(%arg0: i32, %arg1: i32) -> (i32, i32) {
    %c0_i32 = arith.constant 0 : i32
    %c0_i32_0 = arith.constant 0 : i32
    %c0_i32_1 = arith.constant 0 : i32
    return %c0_i32, %c0_i32_0 : i32, i32
  }
  func.func @transform_12(%arg0: i32, %arg1: i32) -> (i32, i32) {
    %c0_i32 = arith.constant 0 : i32
    %c0_i32_0 = arith.constant 0 : i32
    %c0_i32_1 = arith.constant 0 : i32
    return %c0_i32, %c0_i32_0 : i32, i32
  }
  func.func @transform_13(%arg0: i32, %arg1: i32) -> (i32, i32, i32) {
    %c0_i32 = arith.constant 0 : i32
    %c0_i32_0 = arith.constant 0 : i32
    %c0_i32_1 = arith.constant 0 : i32
    return %arg0, %c0_i32, %c0_i32_0 : i32, i32, i32
  }
}

</mosaic_0001>

<bundles_post_ra>
// kernel: tpu_custom_call.1
= control target key start
LH: loop header
LB: loop body
LE: loop exit
PB: predicated region body
PF: predicated region fallthrough
CT: control target
= control target key end

     0   :  { %s8885_s0 = inlined_call_operand.hbm [shape: f32[4,8,256], index: 0, kind: input, shape index: {}]   ;;  %s8886_s1 = inlined_call_operand.hbm [shape: bf16[8,64], index: 1, kind: input, shape index: {}]   ;;  %s8887_s2 = inlined_call_operand.vmem [shape: f32[1,64], index: 2, kind: input, shape index: {}]   ;;  %s8888_s3 = inlined_call_operand.hbm [shape: bf16[64,128], index: 3, kind: input, shape index: {}]   ;;  %s8889_s4 = inlined_call_operand.hbm [shape: f32[1,128], index: 4, kind: input, shape index: {}]   ;;  %s8890_s5 = inlined_call_operand.hbm [shape: bf16[128,1024], index: 5, kind: input, shape index: {}]   ;;  %s8891_s6 = inlined_call_operand.vmem [shape: f32[1,1024], index: 6, kind: input, shape index: {}]   ;;  %s8892_s7 = inlined_call_operand.hbm [shape: bf16[1024,512], index: 7, kind: input, shape index: {}]   ;;  %s8893_s8 = inlined_call_operand.vmem [shape: f32[1,512], index: 8, kind: input, shape index: {}]   ;;  %s8894_s9 = inlined_call_operand.hbm [shape: bf16[512,256], index: 9, kind: input, shape index: {}]   ;;  %s8895_s10 = inlined_call_operand.vmem [shape: f32[1,256], index: 10, kind: input, shape index: {}]   ;;  %s8896_s11 = inlined_call_operand.hbm [shape: bf16[256,128], index: 11, kind: input, shape index: {}]   ;;  %s8897_s12 = inlined_call_operand.vmem [shape: f32[1,128], index: 12, kind: input, shape index: {}]   ;;  %s8898_s13 = inlined_call_operand.hbm [shape: f32[2,2,128], index: 13, kind: output, shape index: {}]  }
   0x1   :  { %8914 = sst [smem:[#allocation27_spill]] %s8885_s0 }
   0x2   :  { %8915 = sst [smem:[#allocation28_spill]] %s8886_s1 }
   0x3   :  { %8916 = sst [smem:[#allocation29_spill]] %s8887_s2 }
   0x4   :  { %8917 = sst [smem:[#allocation30_spill]] %s8888_s3 }
   0x5   :  { %8918 = sst [smem:[#allocation31_spill]] %s8889_s4 }
   0x6   :  { %8919 = sst [smem:[#allocation32_spill]] %s8890_s5 }
   0x7   :  { %8920 = sst [smem:[#allocation33_spill]] %s8891_s6 }
   0x8   :  { %8921 = sst [smem:[#allocation34_spill]] %s8892_s7 }
   0x9   :  { %8922 = sst [smem:[#allocation35_spill]] %s8893_s8 }
   0xa   :  { %8923 = sst [smem:[#allocation36_spill]] %s8894_s9 }
   0xb   :  { %8924 = sst [smem:[#allocation37_spill]] %s8895_s10 }
   0xc   :  { %8925 = sst [smem:[#allocation38_spill]] %s8897_s12 }
   0xd   :  { %8926 = sst [smem:[#allocation39_spill]] %s8898_s13 }
   0xe   :  { %18 = vsyncpa [#allocation4], 0 }
   0xf   :  { %20 = vsyncpa [#allocation4 + $0x1], 0 }
  0x10   :  { %21 = vsyncpa [#allocation7], 0 }
  0x11   :  { %22 = vsyncpa [#allocation10], 0 }
  0x12   :  { %23 = vsyncpa [#allocation13], 0 }
  0x13   :  { %24 = vsyncpa [#allocation16], 0 }
  0x14   :  { %25 = vsyncpa [#allocation5], 0 }
  0x15   :  { %27 = vsyncpa [#allocation5 + $0x1], 0  ;;  %s7766_s25 = smov 0   ;;  %s7768_s26 = smov 0  }
  0x16   :  { %s7770_s27 = smov 0   ;;  %s7772_s28 = smov 0  }
  0x17   :  { %s7774_s29 = smov 0   ;;  %s7776_s30 = smov 0  }
  0x18   :  { %s7778_s14 = smov 0   ;;  %s7780_s15 = smov 0  }
  0x19   :  { %s7782_s16 = smov 0   ;;  %s7784_s17 = smov 0  }
  0x1a   :  { %s7786_s18 = smov 0  }
  0x1b LB: > { %8927 = sst [smem:[#allocation24_spill]] %s7658_s14  ;;  %s8900_s19 = sadd.s32 4294967295, %s7674_s18   ;;  %s7674_s18 = sphi %s7786_s18, %s33_s18   ;;  %s7670_s17 = sphi %s7784_s17, %s8976_s17   ;;  %s7666_s16 = sphi %s7782_s16, %s8975_s16   ;;  %s7662_s15 = sphi %s7780_s15, %s8974_s15   ;;  %s7658_s14 = sphi %s7778_s14, %s8973_s14   ;;  %s7654_s30 = sphi %s7776_s30, %s8972_s30   ;;  %s7650_s29 = sphi %s7774_s29, %s8971_s29   ;;  %s7646_s28 = sphi %s7772_s28, %s8970_s28   ;;  %s7642_s27 = sphi %s7770_s27, %s8969_s27   ;;  %s7638_s26 = sphi %s7768_s26, %s8968_s26   ;;  %s7634_s25 = sphi %s7766_s25, %s8967_s25  }
  0x1c   : > { %8928 = sst [smem:[#allocation25_spill]] %s7662_s15  ;;  %p5974_p0 = scmp.ge.s32.totalorder %s7674_s18, 1 }
  0x1d   : > { %p7825_p1 = scmp.eq.s32.totalorder %s8900_s19, 0  ;;  %p356_p2 = scmp.lt.s32.totalorder %s7674_s18, 5 }
  0x1e   : > { %s7676_s22 = smov [#allocation6]   ;;  %s7677_s24 = smov [#allocation9]  }
  0x1f   : > { %s8929_s20 = scalar_select %p7825_p1, 1, 0 }
  0x20   : > { %p7830_p3 = pnand %p5974_p0, %p356_p2  ;;  %s369_s23 = sshll.u32 %s7676_s22, 4  ;;  %s370_s23 = int_to_ptr.vmem [resolvable:$true] %s369_s23 }
  0x21   : > { %s396_s13 = sshll.u32 %s7677_s24, 4  ;;  %s7678_s15 = smov [#allocation12]   ;;  %s7842_s13 = int_to_ptr.vmem [resolvable:$true] %s396_s13 }
  0x22   : > { %s8930_s21 = scalar_select %p7830_p3, 1, 0 }
  0x23   : > { %p6654_p4 = pneg %p7830_p3  ;;  %s422_s12 = sshll.u32 %s7678_s15, 4  ;;  %s7844_s12 = int_to_ptr.vmem [resolvable:$true] %s422_s12 }
  0x24   : > { %8931 = sst [smem:[#allocation26_spill]] %s8930_s21  ;;  %s8933_s1 = sld [smem:[#allocation28_spill]] }
  0x25   : > { %p7838_p5 = pnand %p6654_p4, %p7825_p1 }
  0x27   : > { %p7854_p7 = pneg %p7838_p5 }
  0x2a   : > { %s7310_s22 = scalar_lea.hbm %s8933_s1, 64 }
  0x2b   : > { %p7311_p6 = scmp.ne.s32.totalorder %s8933_s1, %s7310_s22  ;;  %p7317_p10 = scmp.lt.u32.totalorder %s7310_s22, %s8933_s1 }
  0x2d   : > { %p7313_p8 = pnand %p7854_p7, %p7311_p6 }
  0x2f   : > { %p7314_p9 = pneg %p7313_p8 }
  0x31   : > { %p7319_p11 = pnand %p7317_p10, %p7314_p9 }
  0x33   : > { %7322 = shalt.err (!%p7319_p11)
}
  0x34   : > { %s7323_s8 = scalar_lea.vmem %s370_s23, 64  ;;  %p7331_p2 = scmp.lt.s32.totalorder %s370_s23, %s370_s23 }
  0x35   : > { %p7324_p12 = scmp.ne.s32.totalorder %s370_s23, %s7323_s8  ;;  %p7332_p4 = scmp.lt.s32.totalorder %s7323_s8, %s7323_s8 }
  0x37   : > { %p7326_p13 = pnand %p7324_p12, %p7854_p7  ;;  %p7333_p3 = por %p7332_p4, %p7331_p2 }
  0x39   : > { %p7327_p0 = pneg %p7326_p13 }
  0x3b   : > { %p7334_p1 = pnand %p7333_p3, %p7327_p0 }
  0x3d   : > { %7337 = shalt.err (!%p7334_p1)
}
  0x3e   : > { %6657 = dma.hbm_to_vmem [thread:$0]  (!%p7838_p5), %s8933_s1, 64, %s370_s23, [#allocation7]  }
  0x3f   : > { %s8935_s4 = sld [smem:[#allocation31_spill]] }
  0x45   : > { %s7338_s22 = scalar_lea.hbm %s8935_s4, 16 }
  0x46   : > { %p7339_p6 = scmp.ne.s32.totalorder %s8935_s4, %s7338_s22  ;;  %p7345_p1 = scmp.lt.u32.totalorder %s7338_s22, %s8935_s4 }
  0x48   : > { %p7341_p8 = pnand %p7339_p6, %p7854_p7 }
  0x4a   : > { %p7342_p9 = pneg %p7341_p8 }
  0x4c   : > { %p7347_p3 = pnand %p7345_p1, %p7342_p9 }
  0x4e   : > { %7350 = shalt.err (!%p7347_p3)
}
  0x4f   : > { %s7351_s23 = scalar_lea.vmem %s7842_s13, 16  ;;  %s7358_s21 = scalar_lea.vmem %s7842_s13, 32 }
  0x50   : > { %p7352_p10 = scmp.ne.s32.totalorder %s7842_s13, %s7351_s23  ;;  %p7359_p13 = scmp.lt.s32.totalorder %s7842_s13, %s7842_s13 }
  0x51   : > { %p7360_p0 = scmp.lt.s32.totalorder %s7358_s21, %s7351_s23 }
  0x52   : > { %p7354_p11 = pnand %p7352_p10, %p7854_p7 }
  0x53   : > { %p7361_p2 = por %p7360_p0, %p7359_p13 }
  0x54   : > { %p7355_p12 = pneg %p7354_p11 }
  0x56   : > { %p7362_p4 = pnand %p7361_p2, %p7355_p12 }
  0x58   : > { %7365 = shalt.err (!%p7362_p4)
}
  0x59   : > { %6663 = dma.hbm_to_vmem [thread:$0]  (!%p7838_p5), %s8935_s4, 16, %s7842_s13, [#allocation10]  }
  0x5a   : > { %s8936_s7 = sld [smem:[#allocation34_spill]] }
  0x60   : > { %s7366_s14 = scalar_lea.hbm %s8936_s7, 32768 }
  0x61   : > { %p7367_p6 = scmp.ne.s32.totalorder %s8936_s7, %s7366_s14  ;;  %p7373_p1 = scmp.lt.u32.totalorder %s7366_s14, %s8936_s7 }
  0x63   : > { %p7369_p8 = pnand %p7367_p6, %p7854_p7 }
  0x65   : > { %p7370_p9 = pneg %p7369_p8 }
  0x67   : > { %p7375_p3 = pnand %p7373_p1, %p7370_p9 }
  0x69   : > { %7378 = shalt.err (!%p7375_p3)
}
  0x6a   : > { %s7379_s13 = scalar_lea.vmem %s7844_s12, 32768  ;;  %p7387_p13 = scmp.lt.s32.totalorder %s7844_s12, %s7844_s12 }
  0x6b   : > { %p7380_p10 = scmp.ne.s32.totalorder %s7844_s12, %s7379_s13  ;;  %p7388_p0 = scmp.lt.s32.totalorder %s7379_s13, %s7379_s13 }
  0x6d   : > { %p7382_p11 = pnand %p7380_p10, %p7854_p7  ;;  %p7389_p2 = por %p7388_p0, %p7387_p13 }
  0x6f   : > { %p7383_p12 = pneg %p7382_p11 }
  0x71   : > { %p7390_p4 = pnand %p7389_p2, %p7383_p12 }
  0x73   : > { %7393 = shalt.err (!%p7390_p4)
}
  0x74   : > { %s8907_s21 = smov 256   ;;  %s7680_s0 = smov 16  }
  0x75   : > { %6669 = dma.hbm_to_vmem [thread:$0]  (!%p7838_p5), %s8936_s7, 32768, %s7844_s12, [#allocation13], %s8907_s21, %s8907_s21, %s7680_s0  }
  0x76   : > { %s7681_s2 = smov [#allocation8]   ;;  %s8937_s3 = sld [smem:[#allocation30_spill]] }
  0x77   : > { %s382_s14 = sshll.u32 %s7681_s2, 4  ;;  %s383_s14 = int_to_ptr.vmem [resolvable:$true] %s382_s14 }
  0x7c   : > { %s7394_s8 = scalar_lea.hbm %s8937_s3, 512 }
  0x7d   : > { %p7395_p6 = scmp.ne.s32.totalorder %s8937_s3, %s7394_s8  ;;  %p7401_p1 = scmp.lt.u32.totalorder %s7394_s8, %s8937_s3 }
  0x7f   : > { %p7397_p8 = pnand %p7395_p6, %p7854_p7 }
  0x81   : > { %p7398_p9 = pneg %p7397_p8 }
  0x83   : > { %p7403_p3 = pnand %p7401_p1, %p7398_p9 }
  0x85   : > { %7406 = shalt.err (!%p7403_p3)
}
  0x86   : > { %s7407_s12 = scalar_lea.vmem %s383_s14, 512  ;;  %p7415_p13 = scmp.lt.s32.totalorder %s383_s14, %s383_s14 }
  0x87   : > { %p7408_p10 = scmp.ne.s32.totalorder %s383_s14, %s7407_s12  ;;  %p7416_p0 = scmp.lt.s32.totalorder %s7407_s12, %s7407_s12 }
  0x89   : > { %p7410_p11 = pnand %p7408_p10, %p7854_p7  ;;  %p7417_p2 = por %p7416_p0, %p7415_p13 }
  0x8b   : > { %p7411_p12 = pneg %p7410_p11 }
  0x8d   : > { %p7418_p4 = pnand %p7417_p2, %p7411_p12 }
  0x8f   : > { %7421 = shalt.err (!%p7418_p4)
}
  0x90   : > { %s8908_s0 = smov 64   ;;  %s8909_s6 = smov 4  }
  0x91   : > { %6660 = dma.hbm_to_vmem [thread:$0]  (!%p7838_p5), %s8937_s3, 512, %s383_s14, [#allocation7], %s8908_s0, %s8908_s0, %s8909_s6  }
  0x92   : > { %s7684_s10 = smov [#allocation11]   ;;  %s8938_s5 = sld [smem:[#allocation32_spill]] }
  0x93   : > { %s406_s2 = sshll.u32 %s7684_s10, 4  ;;  %s407_s2 = int_to_ptr.vmem [resolvable:$true] %s406_s2 }
  0x98   : > { %s7422_s8 = scalar_lea.hbm %s8938_s5, 8192 }
  0x99   : > { %p7423_p6 = scmp.ne.s32.totalorder %s8938_s5, %s7422_s8  ;;  %p7429_p1 = scmp.lt.u32.totalorder %s7422_s8, %s8938_s5 }
  0x9b   : > { %p7425_p8 = pnand %p7423_p6, %p7854_p7 }
  0x9d   : > { %p7426_p9 = pneg %p7425_p8 }
  0x9f   : > { %p7431_p3 = pnand %p7429_p1, %p7426_p9 }
  0xa1   : > { %7434 = shalt.err (!%p7431_p3)
}
  0xa2   : > { %s7435_s14 = scalar_lea.vmem %s407_s2, 8192  ;;  %p7443_p13 = scmp.lt.s32.totalorder %s407_s2, %s407_s2 }
  0xa3   : > { %p7436_p10 = scmp.ne.s32.totalorder %s407_s2, %s7435_s14  ;;  %p7444_p0 = scmp.lt.s32.totalorder %s7435_s14, %s7435_s14 }
  0xa5   : > { %p7438_p11 = pnand %p7436_p10, %p7854_p7  ;;  %p7445_p2 = por %p7444_p0, %p7443_p13 }
  0xa7   : > { %p7439_p12 = pneg %p7438_p11 }
  0xa9   : > { %p7446_p4 = pnand %p7445_p2, %p7439_p12 }
  0xab   : > { %7449 = shalt.err (!%p7446_p4)
}
  0xac   : > { %s7685_s1 = smov 512   ;;  %s7686_s4 = smov 32  }
  0xad   : > { %6666 = dma.hbm_to_vmem [thread:$0]  (!%p7838_p5), %s8938_s5, 8192, %s407_s2, [#allocation10], %s7685_s1, %s7685_s1, %s7686_s4  }
  0xae   : > { %s7687_s22 = smov [#allocation14]   ;;  %s8939_s9 = sld [smem:[#allocation36_spill]] }
  0xaf   : > { %s438_s15 = sshll.u32 %s7687_s22, 4  ;;  %s439_s15 = int_to_ptr.vmem [resolvable:$true] %s438_s15 }
  0xb4   : > { %s7450_s13 = scalar_lea.hbm %s8939_s9, 8192 }
  0xb5   : > { %p7451_p6 = scmp.ne.s32.totalorder %s8939_s9, %s7450_s13  ;;  %p7457_p1 = scmp.lt.u32.totalorder %s7450_s13, %s8939_s9 }
  0xb7   : > { %p7453_p8 = pnand %p7451_p6, %p7854_p7 }
  0xb9   : > { %p7454_p9 = pneg %p7453_p8 }
  0xbb   : > { %p7459_p3 = pnand %p7457_p1, %p7454_p9 }
  0xbd   : > { %7462 = shalt.err (!%p7459_p3)
}
  0xbe   : > { %s7463_s2 = scalar_lea.vmem %s439_s15, 8192  ;;  %p7471_p13 = scmp.lt.s32.totalorder %s439_s15, %s439_s15 }
  0xbf   : > { %p7464_p10 = scmp.ne.s32.totalorder %s439_s15, %s7463_s2  ;;  %p7472_p0 = scmp.lt.s32.totalorder %s7463_s2, %s7463_s2 }
  0xc1   : > { %p7466_p11 = pnand %p7464_p10, %p7854_p7  ;;  %p7473_p2 = por %p7472_p0, %p7471_p13 }
  0xc3   : > { %p7467_p12 = pneg %p7466_p11 }
  0xc5   : > { %p7474_p4 = pnand %p7473_p2, %p7467_p12 }
  0xc7   : > { %7477 = shalt.err (!%p7474_p4)
}
  0xc8   : > { %s8910_s1 = smov 128   ;;  %s8911_s4 = smov 8  }
  0xc9   : > { %6672 = dma.hbm_to_vmem [thread:$0]  (!%p7838_p5), %s8939_s9, 8192, %s439_s15, [#allocation13], %s8910_s1, %s8910_s1, %s8911_s4  }
  0xca   : > { %s7690_s21 = smov [#allocation15]   ;;  %s7478_s23 = scalar_lea.hbm %s8896_s11, 2048 }
  0xcb   : > { %s454_s10 = sshll.u32 %s7690_s21, 4  ;;  %p7479_p6 = scmp.ne.s32.totalorder %s8896_s11, %s7478_s23  ;;  %s455_s10 = int_to_ptr.vmem [resolvable:$true] %s454_s10 }
  0xcc   : > { %p7485_p1 = scmp.lt.u32.totalorder %s7478_s23, %s8896_s11 }
  0xcd   : > { %p7481_p8 = pnand %p7479_p6, %p7854_p7 }
  0xcf   : > { %p7482_p9 = pneg %p7481_p8 }
  0xd1   : > { %p7487_p3 = pnand %p7485_p1, %p7482_p9 }
  0xd3   : > { %7490 = shalt.err (!%p7487_p3)
}
  0xd4   : > { %s7491_s15 = scalar_lea.vmem %s455_s10, 2048  ;;  %p7499_p13 = scmp.lt.s32.totalorder %s455_s10, %s455_s10 }
  0xd5   : > { %p7492_p10 = scmp.ne.s32.totalorder %s455_s10, %s7491_s15  ;;  %p7500_p0 = scmp.lt.s32.totalorder %s7491_s15, %s7491_s15 }
  0xd7   : > { %p7494_p11 = pnand %p7492_p10, %p7854_p7  ;;  %p7501_p2 = por %p7500_p0, %p7499_p13 }
  0xd9   : > { %p7495_p12 = pneg %p7494_p11 }
  0xdb   : > { %p7502_p4 = pnand %p7501_p2, %p7495_p12 }
  0xdd   : > { %7505 = shalt.err (!%p7502_p4)
}
  0xde   : > { %s8940_s0 = smov 4   ;;  %s8941_s6 = smov 64  }
  0xdf   : > { %6675 = dma.hbm_to_vmem [thread:$0]  (!%p7838_p5), %s8896_s11, 2048, %s455_s10, [#allocation16], %s8941_s6, %s8941_s6, %s8940_s0  }
  0xe0   : > { %s5973_s19 = sadd.s32 4294967294, %s7674_s18   ;;  %s42_s24 = sadd.s32 1, %s7666_s16 }
  0xe1   : > { %s45_s8 = sadd.s32 1, %s7670_s17  ;;  %p43_p7 = scmp.ge.s32.totalorder %s42_s24, 2 }
  0xe2   : > { %s54_s23 = sadd.s32 1, %s7654_s30  ;;  %p61_p6 = scmp.ne.s32.totalorder %s7654_s30, %s7650_s29 }
  0xe3   : > { %p62_p8 = scmp.eq.s32.totalorder %s7674_s18, 0  ;;  %s8978_s24 = smov (%p43_p7, %s42_s24), 0 }
  0xe4   : > { %s8980_s8 = smov (!%p43_p7, %s45_s8), %s7670_s17  ;;  %s50_s13 = ssub.s32 %s7666_s16, %s8978_s24 }
  0xe5   : > { %p8012_p5 = por %p62_p8, %p61_p6  ;;  %p47_p9 = scmp.ge.s32.totalorder %s8980_s8, 2 }
  0xe6   : > { %p67_p1 = scmp.ne.s32.totalorder %s7650_s29, %s7646_s28  ;;  %s332_s12 = sadd.s32 1, %s7642_s27 }
  0xe7   : > { %p342_p3 = scmp.ne.s32.totalorder %s7642_s27, %s7638_s26  ;;  %s8982_s8 = smov (%p47_p9, %s8980_s8), 0 }
  0xe8   : > { %p8943_p10 = scmp.ne.s32.totalorder %s8929_s20, 0  ;;  %s8945_s2 = sadd.s32 4294967295, %s7674_s18  }
  0xe9   : > { %p343_p12 = scmp.eq.s32.totalorder %s8945_s2, 3  ;;  %s49_s15 = ssub.s32 %s7670_s17, %s8982_s8 }
  0xea   : > { %p8025_p11 = por %p8943_p10, %p67_p1  ;;  %p348_p13 = scmp.ne.s32.totalorder %s7638_s26, %s7634_s25 }
  0xeb   : > { %s51_s0 = sor.u32 %s50_s13, %s49_s15  ;;  %p330_p0 = scmp.eq.s32.totalorder %s49_s15, 0 }
  0xec   : > { %p52_p2 = scmp.eq.s32.totalorder %s51_s0, 0  ;;  %p8035_p4 = por %p343_p12, %p342_p3 }
  0xed   : > { %s8040_s6 = scalar_select %p330_p0, %s7642_s27, %s332_s12  }
  0xee   : > { %s8946_s28 = scalar_select %p8035_p4, 1, 0 }
  0xef   : > { %s8043_s21 = scalar_select %p52_p2, %s7654_s30, %s54_s23  }
  0xf0   : > { %p349_p7 = scmp.eq.s32.totalorder %s5973_s19, 3  ;;  %p6691_p6 = scmp.lt.s32.totalorder %s7674_s18, 4 }
  0xf1   : > { %s471_s22 = sand.u32 1, %s7654_s30   ;;  %s6443_s1 = sshll.u32 %s7670_s17, 2 }
  0xf2   : > { %p8048_p8 = por %p349_p7, %p348_p13  ;;  %s5983_s13 = sshll.u32 %s471_s22, 4 }
  0xf3   : > { %s481_s15 = sadd.s32 %s7666_s16, %s6443_s1  ;;  %s8948_s5 = sld [smem:[#allocation27_spill]] }
  0xf4   : > { %s8947_s2 = scalar_select %p8048_p8, 1, 0 }
  0xf5   : > { %s5986_s0 = sshll.u32 %s481_s15, 7  ;;  %s475_s19 = scalar_lea.vmem [#allocation3], %s5983_s13 }
  0xf6   : > { %s484_s23 = sshll.u32 %s475_s19, 4  ;;  %p8062_p9 = pnand %p6691_p6, %p8012_p5  ;;  %s8058_s23 = int_to_ptr.vmem [resolvable:$true] %s484_s23 }
  0xf7   : > { %s8066_s1 = scalar_lea.sflag [#allocation4], %s471_s22 }
  0xf8   : > { %p7508_p3 = pneg %p8062_p9 }
  0xf9   : > { %s8056_s7 = scalar_lea.hbm %s8948_s5, %s5986_s0  ;;  %s7511_s10 = scalar_lea.hbm %s8948_s5, 1024 }
  0xfa   : > { %s7506_s3 = scalar_lea.hbm %s8056_s7, 256  ;;  %p7512_p5 = scmp.lt.u32.totalorder %s8056_s7, %s8948_s5 }
  0xfb   : > { %p7507_p1 = scmp.ne.s32.totalorder %s8056_s7, %s7506_s3  ;;  %p7513_p13 = scmp.lt.u32.totalorder %s7511_s10, %s7506_s3 }
  0xfc   : > { %p7515_p2 = scmp.lt.u32.totalorder %s7506_s3, %s8056_s7 }
  0xfd   : > { %p7509_p10 = pnand %p7508_p3, %p7507_p1  ;;  %p7514_p0 = por %p7513_p13, %p7512_p5 }
  0xff   : > { %p7510_p12 = pneg %p7509_p10  ;;  %p7516_p7 = por %p7515_p2, %p7514_p0 }
 0x101   : > { %p7517_p6 = pnand %p7516_p7, %p7510_p12 }
 0x103   : > { %7520 = shalt.err (!%p7517_p6)
}
 0x104   : > { %s7521_s22 = scalar_lea.vmem %s8058_s23, 256  ;;  %s7691_s19 = smov [#allocation3]  }
 0x105   : > { %p7522_p1 = scmp.ne.s32.totalorder %s8058_s23, %s7521_s22  ;;  %s7526_s4 = sshll.u32 %s7691_s19, 4  ;;  %s7527_s4 = int_to_ptr.vmem [resolvable:$false] %s7526_s4 }
 0x106   : > { %s7528_s13 = scalar_lea.vmem %s7527_s4, 512  ;;  %p7529_p4 = scmp.lt.s32.totalorder %s8058_s23, %s7527_s4 }
 0x107   : > { %p7524_p10 = pnand %p7522_p1, %p7508_p3  ;;  %p7530_p5 = scmp.lt.s32.totalorder %s7528_s13, %s7521_s22 }
 0x109   : > { %p7525_p8 = pneg %p7524_p10  ;;  %p7531_p13 = por %p7530_p5, %p7529_p4 }
 0x10b   : > { %p7532_p0 = pnand %p7531_p13, %p7525_p8 }
 0x10d   : > { %7535 = shalt.err (!%p7532_p0)
}
 0x10e   : > { %s8950_s3 = smov 8   ;;  %s8951_s10 = smov 128  }
 0x10f   : > { %s8952_s15 = smov 256   ;;  %s8953_s0 = sld [smem:[#allocation26_spill]] }
 0x110   : > { %6679 = dma.hbm_to_vmem [thread:$0]  (!%p8062_p9), %s8056_s7, 256, %s8058_s23, %s8066_s1, %s8952_s15, %s8951_s10, %s8950_s3  }
 0x115   : > { %p8954_p3 = scmp.ne.s32.totalorder %s8953_s0, 0 }
 0x116   : > { %s498_s19 = sand.u32 (!%p8954_p3), 1, %s7650_s29  }
 0x117   : > { %496 = sbr.rel (%p8954_p3) target bundleno = 2376 (0x948), region = 72  ;;  %s5988_s4 = sshll.u32 (!%p8954_p3), %s498_s19, 4 }
 0x118   : > { %s499_s22 = scalar_lea.sflag (!%p8954_p3), [#allocation4], %s498_s19  ;;  %s502_s13 = scalar_lea.vmem (!%p8954_p3), [#allocation3], %s5988_s4 }
 0x11e   : > { %7609 = dma.done.wait (%p8025_p11), %s499_s22, 256  }
 0x11f   : > { %7611 = vsyncadd (%p8025_p11), %s499_s22, 4294967040  ;;  %p8955_p4 = scmp.ne.s32.totalorder %s8929_s20, 0 }
 0x121   : > { %7613 = dma.done.wait (%p8955_p4), [#allocation7], 576  }
 0x122   : > { %7615 = vsyncadd (%p8955_p4), [#allocation7], 4294966720 }
 0x123   : > { %7617 = dma.done.wait (%p8955_p4), [#allocation10], 8208  }
 0x124   : > { %7619 = vsyncadd (%p8955_p4), [#allocation10], 4294959088 }
 0x125   : > { %7621 = dma.done.wait (%p8955_p4), [#allocation13], 40960  }
 0x126   : > { %7623 = vsyncadd (%p8955_p4), [#allocation13], 4294926336 }
 0x127   : > { %7625 = dma.done.wait (%p8955_p4), [#allocation16], 2048  }
 0x128   : > { %7627 = vsyncadd (%p8955_p4), [#allocation16], 4294965248  ;;  %v575_v0 = vld [vmem:[%s502_s13] sm:$0xff]  ;;  %s570_s7 = sand.u32 1, %s7638_s26   ;;  %vm642_vm0 = vcmask 1043456   ;;  %v6005_v3 = vld [vmem:[%s502_s13 + $0x8] sm:$0xff] }
 0x129   : > { %576 = vxpose.xlu0.b32.start.end [1/1] (short) %v575_v0, 128  ;;  %v616_v1 = vld [vmem:[#allocation6] sm:$0xf]  ;;  %s8123_s14 = sshll.u32 %s570_s7, 1  ;;  %v6807_v4 = vld [vmem:[#allocation8] sm:$0xff]   ;;  %vm617_vm1 = vcmask 64512   ;;  %v6808_v11 = vld [vmem:[#allocation8 + $0x8] sm:$0xff]  }
 0x12a   : > { %6620 = vmatprep.subr.msk.bf16.mxu0 %vm642_vm0, %v616_v1  ;;  %v644_v2 = vsel %vm642_vm0, %v616_v1, 0  ;;  %6621 = vmatprep.subr.msk.bf16.mxu1 %vm642_vm0, %v616_v1  ;;  %v6809_v13 = vld [vmem:[#allocation8 + $0x10] sm:$0xff]   ;;  %v6810_v46 = vld [vmem:[#allocation8 + $0x18] sm:$0xff]   ;;  %v8141_v56 = vld [vmem:[#allocation11] sm:$0xff]  ;;  %s8956_s12 = sld [smem:[#allocation29_spill]]  ;;  %vm1032_vm2 = vcmask 523264  }
 0x12b   : > { %6505 = vmatpush3.bf16.msra.mxu0 %v644_v2  ;;  %6523 = vmatpush3.bf16.msra.mxu1 %v644_v2  ;;  %v8143_v57 = vld [vmem:[#allocation11 + $0x20] sm:$0xff]  ;;  %v1291_v58 = vld [vmem:[#allocation11 + $0x8] sm:$0xff]  ;;  %s8957_s10 = sld [smem:[#allocation33_spill]]  ;;  %s572_s19 = scalar_lea.vmem [#allocation17], %s8123_s14 }
 0x12c   : > { %6540 = vmatprep.subr.bf16.mxu0 %v6807_v4  ;;  %6580 = vmatprep.subr.bf16.mxu1 %v6807_v4  ;;  %v6036_v59 = vcombine.low %v8141_v56, %v8143_v57  ;;  %v6037_v60 = vcombine.high %v8141_v56, %v8143_v57  ;;  %v1295_v61 = vld [vmem:[#allocation11 + $0x28] sm:$0xff]  ;;  %s8958_s4 = sld [smem:[#allocation24_spill]] }
 0x12d   : > { %v6039_v62 = vcombine.high %v1291_v58, %v1295_v61 }
 0x130   : > { %v8152_v63 = vld [vmem:[%s8956_s12] ss:$0 sm:$0xff] }
 0x132   : > { %p6100_p11 = scmp.ne.s32.totalorder %s8958_s4, 0 }
 0x166   : > { %745 = vxpose.xlu0.b32.start.end [1/1] (short) %v6005_v3, 128 }
 0x1a9   : > { %v592_v5 = vpop.trf.xlu0 }
 0x1ad   : > { %v593_v6 = vpop.trf.xlu0 }
 0x1ae   : > { %v608_v7 = vpack.c.bf16 %v593_v6, %v592_v5 }
 0x1b0   : > { %6506 = vmatprep.mubr.msk.bf16.mxu0 %vm617_vm1, %v608_v7 }
 0x1b1   : > { %v594_v8 = vpop.trf.xlu0 }
 0x1b5   : > { %v595_v9 = vpop.trf.xlu0 }
 0x1b6   : > { %v609_v10 = vpack.c.bf16 %v595_v9, %v594_v8 }
 0x1b8   : > { %6507 = vmatmul.mubr.msk.bf16.vlgmr.msra.gmra.mrb[0].mxu0 %vm617_vm1, %v609_v10 }
 0x1b9   : > { %v596_v12 = vpop.trf.xlu0  ;;  %6541 = vmatpush3.bf16.msra.mxu0 %v6807_v4 }
 0x1ba   : > { %6542 = vmatprep.subr.bf16.mxu0 %v6808_v11 }
 0x1bd   : > { %v597_v14 = vpop.trf.xlu0  ;;  %6543 = vmatpush3.bf16.msra.mxu0 %v6808_v11 }
 0x1be   : > { %v610_v15 = vpack.c.bf16 %v597_v14, %v596_v12  ;;  %6544 = vmatprep.subr.bf16.mxu0 %v6809_v13  ;;  %v1299_v12 = vld [vmem:[#allocation11 + $0x48] sm:$0xff] }
 0x1c0   : > { %6510 = vmatprep.mubr.msk.bf16.mxu0 %vm617_vm1, %v610_v15 }
 0x1c1   : > { %v598_v16 = vpop.trf.xlu0  ;;  %6545 = vmatpush3.bf16.msra.mxu0 %v6809_v13 }
 0x1c2   : > { %6546 = vmatprep.subr.bf16.mxu0 %v6810_v46 }
 0x1c5   : > { %v599_v17 = vpop.trf.xlu0  ;;  %6547 = vmatpush3.bf16.msra.mxu0 %v6810_v46 }
 0x1c6   : > { %v611_v18 = vpack.c.bf16 %v599_v17, %v598_v16  ;;  %1909 = vmatprep.subr.bf16.mxu0 %v6039_v62  ;;  %v6038_v16 = vcombine.low %v1291_v58, %v1295_v61 }
 0x1c8   : > { %6511 = vmatmul.mubr.msk.bf16.gmra.mrb[4].mxu0 %vm617_vm1, %v611_v18  ;;  %v1307_v18 = vld [vmem:[#allocation11 + $0x88] sm:$0xff] }
 0x1c9   : > { %v600_v19 = vpop.trf.xlu0 }
 0x1cd   : > { %v601_v20 = vpop.trf.xlu0 }
 0x1ce   : > { %v612_v21 = vpack.c.bf16 %v601_v20, %v600_v19  ;;  %v1311_v19 = vld [vmem:[#allocation11 + $0xa8] sm:$0xff] }
 0x1d0   : > { %6514 = vmatprep.mubr.msk.bf16.mxu0 %vm617_vm1, %v612_v21  ;;  %v6055_v21 = vcombine.high %v1307_v18, %v1311_v19 }
 0x1d1   : > { %v602_v22 = vpop.trf.xlu0 }
 0x1d5   : > { %v603_v23 = vpop.trf.xlu0 }
 0x1d6   : > { %v613_v24 = vpack.c.bf16 %v603_v23, %v602_v22  ;;  %v1315_v22 = vld [vmem:[#allocation11 + $0xc8] sm:$0xff] }
 0x1d7   : > { %v1319_v23 = vld [vmem:[#allocation11 + $0xe8] sm:$0xff] }
 0x1d8   : > { %6515 = vmatmul.mubr.msk.bf16.gmra.mrb[8].mxu0 %vm617_vm1, %v613_v24 }
 0x1d9   : > { %v604_v25 = vpop.trf.xlu0 }
 0x1dd   : > { %v605_v26 = vpop.trf.xlu0 }
 0x1de   : > { %v614_v27 = vpack.c.bf16 %v605_v26, %v604_v25  ;;  %v6054_v25 = vcombine.low %v1307_v18, %v1311_v19 }
 0x1e0   : > { %6518 = vmatprep.mubr.msk.bf16.mxu0 %vm617_vm1, %v614_v27 }
 0x1e1   : > { %v606_v28 = vpop.trf.xlu0 }
 0x1e5   : > { %v607_v29 = vpop.trf.xlu0 }
 0x1e6   : > { %v615_v30 = vpack.c.bf16 %v607_v29, %v606_v28  ;;  %v6063_v28 = vcombine.high %v1315_v22, %v1319_v23 }
 0x1e8   : > { %6519 = vmatmul.mubr.msk.bf16.gmra.mrb[12].mxu0 %vm617_vm1, %v615_v30 }
 0x1e9   : > { %v761_v31 = vpop.trf.xlu0 }
 0x1ed   : > { %v762_v32 = vpop.trf.xlu0 }
 0x1ee   : > { %v777_v33 = vpack.c.bf16 %v762_v32, %v761_v31  ;;  %v1323_v31 = vld [vmem:[#allocation11 + $0x108] sm:$0xff] }
 0x1ef   : > { %v1327_v32 = vld [vmem:[#allocation11 + $0x128] sm:$0xff] }
 0x1f0   : > { %6524 = vmatprep.mubr.msk.bf16.mxu1 %vm617_vm1, %v777_v33 }
 0x1f1   : > { %v763_v34 = vpop.trf.xlu0 }
 0x1f5   : > { %v764_v35 = vpop.trf.xlu0 }
 0x1f6   : > { %v778_v36 = vpack.c.bf16 %v764_v35, %v763_v34 }
 0x1f8   : > { %6525 = vmatmul.mubr.msk.bf16.vlgmr.msra.gmra.mrb[0].mxu1 %vm617_vm1, %v778_v36  ;;  %v6062_v36 = vcombine.low %v1315_v22, %v1319_v23 }
 0x1f9   : > { %v765_v37 = vpop.trf.xlu0  ;;  %6584 = vmatpush3.bf16.msra.mxu1 %v6807_v4 }
 0x1fa   : > { %6581 = vmatprep.subr.bf16.mxu1 %v6808_v11 }
 0x1fd   : > { %v766_v38 = vpop.trf.xlu0  ;;  %6585 = vmatpush3.bf16.msra.mxu1 %v6808_v11 }
 0x1fe   : > { %v779_v39 = vpack.c.bf16 %v766_v38, %v765_v37  ;;  %6582 = vmatprep.subr.bf16.mxu1 %v6809_v13 }
 0x200   : > { %6528 = vmatprep.mubr.msk.bf16.mxu1 %vm617_vm1, %v779_v39  ;;  %v6071_v39 = vcombine.high %v1323_v31, %v1327_v32 }
 0x201   : > { %v767_v40 = vpop.trf.xlu0  ;;  %6586 = vmatpush3.bf16.msra.mxu1 %v6809_v13  ;;  %v1303_v13 = vld [vmem:[#allocation11 + $0x68] sm:$0xff] }
 0x202   : > { %6583 = vmatprep.subr.bf16.mxu1 %v6810_v46  ;;  %v6047_v17 = vcombine.high %v1299_v12, %v1303_v13  ;;  %v6046_v20 = vcombine.low %v1299_v12, %v1303_v13 }
 0x205   : > { %v768_v41 = vpop.trf.xlu0  ;;  %6587 = vmatpush3.bf16.msra.mxu1 %v6810_v46  ;;  %v6070_v46 = vcombine.low %v1323_v31, %v1327_v32 }
 0x206   : > { %v780_v42 = vpack.c.bf16 %v768_v41, %v767_v40  ;;  %1716 = vmatprep.subr.bf16.mxu1 %v6037_v60 }
 0x208   : > { %6529 = vmatmul.mubr.msk.bf16.gmra.mrb[4].mxu1 %vm617_vm1, %v780_v42  ;;  %v1331_v42 = vld [vmem:[#allocation11 + $0x148] sm:$0xff] }
 0x209   : > { %v769_v43 = vpop.trf.xlu0 }
 0x20d   : > { %v770_v44 = vpop.trf.xlu0 }
 0x20e   : > { %v781_v45 = vpack.c.bf16 %v770_v44, %v769_v43  ;;  %v1335_v43 = vld [vmem:[#allocation11 + $0x168] sm:$0xff] }
 0x210   : > { %6532 = vmatprep.mubr.msk.bf16.mxu1 %vm617_vm1, %v781_v45 }
 0x211   : > { %v771_v47 = vpop.trf.xlu0 }
 0x215   : > { %v772_v48 = vpop.trf.xlu0 }
 0x216   : > { %v782_v49 = vpack.c.bf16 %v772_v48, %v771_v47  ;;  %v6079_v47 = vcombine.high %v1331_v42, %v1335_v43  ;;  %v6078_v48 = vcombine.low %v1331_v42, %v1335_v43 }
 0x218   : > { %6533 = vmatmul.mubr.msk.bf16.gmra.mrb[8].mxu1 %vm617_vm1, %v782_v49 }
 0x219   : > { %v773_v50 = vpop.trf.xlu0 }
 0x21d   : > { %v774_v51 = vpop.trf.xlu0 }
 0x21e   : > { %v783_v52 = vpack.c.bf16 %v774_v51, %v773_v50 }
 0x220   : > { %6536 = vmatprep.mubr.msk.bf16.mxu1 %vm617_vm1, %v783_v52 }
 0x221   : > { %v775_v53 = vpop.trf.xlu0 }
 0x225   : > { %v776_v54 = vpop.trf.xlu0 }
 0x226   : > { %v784_v55 = vpack.c.bf16 %v776_v54, %v775_v53 }
 0x228   : > { %6537 = vmatmul.mubr.msk.bf16.gmra.mrb[12].mxu1 %vm617_vm1, %v784_v55 }
 0x28b   : > { %v6508_v0 = vpop.f32.mrb[0].mxu0 }
 0x28c   : > { %v915_v1 = vadd.f32 %v6508_v0, %v8152_v63  ;;  %v680_v2 = vpop.f32.mrb[1].mxu0 }
 0x28d   : > { %v913_v3 = vadd.f32 %v8152_v63, %v680_v2  ;;  %v6509_v4 = vpop.f32.mrb[2].mxu0 }
 0x28e   : > { %v916_v5 = vadd.f32 %v6509_v4, %v8152_v63  ;;  %v683_v6 = vpop.f32.mrb[3].mxu0  ;;  %v947_v8 = vmax.f32 %v915_v1, 0.0 }
 0x28f   : > { %v914_v7 = vadd.f32 %v8152_v63, %v683_v6  ;;  %v945_v10 = vmax.f32 %v913_v3, 0.0 }
 0x290   : > { %v948_v9 = vmax.f32 %v916_v5, 0.0 }
 0x291   : > { %v946_v11 = vmax.f32 %v914_v7, 0.0 }
 0x292   : > { %v978_v14 = vpack.c.bf16 %v948_v9, %v947_v8 }
 0x293   : > { %v977_v15 = vpack.c.bf16 %v946_v11, %v945_v10 }
 0x295   : > { %6548 = vmatprep.mubr.msk.bf16.mxu0 %vm1032_vm2, %v977_v15 }
 0x296   : > { %6549 = vmatmul.mubr.msk.bf16.vlgmr.msra.gmra.mrb[16].mxu0 %vm1032_vm2, %v978_v14 }
 0x297   : > { %1910 = vmatpush1.bf16.msra.mxu0 %v6038_v16 }
 0x298   : > { %1911 = vmatprep.subr.bf16.mxu0 %v6047_v17 }
 0x29b   : > { %v6512_v24 = vpop.f32.mrb[4].mxu0  ;;  %1912 = vmatpush1.bf16.msra.mxu0 %v6046_v20 }
 0x29c   : > { %v919_v26 = vadd.f32 %v6512_v24, %v8152_v63  ;;  %v696_v27 = vpop.f32.mrb[5].mxu0  ;;  %1913 = vmatprep.subr.bf16.mxu0 %v6055_v21 }
 0x29d   : > { %v917_v29 = vadd.f32 %v8152_v63, %v696_v27  ;;  %v6513_v30 = vpop.f32.mrb[6].mxu0 }
 0x29e   : > { %v920_v33 = vadd.f32 %v6513_v30, %v8152_v63  ;;  %v699_v34 = vpop.f32.mrb[7].mxu0  ;;  %v951_v37 = vmax.f32 %v919_v26, 0.0  ;;  %v1302_v30 = vld [vmem:[#allocation11 + $0x60] sm:$0xff] }
 0x29f   : > { %v918_v35 = vadd.f32 %v8152_v63, %v699_v34  ;;  %1914 = vmatpush1.bf16.msra.mxu0 %v6054_v25  ;;  %v949_v40 = vmax.f32 %v917_v29, 0.0  ;;  %v1298_v29 = vld [vmem:[#allocation11 + $0x40] sm:$0xff] }
 0x2a0   : > { %v952_v38 = vmax.f32 %v920_v33, 0.0  ;;  %1915 = vmatprep.subr.bf16.mxu0 %v6063_v28  ;;  %v6045_v33 = vcombine.high %v1298_v29, %v1302_v30  ;;  %v1306_v34 = vld [vmem:[#allocation11 + $0x80] sm:$0xff] }
 0x2a1   : > { %v950_v41 = vmax.f32 %v918_v35, 0.0  ;;  %v1310_v35 = vld [vmem:[#allocation11 + $0xa0] sm:$0xff] }
 0x2a2   : > { %v980_v44 = vpack.c.bf16 %v952_v38, %v951_v37  ;;  %v6053_v37 = vcombine.high %v1306_v34, %v1310_v35  ;;  %v1314_v38 = vld [vmem:[#allocation11 + $0xc0] sm:$0xff] }
 0x2a3   : > { %v979_v45 = vpack.c.bf16 %v950_v41, %v949_v40  ;;  %1916 = vmatpush1.bf16.msra.mxu0 %v6062_v36  ;;  %v6044_v36 = vcombine.low %v1298_v29, %v1302_v30  ;;  %v6052_v41 = vcombine.low %v1306_v34, %v1310_v35  ;;  %v1292_v30 = vld [vmem:[#allocation11 + $0x10] sm:$0xff]  ;;  %v7692_v34 = vmov 0  }
 0x2a4   : > { %1917 = vmatprep.subr.bf16.mxu0 %v6071_v39  ;;  %v1318_v39 = vld [vmem:[#allocation11 + $0xe0] sm:$0xff] }
 0x2a5   : > { %6552 = vmatprep.mubr.msk.bf16.mxu0 %vm1032_vm2, %v979_v45 }
 0x2a6   : > { %6553 = vmatmul.mubr.msk.bf16.gmra.mrb[20].mxu0 %vm1032_vm2, %v980_v44  ;;  %v6061_v44 = vcombine.high %v1314_v38, %v1318_v39 }
 0x2a7   : > { %1918 = vmatpush1.bf16.msra.mxu0 %v6070_v46 }
 0x2a8   : > { %1919 = vmatprep.subr.bf16.mxu0 %v6079_v47  ;;  %v1322_v47 = vld [vmem:[#allocation11 + $0x100] sm:$0xff] }
 0x2ab   : > { %v6516_v49 = vpop.f32.mrb[8].mxu0  ;;  %1920 = vmatpush1.bf16.msra.mxu0 %v6078_v48  ;;  %v1326_v48 = vld [vmem:[#allocation11 + $0x120] sm:$0xff] }
 0x2ac   : > { %v923_v50 = vadd.f32 %v6516_v49, %v8152_v63  ;;  %v712_v51 = vpop.f32.mrb[9].mxu0  ;;  %v6060_v49 = vcombine.low %v1314_v38, %v1318_v39 }
 0x2ad   : > { %v921_v52 = vadd.f32 %v8152_v63, %v712_v51  ;;  %v6517_v53 = vpop.f32.mrb[10].mxu0 }
 0x2ae   : > { %v924_v54 = vadd.f32 %v6517_v53, %v8152_v63  ;;  %v715_v55 = vpop.f32.mrb[11].mxu0  ;;  %v955_v60 = vmax.f32 %v923_v50, 0.0 }
 0x2af   : > { %v922_v58 = vadd.f32 %v8152_v63, %v715_v55  ;;  %v953_v62 = vmax.f32 %v921_v52, 0.0  ;;  %v6069_v52 = vcombine.high %v1322_v47, %v1326_v48  ;;  %v1330_v55 = vld [vmem:[#allocation11 + $0x140] sm:$0xff] }
 0x2b0   : > { %v956_v61 = vmax.f32 %v924_v54, 0.0 }
 0x2b1   : > { %v954_v0 = vmax.f32 %v922_v58, 0.0  ;;  %v1334_v58 = vld [vmem:[#allocation11 + $0x160] sm:$0xff] }
 0x2b2   : > { %v982_v1 = vpack.c.bf16 %v956_v61, %v955_v60 }
 0x2b3   : > { %v981_v2 = vpack.c.bf16 %v954_v0, %v953_v62  ;;  %v6068_v62 = vcombine.low %v1322_v47, %v1326_v48  ;;  %v6077_v0 = vcombine.high %v1330_v55, %v1334_v58 }
 0x2b5   : > { %6556 = vmatprep.mubr.msk.bf16.mxu0 %vm1032_vm2, %v981_v2  ;;  %v1338_v2 = vld [vmem:[#allocation11 + $0x180] sm:$0xff] }
 0x2b6   : > { %6557 = vmatmul.mubr.msk.bf16.gmra.mrb[24].mxu0 %vm1032_vm2, %v982_v1  ;;  %v6076_v1 = vcombine.low %v1330_v55, %v1334_v58 }
 0x2bb   : > { %v6520_v3 = vpop.f32.mrb[12].mxu0 }
 0x2bc   : > { %v927_v4 = vadd.f32 %v6520_v3, %v8152_v63  ;;  %v728_v5 = vpop.f32.mrb[13].mxu0  ;;  %v1342_v3 = vld [vmem:[#allocation11 + $0x1a0] sm:$0xff] }
 0x2bd   : > { %v925_v6 = vadd.f32 %v8152_v63, %v728_v5  ;;  %v6521_v7 = vpop.f32.mrb[14].mxu0  ;;  %v6085_v5 = vcombine.high %v1338_v2, %v1342_v3 }
 0x2be   : > { %v928_v8 = vadd.f32 %v6521_v7, %v8152_v63  ;;  %v731_v9 = vpop.f32.mrb[15].mxu0  ;;  %v959_v11 = vmax.f32 %v927_v4, 0.0  ;;  %v1339_v4 = vld [vmem:[#allocation11 + $0x188] sm:$0xff] }
 0x2bf   : > { %v926_v10 = vadd.f32 %v8152_v63, %v731_v9  ;;  %v957_v13 = vmax.f32 %v925_v6, 0.0  ;;  %v1343_v6 = vld [vmem:[#allocation11 + $0x1a8] sm:$0xff] }
 0x2c0   : > { %v960_v12 = vmax.f32 %v928_v8, 0.0  ;;  %v6086_v7 = vcombine.low %v1339_v4, %v1343_v6  ;;  %v6087_v8 = vcombine.high %v1339_v4, %v1343_v6  ;;  %v1301_v6 = vld [vmem:[#allocation11 + $0x58] sm:$0xff] }
 0x2c1   : > { %v958_v14 = vmax.f32 %v926_v10, 0.0  ;;  %v6084_v10 = vcombine.low %v1338_v2, %v1342_v3  ;;  %v1300_v2 = vld [vmem:[#allocation11 + $0x50] sm:$0xff] }
 0x2c2   : > { %v984_v15 = vpack.c.bf16 %v960_v12, %v959_v11  ;;  %1921 = vmatprep.subr.bf16.mxu0 %v6087_v8 }
 0x2c3   : > { %v983_v16 = vpack.c.bf16 %v958_v14, %v957_v13  ;;  %v1346_v13 = vld [vmem:[#allocation11 + $0x1c0] sm:$0xff]  ;;  %1922 = vmatpush1.bf16.msra.mxu0 %v6086_v7  ;;  %v1305_v7 = vld [vmem:[#allocation11 + $0x78] sm:$0xff] }
 0x2c4   : > { %v1350_v14 = vld [vmem:[#allocation11 + $0x1e0] sm:$0xff] }
 0x2c5   : > { %6560 = vmatprep.mubr.msk.bf16.mxu0 %vm1032_vm2, %v983_v16 }
 0x2c6   : > { %6561 = vmatmul.mubr.msk.bf16.gmra.mrb[28].mxu0 %vm1032_vm2, %v984_v15  ;;  %v1347_v15 = vld [vmem:[#allocation11 + $0x1c8] sm:$0xff] }
 0x2c7   : > { %1941 = vmatprep.mubr.bf16.mxu0 %v7692_v34 }
 0x2cb   : > { %v6526_v17 = vpop.f32.mrb[0].mxu1 }
 0x2cc   : > { %v931_v18 = vadd.f32 %v6526_v17, %v8152_v63  ;;  %v843_v19 = vpop.f32.mrb[1].mxu1 }
 0x2cd   : > { %v929_v20 = vadd.f32 %v8152_v63, %v843_v19  ;;  %v6527_v21 = vpop.f32.mrb[2].mxu1  ;;  %v1351_v19 = vld [vmem:[#allocation11 + $0x1e8] sm:$0xff] }
 0x2ce   : > { %v932_v22 = vadd.f32 %v6527_v21, %v8152_v63  ;;  %v846_v23 = vpop.f32.mrb[3].mxu1  ;;  %v963_v25 = vmax.f32 %v931_v18, 0.0  ;;  %v6093_v18 = vcombine.high %v1346_v13, %v1350_v14 }
 0x2cf   : > { %v930_v24 = vadd.f32 %v8152_v63, %v846_v23  ;;  %v961_v27 = vmax.f32 %v929_v20, 0.0 }
 0x2d0   : > { %v964_v26 = vmax.f32 %v932_v22, 0.0  ;;  %v6094_v22 = vcombine.low %v1347_v15, %v1351_v19 }
 0x2d1   : > { %v962_v28 = vmax.f32 %v930_v24, 0.0  ;;  %v6092_v24 = vcombine.low %v1346_v13, %v1350_v14  ;;  %v1312_v13 = vld [vmem:[#allocation11 + $0xb0] sm:$0xff]  ;;  %v1309_v14 = vld [vmem:[#allocation11 + $0x98] sm:$0xff] }
 0x2d2   : > { %v986_v31 = vpack.c.bf16 %v964_v26, %v963_v25  ;;  %v6095_v25 = vcombine.high %v1347_v15, %v1351_v19  ;;  %v1313_v15 = vld [vmem:[#allocation11 + $0xb8] sm:$0xff] }
 0x2d3   : > { %v985_v32 = vpack.c.bf16 %v962_v28, %v961_v27  ;;  %v6059_v19 = vcombine.high %v1309_v14, %v1313_v15 }
 0x2d4   : > { %1923 = vmatprep.subr.bf16.mxu0 %v6095_v25 }
 0x2d5   : > { %6564 = vmatprep.mubr.msk.bf16.mxu1 %vm1032_vm2, %v985_v32  ;;  %v1293_v32 = vld [vmem:[#allocation11 + $0x18] sm:$0xff]  ;;  %1924 = vmatpush1.bf16.msra.mxu0 %v6094_v22 }
 0x2d6   : > { %6565 = vmatmul.mubr.msk.bf16.vlgmr.msra.gmra.mrb[16].mxu1 %vm1032_vm2, %v986_v31  ;;  %v1296_v31 = vld [vmem:[#allocation11 + $0x30] sm:$0xff]  ;;  %v1317_v22 = vld [vmem:[#allocation11 + $0xd8] sm:$0xff] }
 0x2d7   : > { %1717 = vmatpush1.bf16.msra.mxu1 %v6036_v59  ;;  %v6040_v35 = vcombine.low %v1292_v30, %v1296_v31 }
 0x2d8   : > { %1718 = vmatprep.subr.bf16.mxu1 %v6045_v33 }
 0x2db   : > { %v6530_v40 = vpop.f32.mrb[4].mxu1  ;;  %1719 = vmatpush1.bf16.msra.mxu1 %v6044_v36  ;;  %v6041_v36 = vcombine.high %v1292_v30, %v1296_v31  ;;  %v1324_v31 = vld [vmem:[#allocation11 + $0x110] sm:$0xff] }
 0x2dc   : > { %v935_v42 = vadd.f32 %v6530_v40, %v8152_v63  ;;  %v859_v43 = vpop.f32.mrb[5].mxu1  ;;  %1720 = vmatprep.subr.bf16.mxu1 %v6053_v37  ;;  %v1297_v37 = vld [vmem:[#allocation11 + $0x38] sm:$0xff] }
 0x2dd   : > { %v933_v45 = vadd.f32 %v8152_v63, %v859_v43  ;;  %v6531_v46 = vpop.f32.mrb[6].mxu1  ;;  %v6042_v39 = vcombine.low %v1293_v32, %v1297_v37  ;;  %v6043_v40 = vcombine.high %v1293_v32, %v1297_v37  ;;  %v1329_v37 = vld [vmem:[#allocation11 + $0x138] sm:$0xff] }
 0x2de   : > { %v936_v56 = vadd.f32 %v6531_v46, %v8152_v63  ;;  %v862_v57 = vpop.f32.mrb[7].mxu1  ;;  %v967_v50 = vmax.f32 %v935_v42, 0.0 }
 0x2df   : > { %v934_v59 = vadd.f32 %v8152_v63, %v862_v57  ;;  %1721 = vmatpush1.bf16.msra.mxu1 %v6052_v41  ;;  %v965_v53 = vmax.f32 %v933_v45, 0.0  ;;  %2295 = vmatprep.subr.bf16.mxu0 %v6043_v40 }
 0x2e0   : > { %v968_v51 = vmax.f32 %v936_v56, 0.0  ;;  %1722 = vmatprep.subr.bf16.mxu1 %v6061_v44 }
 0x2e1   : > { %v966_v54 = vmax.f32 %v934_v59, 0.0 }
 0x2e2   : > { %v988_v60 = vpack.c.bf16 %v968_v51, %v967_v50 }
 0x2e3   : > { %v987_v61 = vpack.c.bf16 %v966_v54, %v965_v53  ;;  %1723 = vmatpush1.bf16.msra.mxu1 %v6060_v49 }
 0x2e4   : > { %1724 = vmatprep.subr.bf16.mxu1 %v6069_v52  ;;  %v8207_v52 = vld [vmem:[#allocation9] ss:$0 sm:$0xff] }
 0x2e5   : > { %6568 = vmatprep.mubr.msk.bf16.mxu1 %vm1032_vm2, %v987_v61 }
 0x2e6   : > { %6569 = vmatmul.mubr.msk.bf16.gmra.mrb[20].mxu1 %vm1032_vm2, %v988_v60 }
 0x2e7   : > { %1725 = vmatpush1.bf16.msra.mxu1 %v6068_v62 }
 0x2e8   : > { %1726 = vmatprep.subr.bf16.mxu1 %v6077_v0 }
 0x2eb   : > { %v6534_v9 = vpop.f32.mrb[8].mxu1  ;;  %1727 = vmatpush1.bf16.msra.mxu1 %v6076_v1 }
 0x2ec   : > { %v939_v11 = vadd.f32 %v6534_v9, %v8152_v63  ;;  %v875_v12 = vpop.f32.mrb[9].mxu1  ;;  %1728 = vmatprep.subr.bf16.mxu1 %v6085_v5  ;;  %v1304_v5 = vld [vmem:[#allocation11 + $0x70] sm:$0xff] }
 0x2ed   : > { %v937_v16 = vadd.f32 %v8152_v63, %v875_v12  ;;  %v6535_v17 = vpop.f32.mrb[10].mxu1  ;;  %v6051_v12 = vcombine.high %v1301_v6, %v1305_v7 }
 0x2ee   : > { %v940_v20 = vadd.f32 %v6535_v17, %v8152_v63  ;;  %v878_v21 = vpop.f32.mrb[11].mxu1  ;;  %v971_v26 = vmax.f32 %v939_v11, 0.0  ;;  %v6049_v11 = vcombine.high %v1300_v2, %v1304_v5  ;;  %v6050_v17 = vcombine.low %v1301_v6, %v1305_v7  ;;  %v1349_v6 = vld [vmem:[#allocation11 + $0x1d8] sm:$0xff] }
 0x2ef   : > { %v938_v23 = vadd.f32 %v8152_v63, %v878_v21  ;;  %1729 = vmatpush1.bf16.msra.mxu1 %v6084_v10  ;;  %v969_v28 = vmax.f32 %v937_v16, 0.0  ;;  %v1308_v10 = vld [vmem:[#allocation11 + $0x90] sm:$0xff]  ;;  %v6048_v16 = vcombine.low %v1300_v2, %v1304_v5  ;;  %v1353_v7 = vld [vmem:[#allocation11 + $0x1f8] sm:$0xff] }
 0x2f0   : > { %v972_v27 = vmax.f32 %v940_v20, 0.0  ;;  %1730 = vmatprep.subr.bf16.mxu1 %v6093_v18  ;;  %v6057_v18 = vcombine.high %v1308_v10, %v1312_v13  ;;  %v1316_v20 = vld [vmem:[#allocation11 + $0xd0] sm:$0xff]  ;;  %v6056_v25 = vcombine.low %v1308_v10, %v1312_v13 }
 0x2f1   : > { %v970_v29 = vmax.f32 %v938_v23, 0.0  ;;  %v1320_v21 = vld [vmem:[#allocation11 + $0xf0] sm:$0xff]  ;;  %v1321_v23 = vld [vmem:[#allocation11 + $0xf8] sm:$0xff] }
 0x2f2   : > { %v990_v33 = vpack.c.bf16 %v972_v27, %v971_v26  ;;  %v6058_v26 = vcombine.low %v1309_v14, %v1313_v15  ;;  %v6067_v30 = vcombine.high %v1317_v22, %v1321_v23  ;;  %v1352_v5 = vld [vmem:[#allocation11 + $0x1f0] sm:$0xff] }
 0x2f3   : > { %v989_v38 = vpack.c.bf16 %v970_v29, %v969_v28  ;;  %1731 = vmatpush1.bf16.msra.mxu1 %v6092_v24  ;;  %v6065_v29 = vcombine.high %v1316_v20, %v1320_v21 }
 0x2f4   : > { %2102 = vmatprep.subr.bf16.mxu1 %v6041_v36  ;;  %v1325_v36 = vld [vmem:[#allocation11 + $0x118] sm:$0xff] }
 0x2f5   : > { %6572 = vmatprep.mubr.msk.bf16.mxu1 %vm1032_vm2, %v989_v38 }
 0x2f6   : > { %6573 = vmatmul.mubr.msk.bf16.gmra.mrb[24].mxu1 %vm1032_vm2, %v990_v33 }
 0x2fb   : > { %v6538_v41 = vpop.f32.mrb[12].mxu1 }
 0x2fc   : > { %v943_v42 = vadd.f32 %v6538_v41, %v8152_v63  ;;  %v891_v43 = vpop.f32.mrb[13].mxu1  ;;  %v6064_v41 = vcombine.low %v1316_v20, %v1320_v21 }
 0x2fd   : > { %v941_v44 = vadd.f32 %v8152_v63, %v891_v43  ;;  %v6539_v45 = vpop.f32.mrb[14].mxu1 }
 0x2fe   : > { %v944_v46 = vadd.f32 %v6539_v45, %v8152_v63  ;;  %v894_v47 = vpop.f32.mrb[15].mxu1  ;;  %v975_v56 = vmax.f32 %v943_v42, 0.0  ;;  %v6066_v42 = vcombine.low %v1317_v22, %v1321_v23  ;;  %v6098_v23 = vcombine.low %v1349_v6, %v1353_v7 }
 0x2ff   : > { %v942_v48 = vadd.f32 %v8152_v63, %v894_v47  ;;  %v973_v59 = vmax.f32 %v941_v44, 0.0  ;;  %v1332_v47 = vld [vmem:[#allocation11 + $0x150] sm:$0xff] }
 0x300   : > { %v976_v57 = vmax.f32 %v944_v46, 0.0  ;;  %v6075_v46 = vcombine.high %v1325_v36, %v1329_v37 }
 0x301   : > { %v974_v49 = vmax.f32 %v942_v48, 0.0 }
 0x302   : > { %v992_v50 = vpack.c.bf16 %v976_v57, %v975_v56  ;;  %v1336_v57 = vld [vmem:[#allocation11 + $0x170] sm:$0xff] }
 0x303   : > { %v991_v51 = vpack.c.bf16 %v974_v49, %v973_v59  ;;  %v1333_v59 = vld [vmem:[#allocation11 + $0x158] sm:$0xff] }
 0x304   : > { %v1337_v49 = vld [vmem:[#allocation11 + $0x178] sm:$0xff] }
 0x305   : > { %6576 = vmatprep.mubr.msk.bf16.mxu1 %vm1032_vm2, %v991_v51 }
 0x306   : > { %6577 = vmatmul.mubr.msk.bf16.gmra.mrb[28].mxu1 %vm1032_vm2, %v992_v50 }
 0x307   : > { %1748 = vmatprep.mubr.bf16.mxu1 %v7692_v34 }
 0x369   : > { %v6550_v53 = vpop.f32.mrb[16].mxu0 }
 0x36a   : > { %v1124_v54 = vadd.f32 %v6550_v53, %v8207_v52  ;;  %v1115_v55 = vpop.f32.mrb[17].mxu0 }
 0x36b   : > { %v1116_v63 = vadd.f32 %v8207_v52, %v1115_v55  ;;  %v6551_v58 = vpop.f32.mrb[18].mxu0  ;;  %v6081_v55 = vcombine.high %v1332_v47, %v1336_v57 }
 0x36c   : > { %v1127_v60 = vadd.f32 %v6551_v58, %v8207_v52  ;;  %v1118_v61 = vpop.f32.mrb[19].mxu0  ;;  %v1244_v0 = vmax.f32 %v1124_v54, 0.0  ;;  %v6074_v54 = vcombine.low %v1325_v36, %v1329_v37  ;;  %v1340_v58 = vld [vmem:[#allocation11 + $0x190] sm:$0xff] }
 0x36d   : > { %v1119_v62 = vadd.f32 %v8207_v52, %v1118_v61  ;;  %v1242_v3 = vmax.f32 %v1116_v63, 0.0  ;;  %v6083_v63 = vcombine.high %v1333_v59, %v1337_v49  ;;  %v1341_v61 = vld [vmem:[#allocation11 + $0x198] sm:$0xff] }
 0x36e   : > { %v1245_v1 = vmax.f32 %v1127_v60, 0.0  ;;  %v1344_v60 = vld [vmem:[#allocation11 + $0x1b0] sm:$0xff] }
 0x36f   : > { %v1243_v4 = vmax.f32 %v1119_v62, 0.0  ;;  %v1345_v62 = vld [vmem:[#allocation11 + $0x1b8] sm:$0xff]  ;;  %v6089_v2 = vcombine.high %v1340_v58, %v1344_v60 }
 0x370   : > { %v8213_v8 = vpack.c.bf16 %v1245_v1, %v1244_v0  ;;  %v6080_v0 = vcombine.low %v1332_v47, %v1336_v57  ;;  %v6082_v1 = vcombine.low %v1333_v59, %v1337_v49 }
 0x371   : > { %v8215_v9 = vpack.c.bf16 %v1243_v4, %v1242_v3  ;;  %v6091_v3 = vcombine.high %v1341_v61, %v1345_v62  ;;  %v1348_v4 = vld [vmem:[#allocation11 + $0x1d0] sm:$0xff] }
 0x372   : > { %v6097_v15 = vcombine.high %v1348_v4, %v1352_v5  ;;  %v6096_v22 = vcombine.low %v1348_v4, %v1352_v5 }
 0x373   : > { %1749 = vmatmul.mubr.bf16.vlgmr.msra.gmra.mrb[32].mxu1 %v8215_v9  ;;  %1942 = vmatmul.mubr.bf16.vlgmr.msra.gmra.mrb[32].mxu0 %v8215_v9 }
 0x374   : > { %2103 = vmatpush1.bf16.msra.mxu1 %v6040_v35  ;;  %2296 = vmatpush1.bf16.msra.mxu0 %v6042_v39  ;;  %v1328_v35 = vld [vmem:[#allocation11 + $0x130] sm:$0xff] }
 0x375   : > { %1758 = vmatprep.mubr.bf16.mxu1 %v7692_v34  ;;  %1951 = vmatprep.mubr.bf16.mxu0 %v7692_v34  ;;  %v6073_v45 = vcombine.high %v1324_v31, %v1328_v35  ;;  %v6072_v53 = vcombine.low %v1324_v31, %v1328_v35 }
 0x376   : > { %2104 = vmatprep.subr.bf16.mxu1 %v6049_v11  ;;  %2297 = vmatprep.subr.bf16.mxu0 %v6051_v12  ;;  %v6088_v11 = vcombine.low %v1340_v58, %v1344_v60  ;;  %v6090_v12 = vcombine.low %v1341_v61, %v1345_v62 }
 0x378   : > { %2105 = vmatpush1.bf16.msra.mxu1 %v6048_v16  ;;  %2298 = vmatpush1.bf16.msra.mxu0 %v6050_v17  ;;  %v6099_v16 = vcombine.high %v1349_v6, %v1353_v7 }
 0x379   : > { %v6554_v24 = vpop.f32.mrb[20].mxu0  ;;  %2106 = vmatprep.subr.bf16.mxu1 %v6057_v18  ;;  %2299 = vmatprep.subr.bf16.mxu0 %v6059_v19 }
 0x37a   : > { %v1140_v27 = vadd.f32 %v6554_v24, %v8207_v52  ;;  %v1131_v28 = vpop.f32.mrb[21].mxu0 }
 0x37b   : > { %v1132_v32 = vadd.f32 %v8207_v52, %v1131_v28  ;;  %v6555_v33 = vpop.f32.mrb[22].mxu0  ;;  %1759 = vmatmul.mubr.bf16.gmra.mrb[36].mxu1 %v8213_v8  ;;  %1952 = vmatmul.mubr.bf16.gmra.mrb[36].mxu0 %v8213_v8 }
 0x37c   : > { %v1143_v38 = vadd.f32 %v6555_v33, %v8207_v52  ;;  %v1134_v39 = vpop.f32.mrb[23].mxu0  ;;  %1768 = vmatprep.mubr.bf16.mxu1 %v7692_v34  ;;  %1961 = vmatprep.mubr.bf16.mxu0 %v7692_v34  ;;  %v1248_v43 = vmax.f32 %v1140_v27, 0.0 }
 0x37d   : > { %v1135_v40 = vadd.f32 %v8207_v52, %v1134_v39  ;;  %2107 = vmatpush1.bf16.msra.mxu1 %v6056_v25  ;;  %2300 = vmatpush1.bf16.msra.mxu0 %v6058_v26  ;;  %v1246_v48 = vmax.f32 %v1132_v32, 0.0 }
 0x37e   : > { %v1249_v44 = vmax.f32 %v1143_v38, 0.0  ;;  %2108 = vmatprep.subr.bf16.mxu1 %v6065_v29  ;;  %2301 = vmatprep.subr.bf16.mxu0 %v6067_v30 }
 0x37f   : > { %v1247_v56 = vmax.f32 %v1135_v40, 0.0 }
 0x380   : > { %v8229_v50 = vpack.c.bf16 %v1249_v44, %v1248_v43 }
 0x381   : > { %v8231_v51 = vpack.c.bf16 %v1247_v56, %v1246_v48  ;;  %2109 = vmatpush1.bf16.msra.mxu1 %v6064_v41  ;;  %2302 = vmatpush1.bf16.msra.mxu0 %v6066_v42 }
 0x382   : > { %2110 = vmatprep.subr.bf16.mxu1 %v6073_v45  ;;  %2303 = vmatprep.subr.bf16.mxu0 %v6075_v46 }
 0x383   : > { %1769 = vmatmul.mubr.bf16.gmra.mrb[40].mxu1 %v8231_v51  ;;  %1962 = vmatmul.mubr.bf16.gmra.mrb[40].mxu0 %v8231_v51 }
 0x384   : > { %1778 = vmatprep.mubr.bf16.mxu1 %v7692_v34  ;;  %1971 = vmatprep.mubr.bf16.mxu0 %v7692_v34 }
 0x385   : > { %2111 = vmatpush1.bf16.msra.mxu1 %v6072_v53  ;;  %2304 = vmatpush1.bf16.msra.mxu0 %v6074_v54 }
 0x386   : > { %2112 = vmatprep.subr.bf16.mxu1 %v6081_v55  ;;  %2305 = vmatprep.subr.bf16.mxu0 %v6083_v63 }
 0x389   : > { %v6558_v10 = vpop.f32.mrb[24].mxu0  ;;  %2113 = vmatpush1.bf16.msra.mxu1 %v6080_v0  ;;  %2306 = vmatpush1.bf16.msra.mxu0 %v6082_v1 }
 0x38a   : > { %v1156_v13 = vadd.f32 %v6558_v10, %v8207_v52  ;;  %v1147_v14 = vpop.f32.mrb[25].mxu0  ;;  %2114 = vmatprep.subr.bf16.mxu1 %v6089_v2  ;;  %2307 = vmatprep.subr.bf16.mxu0 %v6091_v3 }
 0x38b   : > { %v1148_v17 = vadd.f32 %v8207_v52, %v1147_v14  ;;  %v6559_v18 = vpop.f32.mrb[26].mxu0  ;;  %1779 = vmatmul.mubr.bf16.gmra.mrb[44].mxu1 %v8229_v50  ;;  %1972 = vmatmul.mubr.bf16.gmra.mrb[44].mxu0 %v8229_v50 }
 0x38c   : > { %v1159_v19 = vadd.f32 %v6559_v18, %v8207_v52  ;;  %v1150_v20 = vpop.f32.mrb[27].mxu0  ;;  %1788 = vmatprep.mubr.bf16.mxu1 %v7692_v34  ;;  %1981 = vmatprep.mubr.bf16.mxu0 %v7692_v34  ;;  %v1252_v24 = vmax.f32 %v1156_v13, 0.0 }
 0x38d   : > { %v1151_v21 = vadd.f32 %v8207_v52, %v1150_v20  ;;  %2115 = vmatpush1.bf16.msra.mxu1 %v6088_v11  ;;  %2308 = vmatpush1.bf16.msra.mxu0 %v6090_v12  ;;  %v1250_v26 = vmax.f32 %v1148_v17, 0.0 }
 0x38e   : > { %v1253_v25 = vmax.f32 %v1159_v19, 0.0  ;;  %2116 = vmatprep.subr.bf16.mxu1 %v6097_v15  ;;  %2309 = vmatprep.subr.bf16.mxu0 %v6099_v16 }
 0x38f   : > { %v1251_v27 = vmax.f32 %v1151_v21, 0.0 }
 0x390   : > { %v8245_v28 = vpack.c.bf16 %v1253_v25, %v1252_v24 }
 0x391   : > { %v8247_v29 = vpack.c.bf16 %v1251_v27, %v1250_v26  ;;  %2117 = vmatpush1.bf16.msra.mxu1 %v6096_v22  ;;  %2310 = vmatpush1.bf16.msra.mxu0 %v6098_v23 }
 0x393   : > { %1789 = vmatmul.mubr.bf16.gmra.mrb[48].mxu1 %v8247_v29  ;;  %1982 = vmatmul.mubr.bf16.gmra.mrb[48].mxu0 %v8247_v29 }
 0x394   : > { %1798 = vmatprep.mubr.bf16.mxu1 %v7692_v34  ;;  %1991 = vmatprep.mubr.bf16.mxu0 %v7692_v34 }
 0x399   : > { %v6562_v30 = vpop.f32.mrb[28].mxu0 }
 0x39a   : > { %v1172_v31 = vadd.f32 %v6562_v30, %v8207_v52  ;;  %v1163_v32 = vpop.f32.mrb[29].mxu0 }
 0x39b   : > { %v1164_v33 = vadd.f32 %v8207_v52, %v1163_v32  ;;  %v6563_v35 = vpop.f32.mrb[30].mxu0  ;;  %1799 = vmatmul.mubr.bf16.gmra.mrb[52].mxu1 %v8245_v28  ;;  %1992 = vmatmul.mubr.bf16.gmra.mrb[52].mxu0 %v8245_v28 }
 0x39c   : > { %v1175_v36 = vadd.f32 %v6563_v35, %v8207_v52  ;;  %v1166_v37 = vpop.f32.mrb[31].mxu0  ;;  %1808 = vmatprep.mubr.bf16.mxu1 %v7692_v34  ;;  %2001 = vmatprep.mubr.bf16.mxu0 %v7692_v34  ;;  %v1256_v39 = vmax.f32 %v1172_v31, 0.0 }
 0x39d   : > { %v1167_v38 = vadd.f32 %v8207_v52, %v1166_v37  ;;  %v1254_v41 = vmax.f32 %v1164_v33, 0.0 }
 0x39e   : > { %v1257_v40 = vmax.f32 %v1175_v36, 0.0 }
 0x39f   : > { %v1255_v42 = vmax.f32 %v1167_v38, 0.0 }
 0x3a0   : > { %v8261_v43 = vpack.c.bf16 %v1257_v40, %v1256_v39 }
 0x3a1   : > { %v8263_v44 = vpack.c.bf16 %v1255_v42, %v1254_v41 }
 0x3a3   : > { %1809 = vmatmul.mubr.bf16.gmra.mrb[56].mxu1 %v8263_v44  ;;  %2002 = vmatmul.mubr.bf16.gmra.mrb[56].mxu0 %v8263_v44 }
 0x3a4   : > { %1818 = vmatprep.mubr.bf16.mxu1 %v7692_v34  ;;  %2011 = vmatprep.mubr.bf16.mxu0 %v7692_v34 }
 0x3a9   : > { %v6566_v45 = vpop.f32.mrb[16].mxu1 }
 0x3aa   : > { %v1188_v46 = vadd.f32 %v6566_v45, %v8207_v52  ;;  %v1179_v47 = vpop.f32.mrb[17].mxu1 }
 0x3ab   : > { %v1180_v48 = vadd.f32 %v8207_v52, %v1179_v47  ;;  %v6567_v56 = vpop.f32.mrb[18].mxu1  ;;  %1819 = vmatmul.mubr.bf16.gmra.mrb[60].mxu1 %v8261_v43  ;;  %2012 = vmatmul.mubr.bf16.gmra.mrb[60].mxu0 %v8261_v43 }
 0x3ac   : > { %v1191_v57 = vadd.f32 %v6567_v56, %v8207_v52  ;;  %v1182_v59 = vpop.f32.mrb[19].mxu1  ;;  %1828 = vmatprep.mubr.bf16.mxu1 %v7692_v34  ;;  %2021 = vmatprep.mubr.bf16.mxu0 %v7692_v34  ;;  %v1260_v53 = vmax.f32 %v1188_v46, 0.0 }
 0x3ad   : > { %v1183_v49 = vadd.f32 %v8207_v52, %v1182_v59  ;;  %v1258_v55 = vmax.f32 %v1180_v48, 0.0 }
 0x3ae   : > { %v1261_v54 = vmax.f32 %v1191_v57, 0.0 }
 0x3af   : > { %v1259_v63 = vmax.f32 %v1183_v49, 0.0 }
 0x3b0   : > { %v8277_v58 = vpack.c.bf16 %v1261_v54, %v1260_v53 }
 0x3b1   : > { %v8279_v60 = vpack.c.bf16 %v1259_v63, %v1258_v55 }
 0x3b3   : > { %1829 = vmatmul.mubr.bf16.gmra.mrb[64].mxu1 %v8279_v60  ;;  %2022 = vmatmul.mubr.bf16.gmra.mrb[64].mxu0 %v8279_v60 }
 0x3b4   : > { %1838 = vmatprep.mubr.bf16.mxu1 %v7692_v34  ;;  %2031 = vmatprep.mubr.bf16.mxu0 %v7692_v34 }
 0x3b9   : > { %v6570_v61 = vpop.f32.mrb[20].mxu1 }
 0x3ba   : > { %v1204_v62 = vadd.f32 %v6570_v61, %v8207_v52  ;;  %v1195_v0 = vpop.f32.mrb[21].mxu1 }
 0x3bb   : > { %v1196_v1 = vadd.f32 %v8207_v52, %v1195_v0  ;;  %v6571_v2 = vpop.f32.mrb[22].mxu1  ;;  %1839 = vmatmul.mubr.bf16.gmra.mrb[68].mxu1 %v8277_v58  ;;  %2032 = vmatmul.mubr.bf16.gmra.mrb[68].mxu0 %v8277_v58 }
 0x3bc   : > { %v1207_v3 = vadd.f32 %v6571_v2, %v8207_v52  ;;  %v1198_v4 = vpop.f32.mrb[23].mxu1  ;;  %1848 = vmatprep.mubr.bf16.mxu1 %v7692_v34  ;;  %2041 = vmatprep.mubr.bf16.mxu0 %v7692_v34  ;;  %v1264_v6 = vmax.f32 %v1204_v62, 0.0 }
 0x3bd   : > { %v1199_v5 = vadd.f32 %v8207_v52, %v1198_v4  ;;  %v1262_v10 = vmax.f32 %v1196_v1, 0.0 }
 0x3be   : > { %v1265_v7 = vmax.f32 %v1207_v3, 0.0 }
 0x3bf   : > { %v1263_v11 = vmax.f32 %v1199_v5, 0.0 }
 0x3c0   : > { %v8293_v12 = vpack.c.bf16 %v1265_v7, %v1264_v6 }
 0x3c1   : > { %v8295_v13 = vpack.c.bf16 %v1263_v11, %v1262_v10 }
 0x3c3   : > { %1849 = vmatmul.mubr.bf16.gmra.mrb[72].mxu1 %v8295_v13  ;;  %2042 = vmatmul.mubr.bf16.gmra.mrb[72].mxu0 %v8295_v13 }
 0x3c4   : > { %1858 = vmatprep.mubr.bf16.mxu1 %v7692_v34  ;;  %2051 = vmatprep.mubr.bf16.mxu0 %v7692_v34 }
 0x3c9   : > { %v6574_v14 = vpop.f32.mrb[24].mxu1 }
 0x3ca   : > { %v1220_v15 = vadd.f32 %v6574_v14, %v8207_v52  ;;  %v1211_v16 = vpop.f32.mrb[25].mxu1 }
 0x3cb   : > { %v1212_v17 = vadd.f32 %v8207_v52, %v1211_v16  ;;  %v6575_v18 = vpop.f32.mrb[26].mxu1  ;;  %1859 = vmatmul.mubr.bf16.gmra.mrb[76].mxu1 %v8293_v12  ;;  %2052 = vmatmul.mubr.bf16.gmra.mrb[76].mxu0 %v8293_v12 }
 0x3cc   : > { %v1223_v19 = vadd.f32 %v6575_v18, %v8207_v52  ;;  %v1214_v20 = vpop.f32.mrb[27].mxu1  ;;  %1868 = vmatprep.mubr.bf16.mxu1 %v7692_v34  ;;  %2061 = vmatprep.mubr.bf16.mxu0 %v7692_v34  ;;  %v1268_v22 = vmax.f32 %v1220_v15, 0.0 }
 0x3cd   : > { %v1215_v21 = vadd.f32 %v8207_v52, %v1214_v20  ;;  %v1266_v24 = vmax.f32 %v1212_v17, 0.0 }
 0x3ce   : > { %v1269_v23 = vmax.f32 %v1223_v19, 0.0 }
 0x3cf   : > { %v1267_v25 = vmax.f32 %v1215_v21, 0.0 }
 0x3d0   : > { %v8309_v26 = vpack.c.bf16 %v1269_v23, %v1268_v22 }
 0x3d1   : > { %v8311_v27 = vpack.c.bf16 %v1267_v25, %v1266_v24 }
 0x3d3   : > { %1869 = vmatmul.mubr.bf16.gmra.mrb[80].mxu1 %v8311_v27  ;;  %2062 = vmatmul.mubr.bf16.gmra.mrb[80].mxu0 %v8311_v27 }
 0x3d4   : > { %1878 = vmatprep.mubr.bf16.mxu1 %v7692_v34  ;;  %2071 = vmatprep.mubr.bf16.mxu0 %v7692_v34 }
 0x3d9   : > { %v6578_v30 = vpop.f32.mrb[28].mxu1 }
 0x3da   : > { %v1236_v31 = vadd.f32 %v6578_v30, %v8207_v52  ;;  %v1227_v32 = vpop.f32.mrb[29].mxu1 }
 0x3db   : > { %v1228_v33 = vadd.f32 %v8207_v52, %v1227_v32  ;;  %v6579_v35 = vpop.f32.mrb[30].mxu1  ;;  %1879 = vmatmul.mubr.bf16.gmra.mrb[84].mxu1 %v8309_v26  ;;  %2072 = vmatmul.mubr.bf16.gmra.mrb[84].mxu0 %v8309_v26 }
 0x3dc   : > { %v1239_v36 = vadd.f32 %v6579_v35, %v8207_v52  ;;  %v1230_v37 = vpop.f32.mrb[31].mxu1  ;;  %1888 = vmatprep.mubr.bf16.mxu1 %v7692_v34  ;;  %2081 = vmatprep.mubr.bf16.mxu0 %v7692_v34  ;;  %v1272_v39 = vmax.f32 %v1236_v31, 0.0 }
 0x3dd   : > { %v1231_v38 = vadd.f32 %v8207_v52, %v1230_v37  ;;  %v1270_v41 = vmax.f32 %v1228_v33, 0.0  ;;  %v1356_v52 = vlaneseq }
 0x3de   : > { %v1273_v40 = vmax.f32 %v1239_v36, 0.0 }
 0x3df   : > { %v1271_v42 = vmax.f32 %v1231_v38, 0.0 }
 0x3e0   : > { %v8325_v45 = vpack.c.bf16 %v1273_v40, %v1272_v39 }
 0x3e1   : > { %v8327_v46 = vpack.c.bf16 %v1271_v42, %v1270_v41 }
 0x3e3   : > { %1889 = vmatmul.mubr.bf16.gmra.mrb[88].mxu1 %v8327_v46  ;;  %2082 = vmatmul.mubr.bf16.gmra.mrb[88].mxu0 %v8327_v46 }
 0x3e4   : > { %1898 = vmatprep.mubr.bf16.mxu1 %v7692_v34  ;;  %2091 = vmatprep.mubr.bf16.mxu0 %v7692_v34 }
 0x3eb   : > { %1899 = vmatmul.mubr.bf16.gmra.mrb[92].mxu1 %v8325_v45  ;;  %2092 = vmatmul.mubr.bf16.gmra.mrb[92].mxu0 %v8325_v45 }
 0x3ec   : > { %2134 = vmatprep.mubr.bf16.mxu1 %v7692_v34  ;;  %2327 = vmatprep.mubr.bf16.mxu0 %v7692_v34 }
 0x3f3   : > { %2135 = vmatmul.mubr.bf16.vlgmr.msra.gmra.mrb[96].mxu1 %v8215_v9  ;;  %2328 = vmatmul.mubr.bf16.vlgmr.msra.gmra.mrb[96].mxu0 %v8215_v9 }
 0x3f4   : > { %2144 = vmatprep.mubr.bf16.mxu1 %v7692_v34  ;;  %2337 = vmatprep.mubr.bf16.mxu0 %v7692_v34 }
 0x3fb   : > { %2145 = vmatmul.mubr.bf16.gmra.mrb[100].mxu1 %v8213_v8  ;;  %2338 = vmatmul.mubr.bf16.gmra.mrb[100].mxu0 %v8213_v8  ;;  %v8375_v8 = vshrl.u32 %v1356_v52, 7 }
 0x3fc   : > { %2154 = vmatprep.mubr.bf16.mxu1 %v7692_v34  ;;  %2347 = vmatprep.mubr.bf16.mxu0 %v7692_v34 }
 0x3fd   : > { %v8380_v9 = vsub.s32 0, %v8375_v8 }
 0x403   : > { %2155 = vmatmul.mubr.bf16.gmra.mrb[104].mxu1 %v8231_v51  ;;  %2348 = vmatmul.mubr.bf16.gmra.mrb[104].mxu0 %v8231_v51  ;;  %v1354_v51 = vld [vmem:[%s8957_s10] sm:$0xff] }
 0x404   : > { %2164 = vmatprep.mubr.bf16.mxu1 %v7692_v34  ;;  %2357 = vmatprep.mubr.bf16.mxu0 %v7692_v34 }
 0x40b   : > { %2165 = vmatmul.mubr.bf16.gmra.mrb[108].mxu1 %v8229_v50  ;;  %2358 = vmatmul.mubr.bf16.gmra.mrb[108].mxu0 %v8229_v50  ;;  %v1366_v50 = vsub.s32 2, %v8375_v8 }
 0x40c   : > { %2174 = vmatprep.mubr.bf16.mxu1 %v7692_v34  ;;  %2367 = vmatprep.mubr.bf16.mxu0 %v7692_v34 }
 0x413   : > { %2175 = vmatmul.mubr.bf16.gmra.mrb[112].mxu1 %v8247_v29  ;;  %2368 = vmatmul.mubr.bf16.gmra.mrb[112].mxu0 %v8247_v29  ;;  %v1370_v29 = vsub.s32 3, %v8375_v8 }
 0x414   : > { %2184 = vmatprep.mubr.bf16.mxu1 %v7692_v34  ;;  %2377 = vmatprep.mubr.bf16.mxu0 %v7692_v34 }
 0x415   : > { %v8404_v48 = vrot.slane %v1354_v51, %v1370_v29 }
 0x41b   : > { %2185 = vmatmul.mubr.bf16.gmra.mrb[116].mxu1 %v8245_v28  ;;  %2378 = vmatmul.mubr.bf16.gmra.mrb[116].mxu0 %v8245_v28  ;;  %v8387_v28 = vsub.s32 1, %v8375_v8 }
 0x41c   : > { %2194 = vmatprep.mubr.bf16.mxu1 %v7692_v34  ;;  %2387 = vmatprep.mubr.bf16.mxu0 %v7692_v34 }
 0x41d   : > { %v8400_v47 = vrot.slane %v1354_v51, %v8387_v28 }
 0x423   : > { %2195 = vmatmul.mubr.bf16.gmra.mrb[120].mxu1 %v8263_v44  ;;  %2388 = vmatmul.mubr.bf16.gmra.mrb[120].mxu0 %v8263_v44  ;;  %v8397_v44 = vrot.slane %v1354_v51, %v1366_v50 }
 0x424   : > { %2204 = vmatprep.mubr.bf16.mxu1 %v7692_v34  ;;  %2397 = vmatprep.mubr.bf16.mxu0 %v7692_v34 }
 0x42b   : > { %2205 = vmatmul.mubr.bf16.gmra.mrb[124].mxu1 %v8261_v43  ;;  %2398 = vmatmul.mubr.bf16.gmra.mrb[124].mxu0 %v8261_v43  ;;  %v8393_v43 = vrot.slane %v1354_v51, %v8380_v9 }
 0x42c   : > { %2214 = vmatprep.mubr.bf16.mxu1 %v7692_v34  ;;  %2407 = vmatprep.mubr.bf16.mxu0 %v7692_v34 }
 0x433   : > { %2215 = vmatmul.mubr.bf16.gmra.mrb[128].mxu1 %v8279_v60  ;;  %2408 = vmatmul.mubr.bf16.gmra.mrb[128].mxu0 %v8279_v60 }
 0x434   : > { %2224 = vmatprep.mubr.bf16.mxu1 %v7692_v34  ;;  %2417 = vmatprep.mubr.bf16.mxu0 %v7692_v34 }
 0x43b   : > { %2225 = vmatmul.mubr.bf16.gmra.mrb[132].mxu1 %v8277_v58  ;;  %2418 = vmatmul.mubr.bf16.gmra.mrb[132].mxu0 %v8277_v58 }
 0x43c   : > { %2234 = vmatprep.mubr.bf16.mxu1 %v7692_v34  ;;  %2427 = vmatprep.mubr.bf16.mxu0 %v7692_v34 }
 0x443   : > { %2235 = vmatmul.mubr.bf16.gmra.mrb[136].mxu1 %v8295_v13  ;;  %2428 = vmatmul.mubr.bf16.gmra.mrb[136].mxu0 %v8295_v13 }
 0x444   : > { %2244 = vmatprep.mubr.bf16.mxu1 %v7692_v34  ;;  %2437 = vmatprep.mubr.bf16.mxu0 %v7692_v34 }
 0x446   : > { %v1750_v56 = vpop.f32.mrb[32].mxu1  ;;  %v1943_v57 = vpop.f32.mrb[32].mxu0 }
 0x447   : > { %v1751_v59 = vadd.f32 %v1750_v56, %v8393_v43  ;;  %v1944_v49 = vadd.f32 %v1943_v57, %v8397_v44  ;;  %v1752_v53 = vpop.f32.mrb[33].mxu1  ;;  %v1945_v54 = vpop.f32.mrb[33].mxu0 }
 0x448   : > { %v1753_v55 = vadd.f32 %v1752_v53, %v8400_v47  ;;  %v1946_v63 = vadd.f32 %v1945_v54, %v8404_v48  ;;  %v1754_v58 = vpop.f32.mrb[34].mxu1  ;;  %v1947_v60 = vpop.f32.mrb[34].mxu0 }
 0x449   : > { %v1755_v61 = vadd.f32 %v1754_v58, %v8393_v43  ;;  %v1948_v62 = vadd.f32 %v1947_v60, %v8397_v44  ;;  %v1756_v0 = vpop.f32.mrb[35].mxu1  ;;  %v1949_v1 = vpop.f32.mrb[35].mxu0  ;;  %v2488_v4 = vmax.f32 %v1751_v59, 0.0  ;;  %v2490_v5 = vmax.f32 %v1944_v49, 0.0 }
 0x44a   : > { %v1757_v2 = vadd.f32 %v1756_v0, %v8400_v47  ;;  %v1950_v3 = vadd.f32 %v1949_v1, %v8404_v48  ;;  %v2489_v10 = vmax.f32 %v1753_v55, 0.0  ;;  %v2491_v11 = vmax.f32 %v1946_v63, 0.0 }
 0x44b   : > { %v2496_v6 = vmax.f32 %v1755_v61, 0.0  ;;  %v2498_v7 = vmax.f32 %v1948_v62, 0.0  ;;  %2245 = vmatmul.mubr.bf16.gmra.mrb[140].mxu1 %v8293_v12  ;;  %2438 = vmatmul.mubr.bf16.gmra.mrb[140].mxu0 %v8293_v12 }
 0x44c   : > { %v2497_v13 = vmax.f32 %v1757_v2, 0.0  ;;  %v2499_v14 = vmax.f32 %v1950_v3, 0.0  ;;  %2254 = vmatprep.mubr.bf16.mxu1 %v7692_v34  ;;  %2447 = vmatprep.mubr.bf16.mxu0 %v7692_v34 }
 0x44d   : > { %v2744_v15 = vmax.f32 %v2488_v4, %v2496_v6  ;;  %v2786_v16 = vmax.f32 %v2490_v5, %v2498_v7 }
 0x44e   : > { %v2765_v17 = vmax.f32 %v2489_v10, %v2497_v13  ;;  %v2807_v18 = vmax.f32 %v2491_v11, %v2499_v14  ;;  %v1760_v19 = vpop.f32.mrb[36].mxu1  ;;  %v1953_v20 = vpop.f32.mrb[36].mxu0 }
 0x44f   : > { %v1761_v21 = vadd.f32 %v1760_v19, %v8393_v43  ;;  %v1954_v22 = vadd.f32 %v1953_v20, %v8397_v44  ;;  %v1762_v23 = vpop.f32.mrb[37].mxu1  ;;  %v1955_v12 = vpop.f32.mrb[37].mxu0 }
 0x450   : > { %v1763_v24 = vadd.f32 %v1762_v23, %v8400_v47  ;;  %v1956_v25 = vadd.f32 %v1955_v12, %v8404_v48  ;;  %v1764_v30 = vpop.f32.mrb[38].mxu1  ;;  %v1957_v31 = vpop.f32.mrb[38].mxu0 }
 0x451   : > { %v2504_v32 = vmax.f32 %v1761_v21, 0.0  ;;  %v2506_v33 = vmax.f32 %v1954_v22, 0.0  ;;  %v1765_v35 = vadd.f32 %v1764_v30, %v8393_v43  ;;  %v1958_v36 = vadd.f32 %v1957_v31, %v8397_v44  ;;  %v1766_v37 = vpop.f32.mrb[39].mxu1  ;;  %v1959_v38 = vpop.f32.mrb[39].mxu0 }
 0x452   : > { %v2505_v39 = vmax.f32 %v1763_v24, 0.0  ;;  %v2507_v40 = vmax.f32 %v1956_v25, 0.0  ;;  %v1767_v41 = vadd.f32 %v1766_v37, %v8400_v47  ;;  %v1960_v42 = vadd.f32 %v1959_v38, %v8404_v48 }
 0x453   : > { %v2745_v52 = vmax.f32 %v2744_v15, %v2504_v32  ;;  %v2787_v51 = vmax.f32 %v2786_v16, %v2506_v33  ;;  %v2512_v56 = vmax.f32 %v1765_v35, 0.0  ;;  %v2514_v57 = vmax.f32 %v1958_v36, 0.0  ;;  %2255 = vmatmul.mubr.bf16.gmra.mrb[144].mxu1 %v8311_v27  ;;  %2448 = vmatmul.mubr.bf16.gmra.mrb[144].mxu0 %v8311_v27 }
 0x454   : > { %v2766_v59 = vmax.f32 %v2765_v17, %v2505_v39  ;;  %v2808_v49 = vmax.f32 %v2807_v18, %v2507_v40  ;;  %v2513_v53 = vmax.f32 %v1767_v41, 0.0  ;;  %v2515_v54 = vmax.f32 %v1960_v42, 0.0  ;;  %2264 = vmatprep.mubr.bf16.mxu1 %v7692_v34  ;;  %2457 = vmatprep.mubr.bf16.mxu0 %v7692_v34 }
 0x455   : > { %v2746_v55 = vmax.f32 %v2745_v52, %v2512_v56  ;;  %v2788_v63 = vmax.f32 %v2787_v51, %v2514_v57 }
 0x456   : > { %v2767_v58 = vmax.f32 %v2766_v59, %v2513_v53  ;;  %v2809_v60 = vmax.f32 %v2808_v49, %v2515_v54  ;;  %v1770_v61 = vpop.f32.mrb[40].mxu1  ;;  %v1963_v62 = vpop.f32.mrb[40].mxu0 }
 0x457   : > { %v1771_v0 = vadd.f32 %v1770_v61, %v8393_v43  ;;  %v1964_v1 = vadd.f32 %v1963_v62, %v8397_v44  ;;  %v1772_v2 = vpop.f32.mrb[41].mxu1  ;;  %v1965_v27 = vpop.f32.mrb[41].mxu0 }
 0x458   : > { %v1773_v3 = vadd.f32 %v1772_v2, %v8400_v47  ;;  %v1966_v4 = vadd.f32 %v1965_v27, %v8404_v48  ;;  %v1774_v5 = vpop.f32.mrb[42].mxu1  ;;  %v1967_v6 = vpop.f32.mrb[42].mxu0 }
 0x459   : > { %v2520_v7 = vmax.f32 %v1771_v0, 0.0  ;;  %v2522_v10 = vmax.f32 %v1964_v1, 0.0  ;;  %v1775_v11 = vadd.f32 %v1774_v5, %v8393_v43  ;;  %v1968_v13 = vadd.f32 %v1967_v6, %v8397_v44  ;;  %v1776_v14 = vpop.f32.mrb[43].mxu1  ;;  %v1969_v15 = vpop.f32.mrb[43].mxu0 }
 0x45a   : > { %v2521_v16 = vmax.f32 %v1773_v3, 0.0  ;;  %v2523_v17 = vmax.f32 %v1966_v4, 0.0  ;;  %v1777_v18 = vadd.f32 %v1776_v14, %v8400_v47  ;;  %v1970_v19 = vadd.f32 %v1969_v15, %v8404_v48 }
 0x45b   : > { %v2747_v20 = vmax.f32 %v2746_v55, %v2520_v7  ;;  %v2789_v21 = vmax.f32 %v2788_v63, %v2522_v10  ;;  %v2528_v22 = vmax.f32 %v1775_v11, 0.0  ;;  %v2530_v23 = vmax.f32 %v1968_v13, 0.0  ;;  %2265 = vmatmul.mubr.bf16.gmra.mrb[148].mxu1 %v8309_v26  ;;  %2458 = vmatmul.mubr.bf16.gmra.mrb[148].mxu0 %v8309_v26 }
 0x45c   : > { %v2768_v12 = vmax.f32 %v2767_v58, %v2521_v16  ;;  %v2810_v24 = vmax.f32 %v2809_v60, %v2523_v17  ;;  %v2529_v25 = vmax.f32 %v1777_v18, 0.0  ;;  %v2531_v30 = vmax.f32 %v1970_v19, 0.0  ;;  %2274 = vmatprep.mubr.bf16.mxu1 %v7692_v34  ;;  %2467 = vmatprep.mubr.bf16.mxu0 %v7692_v34 }
 0x45d   : > { %v2748_v31 = vmax.f32 %v2747_v20, %v2528_v22  ;;  %v2790_v32 = vmax.f32 %v2789_v21, %v2530_v23 }
 0x45e   : > { %v2769_v33 = vmax.f32 %v2768_v12, %v2529_v25  ;;  %v2811_v35 = vmax.f32 %v2810_v24, %v2531_v30  ;;  %v1780_v36 = vpop.f32.mrb[44].mxu1  ;;  %v1973_v37 = vpop.f32.mrb[44].mxu0 }
 0x45f   : > { %v1781_v38 = vadd.f32 %v1780_v36, %v8393_v43  ;;  %v1974_v39 = vadd.f32 %v1973_v37, %v8397_v44  ;;  %v1782_v40 = vpop.f32.mrb[45].mxu1  ;;  %v1975_v26 = vpop.f32.mrb[45].mxu0 }
 0x460   : > { %v1783_v41 = vadd.f32 %v1782_v40, %v8400_v47  ;;  %v1976_v42 = vadd.f32 %v1975_v26, %v8404_v48  ;;  %v1784_v52 = vpop.f32.mrb[46].mxu1  ;;  %v1977_v51 = vpop.f32.mrb[46].mxu0 }
 0x461   : > { %v2536_v56 = vmax.f32 %v1781_v38, 0.0  ;;  %v2538_v57 = vmax.f32 %v1974_v39, 0.0  ;;  %v1785_v59 = vadd.f32 %v1784_v52, %v8393_v43  ;;  %v1978_v49 = vadd.f32 %v1977_v51, %v8397_v44  ;;  %v1786_v53 = vpop.f32.mrb[47].mxu1  ;;  %v1979_v54 = vpop.f32.mrb[47].mxu0 }
 0x462   : > { %v2537_v55 = vmax.f32 %v1783_v41, 0.0  ;;  %v2539_v63 = vmax.f32 %v1976_v42, 0.0  ;;  %v1787_v58 = vadd.f32 %v1786_v53, %v8400_v47  ;;  %v1980_v60 = vadd.f32 %v1979_v54, %v8404_v48 }
 0x463   : > { %v2749_v61 = vmax.f32 %v2748_v31, %v2536_v56  ;;  %v2791_v62 = vmax.f32 %v2790_v32, %v2538_v57  ;;  %v2544_v0 = vmax.f32 %v1785_v59, 0.0  ;;  %v2546_v1 = vmax.f32 %v1978_v49, 0.0  ;;  %2275 = vmatmul.mubr.bf16.gmra.mrb[152].mxu1 %v8327_v46  ;;  %2468 = vmatmul.mubr.bf16.gmra.mrb[152].mxu0 %v8327_v46 }
 0x464   : > { %v2770_v2 = vmax.f32 %v2769_v33, %v2537_v55  ;;  %v2812_v27 = vmax.f32 %v2811_v35, %v2539_v63  ;;  %v2545_v3 = vmax.f32 %v1787_v58, 0.0  ;;  %v2547_v4 = vmax.f32 %v1980_v60, 0.0  ;;  %2284 = vmatprep.mubr.bf16.mxu1 %v7692_v34  ;;  %2477 = vmatprep.mubr.bf16.mxu0 %v7692_v34 }
 0x465   : > { %v2750_v5 = vmax.f32 %v2749_v61, %v2544_v0  ;;  %v2792_v6 = vmax.f32 %v2791_v62, %v2546_v1 }
 0x466   : > { %v2771_v7 = vmax.f32 %v2770_v2, %v2545_v3  ;;  %v2813_v10 = vmax.f32 %v2812_v27, %v2547_v4  ;;  %v1790_v11 = vpop.f32.mrb[48].mxu1  ;;  %v1983_v13 = vpop.f32.mrb[48].mxu0 }
 0x467   : > { %v1791_v14 = vadd.f32 %v1790_v11, %v8393_v43  ;;  %v1984_v15 = vadd.f32 %v1983_v13, %v8397_v44  ;;  %v1792_v16 = vpop.f32.mrb[49].mxu1  ;;  %v1985_v46 = vpop.f32.mrb[49].mxu0 }
 0x468   : > { %v1793_v17 = vadd.f32 %v1792_v16, %v8400_v47  ;;  %v1986_v18 = vadd.f32 %v1985_v46, %v8404_v48  ;;  %v1794_v19 = vpop.f32.mrb[50].mxu1  ;;  %v1987_v20 = vpop.f32.mrb[50].mxu0 }
 0x469   : > { %v2552_v21 = vmax.f32 %v1791_v14, 0.0  ;;  %v2554_v34 = vmax.f32 %v1984_v15, 0.0  ;;  %v1795_v22 = vadd.f32 %v1794_v19, %v8393_v43  ;;  %v1988_v23 = vadd.f32 %v1987_v20, %v8397_v44  ;;  %v1796_v12 = vpop.f32.mrb[51].mxu1  ;;  %v1989_v24 = vpop.f32.mrb[51].mxu0 }
 0x46a   : > { %v2553_v25 = vmax.f32 %v1793_v17, 0.0  ;;  %v2555_v30 = vmax.f32 %v1986_v18, 0.0  ;;  %v1797_v31 = vadd.f32 %v1796_v12, %v8400_v47  ;;  %v1990_v32 = vadd.f32 %v1989_v24, %v8404_v48 }
 0x46b   : > { %v2751_v33 = vmax.f32 %v2750_v5, %v2552_v21  ;;  %v2793_v35 = vmax.f32 %v2792_v6, %v2554_v34  ;;  %v2560_v36 = vmax.f32 %v1795_v22, 0.0  ;;  %v2562_v37 = vmax.f32 %v1988_v23, 0.0  ;;  %2285 = vmatmul.mubr.bf16.gmra.mrb[156].mxu1 %v8325_v45  ;;  %2478 = vmatmul.mubr.bf16.gmra.mrb[156].mxu0 %v8325_v45 }
 0x46c   : > { %v2772_v38 = vmax.f32 %v2771_v7, %v2553_v25  ;;  %v2814_v39 = vmax.f32 %v2813_v10, %v2555_v30  ;;  %v2561_v40 = vmax.f32 %v1797_v31, 0.0  ;;  %v2563_v26 = vmax.f32 %v1990_v32, 0.0 }
 0x46d   : > { %v2752_v41 = vmax.f32 %v2751_v33, %v2560_v36  ;;  %v2794_v42 = vmax.f32 %v2793_v35, %v2562_v37 }
 0x46e   : > { %v2773_v52 = vmax.f32 %v2772_v38, %v2561_v40  ;;  %v2815_v51 = vmax.f32 %v2814_v39, %v2563_v26  ;;  %v1800_v56 = vpop.f32.mrb[52].mxu1  ;;  %v1993_v57 = vpop.f32.mrb[52].mxu0 }
 0x46f   : > { %v1801_v59 = vadd.f32 %v1800_v56, %v8393_v43  ;;  %v1994_v49 = vadd.f32 %v1993_v57, %v8397_v44  ;;  %v1802_v53 = vpop.f32.mrb[53].mxu1  ;;  %v1995_v54 = vpop.f32.mrb[53].mxu0 }
 0x470   : > { %v1803_v55 = vadd.f32 %v1802_v53, %v8400_v47  ;;  %v1996_v45 = vadd.f32 %v1995_v54, %v8404_v48  ;;  %v1804_v63 = vpop.f32.mrb[54].mxu1  ;;  %v1997_v58 = vpop.f32.mrb[54].mxu0 }
 0x471   : > { %v2568_v60 = vmax.f32 %v1801_v59, 0.0  ;;  %v2570_v61 = vmax.f32 %v1994_v49, 0.0  ;;  %v1805_v62 = vadd.f32 %v1804_v63, %v8393_v43  ;;  %v1998_v0 = vadd.f32 %v1997_v58, %v8397_v44  ;;  %v1806_v1 = vpop.f32.mrb[55].mxu1  ;;  %v1999_v2 = vpop.f32.mrb[55].mxu0 }
 0x472   : > { %v2569_v27 = vmax.f32 %v1803_v55, 0.0  ;;  %v2571_v3 = vmax.f32 %v1996_v45, 0.0  ;;  %v1807_v4 = vadd.f32 %v1806_v1, %v8400_v47  ;;  %v2000_v5 = vadd.f32 %v1999_v2, %v8404_v48 }
 0x473   : > { %v2753_v6 = vmax.f32 %v2752_v41, %v2568_v60  ;;  %v2795_v7 = vmax.f32 %v2794_v42, %v2570_v61  ;;  %v2576_v10 = vmax.f32 %v1805_v62, 0.0  ;;  %v2578_v11 = vmax.f32 %v1998_v0, 0.0 }
 0x474   : > { %v2774_v13 = vmax.f32 %v2773_v52, %v2569_v27  ;;  %v2816_v14 = vmax.f32 %v2815_v51, %v2571_v3  ;;  %v2577_v15 = vmax.f32 %v1807_v4, 0.0  ;;  %v2579_v16 = vmax.f32 %v2000_v5, 0.0 }
 0x475   : > { %v2754_v46 = vmax.f32 %v2753_v6, %v2576_v10  ;;  %v2796_v17 = vmax.f32 %v2795_v7, %v2578_v11 }
 0x476   : > { %v2775_v18 = vmax.f32 %v2774_v13, %v2577_v15  ;;  %v2817_v19 = vmax.f32 %v2816_v14, %v2579_v16  ;;  %v1810_v20 = vpop.f32.mrb[56].mxu1  ;;  %v2003_v21 = vpop.f32.mrb[56].mxu0 }
 0x477   : > { %v1811_v34 = vadd.f32 %v1810_v20, %v8393_v43  ;;  %v2004_v22 = vadd.f32 %v2003_v21, %v8397_v44  ;;  %v1812_v23 = vpop.f32.mrb[57].mxu1  ;;  %v2005_v12 = vpop.f32.mrb[57].mxu0 }
 0x478   : > { %v1813_v24 = vadd.f32 %v1812_v23, %v8400_v47  ;;  %v2006_v25 = vadd.f32 %v2005_v12, %v8404_v48  ;;  %v1814_v30 = vpop.f32.mrb[58].mxu1  ;;  %v2007_v31 = vpop.f32.mrb[58].mxu0 }
 0x479   : > { %v2584_v32 = vmax.f32 %v1811_v34, 0.0  ;;  %v2586_v33 = vmax.f32 %v2004_v22, 0.0  ;;  %v1815_v35 = vadd.f32 %v1814_v30, %v8393_v43  ;;  %v2008_v36 = vadd.f32 %v2007_v31, %v8397_v44  ;;  %v1816_v37 = vpop.f32.mrb[59].mxu1  ;;  %v2009_v38 = vpop.f32.mrb[59].mxu0 }
 0x47a   : > { %v2585_v39 = vmax.f32 %v1813_v24, 0.0  ;;  %v2587_v40 = vmax.f32 %v2006_v25, 0.0  ;;  %v1817_v26 = vadd.f32 %v1816_v37, %v8400_v47  ;;  %v2010_v41 = vadd.f32 %v2009_v38, %v8404_v48 }
 0x47b   : > { %v2755_v42 = vmax.f32 %v2754_v46, %v2584_v32  ;;  %v2797_v52 = vmax.f32 %v2796_v17, %v2586_v33  ;;  %v2592_v51 = vmax.f32 %v1815_v35, 0.0  ;;  %v2594_v56 = vmax.f32 %v2008_v36, 0.0 }
 0x47c   : > { %v2776_v57 = vmax.f32 %v2775_v18, %v2585_v39  ;;  %v2818_v59 = vmax.f32 %v2817_v19, %v2587_v40  ;;  %v2593_v49 = vmax.f32 %v1817_v26, 0.0  ;;  %v2595_v53 = vmax.f32 %v2010_v41, 0.0 }
 0x47d   : > { %v2756_v54 = vmax.f32 %v2755_v42, %v2592_v51  ;;  %v2798_v55 = vmax.f32 %v2797_v52, %v2594_v56 }
 0x47e   : > { %v2777_v45 = vmax.f32 %v2776_v57, %v2593_v49  ;;  %v2819_v63 = vmax.f32 %v2818_v59, %v2595_v53  ;;  %v1820_v58 = vpop.f32.mrb[60].mxu1  ;;  %v2013_v60 = vpop.f32.mrb[60].mxu0 }
 0x47f   : > { %v1821_v61 = vadd.f32 %v1820_v58, %v8393_v43  ;;  %v2014_v62 = vadd.f32 %v2013_v60, %v8397_v44  ;;  %v1822_v0 = vpop.f32.mrb[61].mxu1  ;;  %v2015_v1 = vpop.f32.mrb[61].mxu0 }
 0x480   : > { %v1823_v2 = vadd.f32 %v1822_v0, %v8400_v47  ;;  %v2016_v27 = vadd.f32 %v2015_v1, %v8404_v48  ;;  %v1824_v3 = vpop.f32.mrb[62].mxu1  ;;  %v2017_v4 = vpop.f32.mrb[62].mxu0 }
 0x481   : > { %v2600_v5 = vmax.f32 %v1821_v61, 0.0  ;;  %v2602_v6 = vmax.f32 %v2014_v62, 0.0  ;;  %v1825_v7 = vadd.f32 %v1824_v3, %v8393_v43  ;;  %v2018_v10 = vadd.f32 %v2017_v4, %v8397_v44  ;;  %v1826_v11 = vpop.f32.mrb[63].mxu1  ;;  %v2019_v13 = vpop.f32.mrb[63].mxu0 }
 0x482   : > { %v2601_v14 = vmax.f32 %v1823_v2, 0.0  ;;  %v2603_v15 = vmax.f32 %v2016_v27, 0.0  ;;  %v1827_v16 = vadd.f32 %v1826_v11, %v8400_v47  ;;  %v2020_v46 = vadd.f32 %v2019_v13, %v8404_v48 }
 0x483   : > { %v2757_v17 = vmax.f32 %v2756_v54, %v2600_v5  ;;  %v2799_v18 = vmax.f32 %v2798_v55, %v2602_v6  ;;  %v2608_v19 = vmax.f32 %v1825_v7, 0.0  ;;  %v2610_v20 = vmax.f32 %v2018_v10, 0.0 }
 0x484   : > { %v2778_v21 = vmax.f32 %v2777_v45, %v2601_v14  ;;  %v2820_v34 = vmax.f32 %v2819_v63, %v2603_v15  ;;  %v2609_v22 = vmax.f32 %v1827_v16, 0.0  ;;  %v2611_v23 = vmax.f32 %v2020_v46, 0.0 }
 0x485   : > { %v2758_v12 = vmax.f32 %v2757_v17, %v2608_v19  ;;  %v2800_v24 = vmax.f32 %v2799_v18, %v2610_v20 }
 0x486   : > { %v2779_v25 = vmax.f32 %v2778_v21, %v2609_v22  ;;  %v2821_v30 = vmax.f32 %v2820_v34, %v2611_v23  ;;  %v1830_v31 = vpop.f32.mrb[64].mxu1  ;;  %v2023_v32 = vpop.f32.mrb[64].mxu0 }
 0x487   : > { %v2759_v33 = vrot.slane %v2758_v12, 4  ;;  %v2801_v35 = vrot.slane %v2800_v24, 4  ;;  %v1831_v36 = vadd.f32 %v1830_v31, %v8393_v43  ;;  %v2024_v37 = vadd.f32 %v2023_v32, %v8397_v44  ;;  %v1832_v38 = vpop.f32.mrb[65].mxu1  ;;  %v2025_v39 = vpop.f32.mrb[65].mxu0 }
 0x488   : > { %v2780_v40 = vrot.slane %v2779_v25, 4  ;;  %v2822_v26 = vrot.slane %v2821_v30, 4  ;;  %v1833_v41 = vadd.f32 %v1832_v38, %v8400_v47  ;;  %v2026_v42 = vadd.f32 %v2025_v39, %v8404_v48  ;;  %v1834_v52 = vpop.f32.mrb[66].mxu1  ;;  %v2027_v51 = vpop.f32.mrb[66].mxu0 }
 0x489   : > { %v2760_v56 = vmax.f32 %v2758_v12, %v2759_v33  ;;  %v2802_v57 = vmax.f32 %v2800_v24, %v2801_v35  ;;  %v2616_v59 = vmax.f32 %v1831_v36, 0.0  ;;  %v2618_v49 = vmax.f32 %v2024_v37, 0.0  ;;  %v1836_v53 = vpop.f32.mrb[67].mxu1  ;;  %v2029_v54 = vpop.f32.mrb[67].mxu0 }
 0x48a   : > { %v2781_v55 = vmax.f32 %v2779_v25, %v2780_v40  ;;  %v2823_v45 = vmax.f32 %v2821_v30, %v2822_v26  ;;  %v2617_v63 = vmax.f32 %v1833_v41, 0.0  ;;  %v2619_v58 = vmax.f32 %v2026_v42, 0.0 }
 0x48b   : > { %v2761_v60 = vrot.slane %v2760_v56, 2  ;;  %v2803_v61 = vrot.slane %v2802_v57, 2  ;;  %v1835_v62 = vadd.f32 %v1834_v52, %v8393_v43  ;;  %v2028_v0 = vadd.f32 %v2027_v51, %v8397_v44 }
 0x48c   : > { %v2782_v1 = vrot.slane %v2781_v55, 2  ;;  %v2824_v2 = vrot.slane %v2823_v45, 2  ;;  %v1837_v27 = vadd.f32 %v1836_v53, %v8400_v47  ;;  %v2030_v3 = vadd.f32 %v2029_v54, %v8404_v48 }
 0x48d   : > { %v2762_v4 = vmax.f32 %v2760_v56, %v2761_v60  ;;  %v2804_v5 = vmax.f32 %v2802_v57, %v2803_v61  ;;  %v2624_v6 = vmax.f32 %v1835_v62, 0.0  ;;  %v2626_v7 = vmax.f32 %v2028_v0, 0.0 }
 0x48e   : > { %v2783_v10 = vmax.f32 %v2781_v55, %v2782_v1  ;;  %v2825_v11 = vmax.f32 %v2823_v45, %v2824_v2  ;;  %v2625_v13 = vmax.f32 %v1837_v27, 0.0  ;;  %v2627_v14 = vmax.f32 %v2030_v3, 0.0  ;;  %v1840_v15 = vpop.f32.mrb[68].mxu1  ;;  %v2033_v16 = vpop.f32.mrb[68].mxu0 }
 0x48f   : > { %v2763_v46 = vrot.slane %v2762_v4, 1  ;;  %v2805_v17 = vrot.slane %v2804_v5, 1  ;;  %v2912_v18 = vmax.f32 %v2616_v59, %v2624_v6  ;;  %v2954_v19 = vmax.f32 %v2618_v49, %v2626_v7  ;;  %v1842_v20 = vpop.f32.mrb[69].mxu1  ;;  %v2035_v21 = vpop.f32.mrb[69].mxu0 }
 0x490   : > { %v2784_v34 = vrot.slane %v2783_v10, 1  ;;  %v2826_v22 = vrot.slane %v2825_v11, 1  ;;  %v2933_v23 = vmax.f32 %v2617_v63, %v2625_v13  ;;  %v2975_v12 = vmax.f32 %v2619_v58, %v2627_v14  ;;  %v1844_v24 = vpop.f32.mrb[70].mxu1  ;;  %v2037_v25 = vpop.f32.mrb[70].mxu0 }
 0x491   : > { %v8498_v30 = vmax.f32 %v2762_v4, %v2763_v46  ;;  %v8500_v31 = vmax.f32 %v2804_v5, %v2805_v17  ;;  %v1841_v32 = vadd.f32 %v1840_v15, %v8393_v43  ;;  %v2034_v33 = vadd.f32 %v2033_v16, %v8397_v44  ;;  %v1846_v35 = vpop.f32.mrb[71].mxu1  ;;  %v2039_v36 = vpop.f32.mrb[71].mxu0 }
 0x492   : > { %v8504_v37 = vmax.f32 %v2783_v10, %v2784_v34  ;;  %v8506_v38 = vmax.f32 %v2825_v11, %v2826_v22  ;;  %v1843_v39 = vadd.f32 %v1842_v20, %v8400_v47  ;;  %v2036_v40 = vadd.f32 %v2035_v21, %v8404_v48 }
 0x493   : > { %v2632_v26 = vmax.f32 %v1841_v32, 0.0  ;;  %v2634_v41 = vmax.f32 %v2034_v33, 0.0  ;;  %v1845_v42 = vadd.f32 %v1844_v24, %v8393_v43  ;;  %v2038_v52 = vadd.f32 %v2037_v25, %v8397_v44 }
 0x494   : > { %v2633_v51 = vmax.f32 %v1843_v39, 0.0  ;;  %v2635_v56 = vmax.f32 %v2036_v40, 0.0  ;;  %v1847_v57 = vadd.f32 %v1846_v35, %v8400_v47  ;;  %v2040_v59 = vadd.f32 %v2039_v36, %v8404_v48 }
 0x495   : > { %v2913_v49 = vmax.f32 %v2912_v18, %v2632_v26  ;;  %v2955_v53 = vmax.f32 %v2954_v19, %v2634_v41  ;;  %v2640_v54 = vmax.f32 %v1845_v42, 0.0  ;;  %v2642_v55 = vmax.f32 %v2038_v52, 0.0 }
 0x496   : > { %v2934_v45 = vmax.f32 %v2933_v23, %v2633_v51  ;;  %v2976_v63 = vmax.f32 %v2975_v12, %v2635_v56  ;;  %v2641_v58 = vmax.f32 %v1847_v57, 0.0  ;;  %v2643_v60 = vmax.f32 %v2040_v59, 0.0  ;;  %v1850_v61 = vpop.f32.mrb[72].mxu1  ;;  %v2043_v62 = vpop.f32.mrb[72].mxu0 }
 0x497   : > { %v2914_v0 = vmax.f32 %v2913_v49, %v2640_v54  ;;  %v2956_v1 = vmax.f32 %v2955_v53, %v2642_v55  ;;  %v1851_v2 = vadd.f32 %v1850_v61, %v8393_v43  ;;  %v2044_v27 = vadd.f32 %v2043_v62, %v8397_v44  ;;  %v1852_v3 = vpop.f32.mrb[73].mxu1  ;;  %v2045_v4 = vpop.f32.mrb[73].mxu0 }
 0x498   : > { %v2935_v5 = vmax.f32 %v2934_v45, %v2641_v58  ;;  %v2977_v6 = vmax.f32 %v2976_v63, %v2643_v60  ;;  %v1853_v7 = vadd.f32 %v1852_v3, %v8400_v47  ;;  %v2046_v10 = vadd.f32 %v2045_v4, %v8404_v48  ;;  %v1854_v11 = vpop.f32.mrb[74].mxu1  ;;  %v2047_v13 = vpop.f32.mrb[74].mxu0 }
 0x499   : > { %v2648_v14 = vmax.f32 %v1851_v2, 0.0  ;;  %v2650_v15 = vmax.f32 %v2044_v27, 0.0  ;;  %v1855_v16 = vadd.f32 %v1854_v11, %v8393_v43  ;;  %v2048_v46 = vadd.f32 %v2047_v13, %v8397_v44  ;;  %v1856_v17 = vpop.f32.mrb[75].mxu1  ;;  %v2049_v18 = vpop.f32.mrb[75].mxu0 }
 0x49a   : > { %v2649_v19 = vmax.f32 %v1853_v7, 0.0  ;;  %v2651_v20 = vmax.f32 %v2046_v10, 0.0  ;;  %v1857_v21 = vadd.f32 %v1856_v17, %v8400_v47  ;;  %v2050_v34 = vadd.f32 %v2049_v18, %v8404_v48 }
 0x49b   : > { %v2915_v22 = vmax.f32 %v2914_v0, %v2648_v14  ;;  %v2957_v23 = vmax.f32 %v2956_v1, %v2650_v15  ;;  %v2656_v12 = vmax.f32 %v1855_v16, 0.0  ;;  %v2658_v24 = vmax.f32 %v2048_v46, 0.0 }
 0x49c   : > { %v2936_v25 = vmax.f32 %v2935_v5, %v2649_v19  ;;  %v2978_v32 = vmax.f32 %v2977_v6, %v2651_v20  ;;  %v2657_v33 = vmax.f32 %v1857_v21, 0.0  ;;  %v2659_v35 = vmax.f32 %v2050_v34, 0.0 }
 0x49d   : > { %v2916_v36 = vmax.f32 %v2915_v22, %v2656_v12  ;;  %v2958_v39 = vmax.f32 %v2957_v23, %v2658_v24 }
 0x49e   : > { %v2937_v40 = vmax.f32 %v2936_v25, %v2657_v33  ;;  %v2979_v26 = vmax.f32 %v2978_v32, %v2659_v35  ;;  %v1860_v41 = vpop.f32.mrb[76].mxu1  ;;  %v2053_v42 = vpop.f32.mrb[76].mxu0 }
 0x49f   : > { %v1861_v52 = vadd.f32 %v1860_v41, %v8393_v43  ;;  %v2054_v51 = vadd.f32 %v2053_v42, %v8397_v44  ;;  %v1862_v56 = vpop.f32.mrb[77].mxu1  ;;  %v2055_v57 = vpop.f32.mrb[77].mxu0 }
 0x4a0   : > { %v1863_v59 = vadd.f32 %v1862_v56, %v8400_v47  ;;  %v2056_v49 = vadd.f32 %v2055_v57, %v8404_v48  ;;  %v1864_v53 = vpop.f32.mrb[78].mxu1  ;;  %v2057_v54 = vpop.f32.mrb[78].mxu0 }
 0x4a1   : > { %v2664_v55 = vmax.f32 %v1861_v52, 0.0  ;;  %v2666_v45 = vmax.f32 %v2054_v51, 0.0  ;;  %v1865_v63 = vadd.f32 %v1864_v53, %v8393_v43  ;;  %v2058_v58 = vadd.f32 %v2057_v54, %v8397_v44  ;;  %v1866_v60 = vpop.f32.mrb[79].mxu1  ;;  %v2059_v61 = vpop.f32.mrb[79].mxu0 }
 0x4a2   : > { %v2665_v62 = vmax.f32 %v1863_v59, 0.0  ;;  %v2667_v0 = vmax.f32 %v2056_v49, 0.0  ;;  %v1867_v1 = vadd.f32 %v1866_v60, %v8400_v47  ;;  %v2060_v2 = vadd.f32 %v2059_v61, %v8404_v48 }
 0x4a3   : > { %v2917_v27 = vmax.f32 %v2916_v36, %v2664_v55  ;;  %v2959_v3 = vmax.f32 %v2958_v39, %v2666_v45  ;;  %v2672_v4 = vmax.f32 %v1865_v63, 0.0  ;;  %v2674_v5 = vmax.f32 %v2058_v58, 0.0 }
 0x4a4   : > { %v2938_v6 = vmax.f32 %v2937_v40, %v2665_v62  ;;  %v2980_v7 = vmax.f32 %v2979_v26, %v2667_v0  ;;  %v2673_v10 = vmax.f32 %v1867_v1, 0.0  ;;  %v2675_v11 = vmax.f32 %v2060_v2, 0.0 }
 0x4a5   : > { %v2918_v13 = vmax.f32 %v2917_v27, %v2672_v4  ;;  %v2960_v14 = vmax.f32 %v2959_v3, %v2674_v5 }
 0x4a6   : > { %v2939_v15 = vmax.f32 %v2938_v6, %v2673_v10  ;;  %v2981_v16 = vmax.f32 %v2980_v7, %v2675_v11  ;;  %v1870_v46 = vpop.f32.mrb[80].mxu1  ;;  %v2063_v17 = vpop.f32.mrb[80].mxu0 }
 0x4a7   : > { %v1871_v18 = vadd.f32 %v1870_v46, %v8393_v43  ;;  %v2064_v19 = vadd.f32 %v2063_v17, %v8397_v44  ;;  %v1872_v20 = vpop.f32.mrb[81].mxu1  ;;  %v2065_v21 = vpop.f32.mrb[81].mxu0 }
 0x4a8   : > { %v1873_v34 = vadd.f32 %v1872_v20, %v8400_v47  ;;  %v2066_v22 = vadd.f32 %v2065_v21, %v8404_v48  ;;  %v1874_v23 = vpop.f32.mrb[82].mxu1  ;;  %v2067_v12 = vpop.f32.mrb[82].mxu0 }
 0x4a9   : > { %v2680_v24 = vmax.f32 %v1871_v18, 0.0  ;;  %v2682_v25 = vmax.f32 %v2064_v19, 0.0  ;;  %v1875_v32 = vadd.f32 %v1874_v23, %v8393_v43  ;;  %v2068_v33 = vadd.f32 %v2067_v12, %v8397_v44  ;;  %v1876_v35 = vpop.f32.mrb[83].mxu1  ;;  %v2069_v36 = vpop.f32.mrb[83].mxu0 }
 0x4aa   : > { %v2681_v39 = vmax.f32 %v1873_v34, 0.0  ;;  %v2683_v40 = vmax.f32 %v2066_v22, 0.0  ;;  %v1877_v26 = vadd.f32 %v1876_v35, %v8400_v47  ;;  %v2070_v41 = vadd.f32 %v2069_v36, %v8404_v48 }
 0x4ab   : > { %v2919_v42 = vmax.f32 %v2918_v13, %v2680_v24  ;;  %v2961_v52 = vmax.f32 %v2960_v14, %v2682_v25  ;;  %v2688_v51 = vmax.f32 %v1875_v32, 0.0  ;;  %v2690_v56 = vmax.f32 %v2068_v33, 0.0 }
 0x4ac   : > { %v2940_v57 = vmax.f32 %v2939_v15, %v2681_v39  ;;  %v2982_v59 = vmax.f32 %v2981_v16, %v2683_v40  ;;  %v2689_v49 = vmax.f32 %v1877_v26, 0.0  ;;  %v2691_v53 = vmax.f32 %v2070_v41, 0.0 }
 0x4ad   : > { %v2920_v54 = vmax.f32 %v2919_v42, %v2688_v51  ;;  %v2962_v55 = vmax.f32 %v2961_v52, %v2690_v56  ;;  %v1374_v41 = vsub.s32 4, %v8375_v8  ;;  %v1382_v42 = vsub.s32 6, %v8375_v8 }
 0x4ae   : > { %v2941_v45 = vmax.f32 %v2940_v57, %v2689_v49  ;;  %v2983_v63 = vmax.f32 %v2982_v59, %v2691_v53  ;;  %v1880_v58 = vpop.f32.mrb[84].mxu1  ;;  %v2073_v60 = vpop.f32.mrb[84].mxu0  ;;  %v1378_v59 = vsub.s32 5, %v8375_v8  ;;  %v1386_v49 = vsub.s32 7, %v8375_v8 }
 0x4af   : > { %v1881_v61 = vadd.f32 %v1880_v58, %v8393_v43  ;;  %v2074_v62 = vadd.f32 %v2073_v60, %v8397_v44  ;;  %v1882_v0 = vpop.f32.mrb[85].mxu1  ;;  %v2075_v1 = vpop.f32.mrb[85].mxu0 }
 0x4b0   : > { %v1883_v2 = vadd.f32 %v1882_v0, %v8400_v47  ;;  %v2076_v27 = vadd.f32 %v2075_v1, %v8404_v48  ;;  %v1884_v3 = vpop.f32.mrb[86].mxu1  ;;  %v2077_v4 = vpop.f32.mrb[86].mxu0 }
 0x4b1   : > { %v2696_v5 = vmax.f32 %v1881_v61, 0.0  ;;  %v2698_v6 = vmax.f32 %v2074_v62, 0.0  ;;  %v1885_v7 = vadd.f32 %v1884_v3, %v8393_v43  ;;  %v2078_v10 = vadd.f32 %v2077_v4, %v8397_v44  ;;  %v1886_v11 = vpop.f32.mrb[87].mxu1  ;;  %v2079_v13 = vpop.f32.mrb[87].mxu0 }
 0x4b2   : > { %v2697_v14 = vmax.f32 %v1883_v2, 0.0  ;;  %v2699_v15 = vmax.f32 %v2076_v27, 0.0  ;;  %v1887_v16 = vadd.f32 %v1886_v11, %v8400_v47  ;;  %v2080_v46 = vadd.f32 %v2079_v13, %v8404_v48 }
 0x4b3   : > { %v2921_v17 = vmax.f32 %v2920_v54, %v2696_v5  ;;  %v2963_v18 = vmax.f32 %v2962_v55, %v2698_v6  ;;  %v2704_v19 = vmax.f32 %v1885_v7, 0.0  ;;  %v2706_v20 = vmax.f32 %v2078_v10, 0.0 }
 0x4b4   : > { %v2942_v21 = vmax.f32 %v2941_v45, %v2697_v14  ;;  %v2984_v34 = vmax.f32 %v2983_v63, %v2699_v15  ;;  %v2705_v22 = vmax.f32 %v1887_v16, 0.0  ;;  %v2707_v23 = vmax.f32 %v2080_v46, 0.0 }
 0x4b5   : > { %v2922_v12 = vmax.f32 %v2921_v17, %v2704_v19  ;;  %v2964_v24 = vmax.f32 %v2963_v18, %v2706_v20  ;;  %v6811_v20 = vld [vmem:[%s8957_s10] sm:$0xff] }
 0x4b6   : > { %v2943_v25 = vmax.f32 %v2942_v21, %v2705_v22  ;;  %v2985_v32 = vmax.f32 %v2984_v34, %v2707_v23  ;;  %v1890_v33 = vpop.f32.mrb[88].mxu1  ;;  %v2083_v35 = vpop.f32.mrb[88].mxu0  ;;  %v8563_v21 = vrot.slane %v6811_v20, %v1374_v41  ;;  %v8565_v34 = vrot.slane %v6811_v20, %v1382_v42 }
 0x4b7   : > { %v1891_v36 = vadd.f32 %v1890_v33, %v8393_v43  ;;  %v2084_v39 = vadd.f32 %v2083_v35, %v8397_v44  ;;  %v1892_v40 = vpop.f32.mrb[89].mxu1  ;;  %v2085_v26 = vpop.f32.mrb[89].mxu0 }
 0x4b8   : > { %v1893_v52 = vadd.f32 %v1892_v40, %v8400_v47  ;;  %v2086_v51 = vadd.f32 %v2085_v26, %v8404_v48  ;;  %v1894_v56 = vpop.f32.mrb[90].mxu1  ;;  %v2087_v57 = vpop.f32.mrb[90].mxu0 }
 0x4b9   : > { %v2712_v53 = vmax.f32 %v1891_v36, 0.0  ;;  %v2714_v54 = vmax.f32 %v2084_v39, 0.0  ;;  %v1895_v55 = vadd.f32 %v1894_v56, %v8393_v43  ;;  %v2088_v45 = vadd.f32 %v2087_v57, %v8397_v44  ;;  %v1896_v63 = vpop.f32.mrb[91].mxu1  ;;  %v2089_v58 = vpop.f32.mrb[91].mxu0 }
 0x4ba   : > { %v2713_v60 = vmax.f32 %v1893_v52, 0.0  ;;  %v2715_v61 = vmax.f32 %v2086_v51, 0.0  ;;  %v1897_v62 = vadd.f32 %v1896_v63, %v8400_v47  ;;  %v2090_v0 = vadd.f32 %v2089_v58, %v8404_v48 }
 0x4bb   : > { %v2923_v1 = vmax.f32 %v2922_v12, %v2712_v53  ;;  %v2965_v2 = vmax.f32 %v2964_v24, %v2714_v54  ;;  %v2720_v27 = vmax.f32 %v1895_v55, 0.0  ;;  %v2722_v3 = vmax.f32 %v2088_v45, 0.0 }
 0x4bc   : > { %v2944_v4 = vmax.f32 %v2943_v25, %v2713_v60  ;;  %v2986_v5 = vmax.f32 %v2985_v32, %v2715_v61  ;;  %v2721_v6 = vmax.f32 %v1897_v62, 0.0  ;;  %v2723_v7 = vmax.f32 %v2090_v0, 0.0 }
 0x4bd   : > { %v2924_v10 = vmax.f32 %v2923_v1, %v2720_v27  ;;  %v2966_v11 = vmax.f32 %v2965_v2, %v2722_v3  ;;  %v8569_v25 = vrot.slane %v6811_v20, %v1378_v59  ;;  %v8571_v32 = vrot.slane %v6811_v20, %v1386_v49 }
 0x4be   : > { %v2945_v13 = vmax.f32 %v2944_v4, %v2721_v6  ;;  %v2987_v14 = vmax.f32 %v2986_v5, %v2723_v7  ;;  %v1900_v15 = vpop.f32.mrb[92].mxu1  ;;  %v2093_v16 = vpop.f32.mrb[92].mxu0 }
 0x4bf   : > { %v1901_v46 = vadd.f32 %v1900_v15, %v8393_v43  ;;  %v2094_v17 = vadd.f32 %v2093_v16, %v8397_v44  ;;  %v1902_v18 = vpop.f32.mrb[93].mxu1  ;;  %v2095_v19 = vpop.f32.mrb[93].mxu0 }
 0x4c0   : > { %v1903_v22 = vadd.f32 %v1902_v18, %v8400_v47  ;;  %v2096_v23 = vadd.f32 %v2095_v19, %v8404_v48  ;;  %v1904_v12 = vpop.f32.mrb[94].mxu1  ;;  %v2097_v24 = vpop.f32.mrb[94].mxu0 }
 0x4c1   : > { %v2728_v33 = vmax.f32 %v1901_v46, 0.0  ;;  %v2730_v35 = vmax.f32 %v2094_v17, 0.0  ;;  %v1905_v36 = vadd.f32 %v1904_v12, %v8393_v43  ;;  %v2098_v39 = vadd.f32 %v2097_v24, %v8397_v44  ;;  %v1906_v40 = vpop.f32.mrb[95].mxu1  ;;  %v2099_v26 = vpop.f32.mrb[95].mxu0 }
 0x4c2   : > { %v2729_v41 = vmax.f32 %v1903_v22, 0.0  ;;  %v2731_v42 = vmax.f32 %v2096_v23, 0.0  ;;  %v1907_v52 = vadd.f32 %v1906_v40, %v8400_v47  ;;  %v2100_v51 = vadd.f32 %v2099_v26, %v8404_v48 }
 0x4c3   : > { %v2925_v56 = vmax.f32 %v2924_v10, %v2728_v33  ;;  %v2967_v57 = vmax.f32 %v2966_v11, %v2730_v35  ;;  %v2736_v59 = vmax.f32 %v1905_v36, 0.0  ;;  %v2738_v53 = vmax.f32 %v2098_v39, 0.0 }
 0x4c4   : > { %v2946_v49 = vmax.f32 %v2945_v13, %v2729_v41  ;;  %v2988_v54 = vmax.f32 %v2987_v14, %v2731_v42  ;;  %v2737_v55 = vmax.f32 %v1907_v52, 0.0  ;;  %v2739_v45 = vmax.f32 %v2100_v51, 0.0 }
 0x4c5   : > { %v2926_v63 = vmax.f32 %v2925_v56, %v2736_v59  ;;  %v2968_v43 = vmax.f32 %v2967_v57, %v2738_v53 }
 0x4c6   : > { %v2947_v58 = vmax.f32 %v2946_v49, %v2737_v55  ;;  %v2989_v44 = vmax.f32 %v2988_v54, %v2739_v45  ;;  %v2136_v60 = vpop.f32.mrb[96].mxu1  ;;  %v2329_v61 = vpop.f32.mrb[96].mxu0 }
 0x4c7   : > { %v2927_v62 = vrot.slane %v2926_v63, 4  ;;  %v2969_v0 = vrot.slane %v2968_v43, 4  ;;  %v2137_v47 = vadd.f32 %v2136_v60, %v8563_v21  ;;  %v2330_v48 = vadd.f32 %v2329_v61, %v8565_v34  ;;  %v2138_v1 = vpop.f32.mrb[97].mxu1  ;;  %v2331_v2 = vpop.f32.mrb[97].mxu0 }
 0x4c8   : > { %v2948_v27 = vrot.slane %v2947_v58, 4  ;;  %v2990_v3 = vrot.slane %v2989_v44, 4  ;;  %v2139_v4 = vadd.f32 %v2138_v1, %v8569_v25  ;;  %v2332_v5 = vadd.f32 %v2331_v2, %v8571_v32  ;;  %v2140_v6 = vpop.f32.mrb[98].mxu1  ;;  %v2333_v7 = vpop.f32.mrb[98].mxu0 }
 0x4c9   : > { %v2928_v10 = vmax.f32 %v2926_v63, %v2927_v62  ;;  %v2970_v11 = vmax.f32 %v2968_v43, %v2969_v0  ;;  %v2492_v13 = vmax.f32 %v2137_v47, 0.0  ;;  %v2494_v14 = vmax.f32 %v2330_v48, 0.0  ;;  %v2142_v15 = vpop.f32.mrb[99].mxu1  ;;  %v2335_v16 = vpop.f32.mrb[99].mxu0 }
 0x4ca   : > { %v2949_v46 = vmax.f32 %v2947_v58, %v2948_v27  ;;  %v2991_v17 = vmax.f32 %v2989_v44, %v2990_v3  ;;  %v2493_v18 = vmax.f32 %v2139_v4, 0.0  ;;  %v2495_v19 = vmax.f32 %v2332_v5, 0.0 }
 0x4cb   : > { %v2929_v20 = vrot.slane %v2928_v10, 2  ;;  %v2971_v22 = vrot.slane %v2970_v11, 2  ;;  %v2141_v23 = vadd.f32 %v2140_v6, %v8563_v21  ;;  %v2334_v12 = vadd.f32 %v2333_v7, %v8565_v34 }
 0x4cc   : > { %v2950_v24 = vrot.slane %v2949_v46, 2  ;;  %v2992_v33 = vrot.slane %v2991_v17, 2  ;;  %v2143_v35 = vadd.f32 %v2142_v15, %v8569_v25  ;;  %v2336_v36 = vadd.f32 %v2335_v16, %v8571_v32 }
 0x4cd   : > { %v2930_v39 = vmax.f32 %v2928_v10, %v2929_v20  ;;  %v2972_v40 = vmax.f32 %v2970_v11, %v2971_v22  ;;  %v2500_v26 = vmax.f32 %v2141_v23, 0.0  ;;  %v2502_v41 = vmax.f32 %v2334_v12, 0.0 }
 0x4ce   : > { %v2951_v42 = vmax.f32 %v2949_v46, %v2950_v24  ;;  %v2993_v52 = vmax.f32 %v2991_v17, %v2992_v33  ;;  %v2501_v51 = vmax.f32 %v2143_v35, 0.0  ;;  %v2503_v56 = vmax.f32 %v2336_v36, 0.0  ;;  %v2146_v57 = vpop.f32.mrb[100].mxu1  ;;  %v2339_v59 = vpop.f32.mrb[100].mxu0 }
 0x4cf   : > { %v2931_v53 = vrot.slane %v2930_v39, 1  ;;  %v2973_v49 = vrot.slane %v2972_v40, 1  ;;  %v2828_v54 = vmax.f32 %v2492_v13, %v2500_v26  ;;  %v2870_v55 = vmax.f32 %v2494_v14, %v2502_v41  ;;  %v2148_v45 = vpop.f32.mrb[101].mxu1  ;;  %v2341_v63 = vpop.f32.mrb[101].mxu0 }
 0x4d0   : > { %v2952_v43 = vrot.slane %v2951_v42, 1  ;;  %v2994_v58 = vrot.slane %v2993_v52, 1  ;;  %v2849_v44 = vmax.f32 %v2493_v18, %v2501_v51  ;;  %v2891_v60 = vmax.f32 %v2495_v19, %v2503_v56  ;;  %v2150_v61 = vpop.f32.mrb[102].mxu1  ;;  %v2343_v62 = vpop.f32.mrb[102].mxu0 }
 0x4d1   : > { %v8585_v0 = vmax.f32 %v2930_v39, %v2931_v53  ;;  %v8587_v47 = vmax.f32 %v2972_v40, %v2973_v49  ;;  %v2147_v48 = vadd.f32 %v2146_v57, %v8563_v21  ;;  %v2340_v1 = vadd.f32 %v2339_v59, %v8565_v34  ;;  %v2152_v2 = vpop.f32.mrb[103].mxu1  ;;  %v2345_v27 = vpop.f32.mrb[103].mxu0 }
 0x4d2   : > { %v8591_v3 = vmax.f32 %v2951_v42, %v2952_v43  ;;  %v8593_v4 = vmax.f32 %v2993_v52, %v2994_v58  ;;  %v2149_v5 = vadd.f32 %v2148_v45, %v8569_v25  ;;  %v2342_v6 = vadd.f32 %v2341_v63, %v8571_v32 }
 0x4d3   : > { %v2508_v7 = vmax.f32 %v2147_v48, 0.0  ;;  %v2510_v10 = vmax.f32 %v2340_v1, 0.0  ;;  %v2151_v11 = vadd.f32 %v2150_v61, %v8563_v21  ;;  %v2344_v13 = vadd.f32 %v2343_v62, %v8565_v34 }
 0x4d4   : > { %v2509_v14 = vmax.f32 %v2149_v5, 0.0  ;;  %v2511_v15 = vmax.f32 %v2342_v6, 0.0  ;;  %v2153_v16 = vadd.f32 %v2152_v2, %v8569_v25  ;;  %v2346_v46 = vadd.f32 %v2345_v27, %v8571_v32 }
 0x4d5   : > { %v2829_v17 = vmax.f32 %v2828_v54, %v2508_v7  ;;  %v2871_v18 = vmax.f32 %v2870_v55, %v2510_v10  ;;  %v2516_v19 = vmax.f32 %v2151_v11, 0.0  ;;  %v2518_v20 = vmax.f32 %v2344_v13, 0.0 }
 0x4d6   : > { %v2850_v22 = vmax.f32 %v2849_v44, %v2509_v14  ;;  %v2892_v23 = vmax.f32 %v2891_v60, %v2511_v15  ;;  %v2517_v12 = vmax.f32 %v2153_v16, 0.0  ;;  %v2519_v24 = vmax.f32 %v2346_v46, 0.0  ;;  %v2156_v33 = vpop.f32.mrb[104].mxu1  ;;  %v2349_v35 = vpop.f32.mrb[104].mxu0 }
 0x4d7   : > { %v2830_v36 = vmax.f32 %v2829_v17, %v2516_v19  ;;  %v2872_v39 = vmax.f32 %v2871_v18, %v2518_v20  ;;  %v2157_v40 = vadd.f32 %v2156_v33, %v8563_v21  ;;  %v2350_v26 = vadd.f32 %v2349_v35, %v8565_v34  ;;  %v2158_v41 = vpop.f32.mrb[105].mxu1  ;;  %v2351_v42 = vpop.f32.mrb[105].mxu0 }
 0x4d8   : > { %v2851_v52 = vmax.f32 %v2850_v22, %v2517_v12  ;;  %v2893_v51 = vmax.f32 %v2892_v23, %v2519_v24  ;;  %v2159_v56 = vadd.f32 %v2158_v41, %v8569_v25  ;;  %v2352_v57 = vadd.f32 %v2351_v42, %v8571_v32  ;;  %v2160_v59 = vpop.f32.mrb[106].mxu1  ;;  %v2353_v53 = vpop.f32.mrb[106].mxu0 }
 0x4d9   : > { %v2524_v49 = vmax.f32 %v2157_v40, 0.0  ;;  %v2526_v54 = vmax.f32 %v2350_v26, 0.0  ;;  %v2161_v55 = vadd.f32 %v2160_v59, %v8563_v21  ;;  %v2354_v45 = vadd.f32 %v2353_v53, %v8565_v34  ;;  %v2162_v63 = vpop.f32.mrb[107].mxu1  ;;  %v2355_v43 = vpop.f32.mrb[107].mxu0 }
 0x4da   : > { %v2525_v58 = vmax.f32 %v2159_v56, 0.0  ;;  %v2527_v44 = vmax.f32 %v2352_v57, 0.0  ;;  %v2163_v60 = vadd.f32 %v2162_v63, %v8569_v25  ;;  %v2356_v61 = vadd.f32 %v2355_v43, %v8571_v32 }
 0x4db   : > { %v2831_v62 = vmax.f32 %v2830_v36, %v2524_v49  ;;  %v2873_v48 = vmax.f32 %v2872_v39, %v2526_v54  ;;  %v2532_v1 = vmax.f32 %v2161_v55, 0.0  ;;  %v2534_v2 = vmax.f32 %v2354_v45, 0.0 }
 0x4dc   : > { %v2852_v27 = vmax.f32 %v2851_v52, %v2525_v58  ;;  %v2894_v5 = vmax.f32 %v2893_v51, %v2527_v44  ;;  %v2533_v6 = vmax.f32 %v2163_v60, 0.0  ;;  %v2535_v7 = vmax.f32 %v2356_v61, 0.0 }
 0x4dd   : > { %v2832_v10 = vmax.f32 %v2831_v62, %v2532_v1  ;;  %v2874_v11 = vmax.f32 %v2873_v48, %v2534_v2 }
 0x4de   : > { %v2853_v13 = vmax.f32 %v2852_v27, %v2533_v6  ;;  %v2895_v14 = vmax.f32 %v2894_v5, %v2535_v7  ;;  %v2166_v15 = vpop.f32.mrb[108].mxu1  ;;  %v2359_v16 = vpop.f32.mrb[108].mxu0 }
 0x4df   : > { %v2167_v46 = vadd.f32 %v2166_v15, %v8563_v21  ;;  %v2360_v17 = vadd.f32 %v2359_v16, %v8565_v34  ;;  %v2168_v18 = vpop.f32.mrb[109].mxu1  ;;  %v2361_v19 = vpop.f32.mrb[109].mxu0 }
 0x4e0   : > { %v2169_v20 = vadd.f32 %v2168_v18, %v8569_v25  ;;  %v2362_v22 = vadd.f32 %v2361_v19, %v8571_v32  ;;  %v2170_v23 = vpop.f32.mrb[110].mxu1  ;;  %v2363_v12 = vpop.f32.mrb[110].mxu0 }
 0x4e1   : > { %v2540_v24 = vmax.f32 %v2167_v46, 0.0  ;;  %v2542_v33 = vmax.f32 %v2360_v17, 0.0  ;;  %v2171_v35 = vadd.f32 %v2170_v23, %v8563_v21  ;;  %v2364_v36 = vadd.f32 %v2363_v12, %v8565_v34  ;;  %v2172_v39 = vpop.f32.mrb[111].mxu1  ;;  %v2365_v40 = vpop.f32.mrb[111].mxu0 }
 0x4e2   : > { %v2541_v26 = vmax.f32 %v2169_v20, 0.0  ;;  %v2543_v41 = vmax.f32 %v2362_v22, 0.0  ;;  %v2173_v42 = vadd.f32 %v2172_v39, %v8569_v25  ;;  %v2366_v52 = vadd.f32 %v2365_v40, %v8571_v32 }
 0x4e3   : > { %v2833_v51 = vmax.f32 %v2832_v10, %v2540_v24  ;;  %v2875_v56 = vmax.f32 %v2874_v11, %v2542_v33  ;;  %v2548_v57 = vmax.f32 %v2171_v35, 0.0  ;;  %v2550_v59 = vmax.f32 %v2364_v36, 0.0 }
 0x4e4   : > { %v2854_v53 = vmax.f32 %v2853_v13, %v2541_v26  ;;  %v2896_v49 = vmax.f32 %v2895_v14, %v2543_v41  ;;  %v2549_v54 = vmax.f32 %v2173_v42, 0.0  ;;  %v2551_v55 = vmax.f32 %v2366_v52, 0.0 }
 0x4e5   : > { %v2834_v45 = vmax.f32 %v2833_v51, %v2548_v57  ;;  %v2876_v63 = vmax.f32 %v2875_v56, %v2550_v59 }
 0x4e6   : > { %v2855_v43 = vmax.f32 %v2854_v53, %v2549_v54  ;;  %v2897_v58 = vmax.f32 %v2896_v49, %v2551_v55  ;;  %v2176_v44 = vpop.f32.mrb[112].mxu1  ;;  %v2369_v60 = vpop.f32.mrb[112].mxu0 }
 0x4e7   : > { %v2177_v61 = vadd.f32 %v2176_v44, %v8563_v21  ;;  %v2370_v62 = vadd.f32 %v2369_v60, %v8565_v34  ;;  %v2178_v48 = vpop.f32.mrb[113].mxu1  ;;  %v2371_v1 = vpop.f32.mrb[113].mxu0 }
 0x4e8   : > { %v2179_v2 = vadd.f32 %v2178_v48, %v8569_v25  ;;  %v2372_v27 = vadd.f32 %v2371_v1, %v8571_v32  ;;  %v2180_v5 = vpop.f32.mrb[114].mxu1  ;;  %v2373_v6 = vpop.f32.mrb[114].mxu0 }
 0x4e9   : > { %v2556_v7 = vmax.f32 %v2177_v61, 0.0  ;;  %v2558_v10 = vmax.f32 %v2370_v62, 0.0  ;;  %v2181_v11 = vadd.f32 %v2180_v5, %v8563_v21  ;;  %v2374_v13 = vadd.f32 %v2373_v6, %v8565_v34  ;;  %v2182_v14 = vpop.f32.mrb[115].mxu1  ;;  %v2375_v15 = vpop.f32.mrb[115].mxu0 }
 0x4ea   : > { %v2557_v16 = vmax.f32 %v2179_v2, 0.0  ;;  %v2559_v46 = vmax.f32 %v2372_v27, 0.0  ;;  %v2183_v17 = vadd.f32 %v2182_v14, %v8569_v25  ;;  %v2376_v18 = vadd.f32 %v2375_v15, %v8571_v32 }
 0x4eb   : > { %v2835_v19 = vmax.f32 %v2834_v45, %v2556_v7  ;;  %v2877_v20 = vmax.f32 %v2876_v63, %v2558_v10  ;;  %v2564_v22 = vmax.f32 %v2181_v11, 0.0  ;;  %v2566_v23 = vmax.f32 %v2374_v13, 0.0 }
 0x4ec   : > { %v2856_v12 = vmax.f32 %v2855_v43, %v2557_v16  ;;  %v2898_v24 = vmax.f32 %v2897_v58, %v2559_v46  ;;  %v2565_v33 = vmax.f32 %v2183_v17, 0.0  ;;  %v2567_v35 = vmax.f32 %v2376_v18, 0.0 }
 0x4ed   : > { %v2836_v36 = vmax.f32 %v2835_v19, %v2564_v22  ;;  %v2878_v39 = vmax.f32 %v2877_v20, %v2566_v23 }
 0x4ee   : > { %v2857_v40 = vmax.f32 %v2856_v12, %v2565_v33  ;;  %v2899_v26 = vmax.f32 %v2898_v24, %v2567_v35  ;;  %v2186_v41 = vpop.f32.mrb[116].mxu1  ;;  %v2379_v42 = vpop.f32.mrb[116].mxu0 }
 0x4ef   : > { %v2187_v52 = vadd.f32 %v2186_v41, %v8563_v21  ;;  %v2380_v51 = vadd.f32 %v2379_v42, %v8565_v34  ;;  %v2188_v56 = vpop.f32.mrb[117].mxu1  ;;  %v2381_v57 = vpop.f32.mrb[117].mxu0 }
 0x4f0   : > { %v2189_v59 = vadd.f32 %v2188_v56, %v8569_v25  ;;  %v2382_v53 = vadd.f32 %v2381_v57, %v8571_v32  ;;  %v2190_v49 = vpop.f32.mrb[118].mxu1  ;;  %v2383_v54 = vpop.f32.mrb[118].mxu0 }
 0x4f1   : > { %v2572_v55 = vmax.f32 %v2187_v52, 0.0  ;;  %v2574_v45 = vmax.f32 %v2380_v51, 0.0  ;;  %v2191_v63 = vadd.f32 %v2190_v49, %v8563_v21  ;;  %v2384_v43 = vadd.f32 %v2383_v54, %v8565_v34  ;;  %v2192_v58 = vpop.f32.mrb[119].mxu1  ;;  %v2385_v44 = vpop.f32.mrb[119].mxu0 }
 0x4f2   : > { %v2573_v60 = vmax.f32 %v2189_v59, 0.0  ;;  %v2575_v61 = vmax.f32 %v2382_v53, 0.0  ;;  %v2193_v62 = vadd.f32 %v2192_v58, %v8569_v25  ;;  %v2386_v48 = vadd.f32 %v2385_v44, %v8571_v32 }
 0x4f3   : > { %v2837_v1 = vmax.f32 %v2836_v36, %v2572_v55  ;;  %v2879_v2 = vmax.f32 %v2878_v39, %v2574_v45  ;;  %v2580_v27 = vmax.f32 %v2191_v63, 0.0  ;;  %v2582_v5 = vmax.f32 %v2384_v43, 0.0 }
 0x4f4   : > { %v2858_v6 = vmax.f32 %v2857_v40, %v2573_v60  ;;  %v2900_v7 = vmax.f32 %v2899_v26, %v2575_v61  ;;  %v2581_v10 = vmax.f32 %v2193_v62, 0.0  ;;  %v2583_v11 = vmax.f32 %v2386_v48, 0.0 }
 0x4f5   : > { %v2838_v13 = vmax.f32 %v2837_v1, %v2580_v27  ;;  %v2880_v14 = vmax.f32 %v2879_v2, %v2582_v5 }
 0x4f6   : > { %v2859_v15 = vmax.f32 %v2858_v6, %v2581_v10  ;;  %v2901_v16 = vmax.f32 %v2900_v7, %v2583_v11  ;;  %v2196_v46 = vpop.f32.mrb[120].mxu1  ;;  %v2389_v17 = vpop.f32.mrb[120].mxu0 }
 0x4f7   : > { %v2197_v18 = vadd.f32 %v2196_v46, %v8563_v21  ;;  %v2390_v19 = vadd.f32 %v2389_v17, %v8565_v34  ;;  %v2198_v20 = vpop.f32.mrb[121].mxu1  ;;  %v2391_v22 = vpop.f32.mrb[121].mxu0 }
 0x4f8   : > { %v2199_v23 = vadd.f32 %v2198_v20, %v8569_v25  ;;  %v2392_v12 = vadd.f32 %v2391_v22, %v8571_v32  ;;  %v2200_v24 = vpop.f32.mrb[122].mxu1  ;;  %v2393_v33 = vpop.f32.mrb[122].mxu0 }
 0x4f9   : > { %v2588_v35 = vmax.f32 %v2197_v18, 0.0  ;;  %v2590_v36 = vmax.f32 %v2390_v19, 0.0  ;;  %v2201_v39 = vadd.f32 %v2200_v24, %v8563_v21  ;;  %v2394_v40 = vadd.f32 %v2393_v33, %v8565_v34  ;;  %v2202_v26 = vpop.f32.mrb[123].mxu1  ;;  %v2395_v41 = vpop.f32.mrb[123].mxu0 }
 0x4fa   : > { %v2589_v42 = vmax.f32 %v2199_v23, 0.0  ;;  %v2591_v52 = vmax.f32 %v2392_v12, 0.0  ;;  %v2203_v51 = vadd.f32 %v2202_v26, %v8569_v25  ;;  %v2396_v56 = vadd.f32 %v2395_v41, %v8571_v32 }
 0x4fb   : > { %v2839_v57 = vmax.f32 %v2838_v13, %v2588_v35  ;;  %v2881_v59 = vmax.f32 %v2880_v14, %v2590_v36  ;;  %v2596_v53 = vmax.f32 %v2201_v39, 0.0  ;;  %v2598_v49 = vmax.f32 %v2394_v40, 0.0 }
 0x4fc   : > { %v2860_v54 = vmax.f32 %v2859_v15, %v2589_v42  ;;  %v2902_v55 = vmax.f32 %v2901_v16, %v2591_v52  ;;  %v2597_v45 = vmax.f32 %v2203_v51, 0.0  ;;  %v2599_v63 = vmax.f32 %v2396_v56, 0.0 }
 0x4fd   : > { %v2840_v43 = vmax.f32 %v2839_v57, %v2596_v53  ;;  %v2882_v58 = vmax.f32 %v2881_v59, %v2598_v49 }
 0x4fe   : > { %v2861_v44 = vmax.f32 %v2860_v54, %v2597_v45  ;;  %v2903_v60 = vmax.f32 %v2902_v55, %v2599_v63  ;;  %v2206_v61 = vpop.f32.mrb[124].mxu1  ;;  %v2399_v62 = vpop.f32.mrb[124].mxu0 }
 0x4ff   : > { %v2207_v48 = vadd.f32 %v2206_v61, %v8563_v21  ;;  %v2400_v1 = vadd.f32 %v2399_v62, %v8565_v34  ;;  %v2208_v2 = vpop.f32.mrb[125].mxu1  ;;  %v2401_v27 = vpop.f32.mrb[125].mxu0 }
 0x500   : > { %v2209_v5 = vadd.f32 %v2208_v2, %v8569_v25  ;;  %v2402_v6 = vadd.f32 %v2401_v27, %v8571_v32  ;;  %v2210_v7 = vpop.f32.mrb[126].mxu1  ;;  %v2403_v10 = vpop.f32.mrb[126].mxu0 }
 0x501   : > { %v2604_v11 = vmax.f32 %v2207_v48, 0.0  ;;  %v2606_v13 = vmax.f32 %v2400_v1, 0.0  ;;  %v2211_v14 = vadd.f32 %v2210_v7, %v8563_v21  ;;  %v2404_v15 = vadd.f32 %v2403_v10, %v8565_v34  ;;  %v2212_v16 = vpop.f32.mrb[127].mxu1  ;;  %v2405_v46 = vpop.f32.mrb[127].mxu0 }
 0x502   : > { %v2605_v17 = vmax.f32 %v2209_v5, 0.0  ;;  %v2607_v18 = vmax.f32 %v2402_v6, 0.0  ;;  %v2213_v19 = vadd.f32 %v2212_v16, %v8569_v25  ;;  %v2406_v20 = vadd.f32 %v2405_v46, %v8571_v32 }
 0x503   : > { %v2841_v22 = vmax.f32 %v2840_v43, %v2604_v11  ;;  %v2883_v23 = vmax.f32 %v2882_v58, %v2606_v13  ;;  %v2612_v12 = vmax.f32 %v2211_v14, 0.0  ;;  %v2614_v24 = vmax.f32 %v2404_v15, 0.0 }
 0x504   : > { %v2862_v33 = vmax.f32 %v2861_v44, %v2605_v17  ;;  %v2904_v35 = vmax.f32 %v2903_v60, %v2607_v18  ;;  %v2613_v36 = vmax.f32 %v2213_v19, 0.0  ;;  %v2615_v39 = vmax.f32 %v2406_v20, 0.0 }
 0x505   : > { %v2842_v40 = vmax.f32 %v2841_v22, %v2612_v12  ;;  %v2884_v26 = vmax.f32 %v2883_v23, %v2614_v24 }
 0x506   : > { %v2863_v41 = vmax.f32 %v2862_v33, %v2613_v36  ;;  %v2905_v42 = vmax.f32 %v2904_v35, %v2615_v39  ;;  %v2216_v52 = vpop.f32.mrb[128].mxu1  ;;  %v2409_v51 = vpop.f32.mrb[128].mxu0 }
 0x507   : > { %v2843_v56 = vrot.slane %v2842_v40, 4  ;;  %v2885_v57 = vrot.slane %v2884_v26, 4  ;;  %v2217_v59 = vadd.f32 %v2216_v52, %v8563_v21  ;;  %v2410_v53 = vadd.f32 %v2409_v51, %v8565_v34  ;;  %v2218_v49 = vpop.f32.mrb[129].mxu1  ;;  %v2411_v54 = vpop.f32.mrb[129].mxu0 }
 0x508   : > { %v2864_v55 = vrot.slane %v2863_v41, 4  ;;  %v2906_v45 = vrot.slane %v2905_v42, 4  ;;  %v2219_v63 = vadd.f32 %v2218_v49, %v8569_v25  ;;  %v2412_v43 = vadd.f32 %v2411_v54, %v8571_v32  ;;  %v2220_v58 = vpop.f32.mrb[130].mxu1  ;;  %v2413_v44 = vpop.f32.mrb[130].mxu0 }
 0x509   : > { %v2844_v60 = vmax.f32 %v2842_v40, %v2843_v56  ;;  %v2886_v61 = vmax.f32 %v2884_v26, %v2885_v57  ;;  %v2620_v62 = vmax.f32 %v2217_v59, 0.0  ;;  %v2622_v48 = vmax.f32 %v2410_v53, 0.0  ;;  %v2222_v1 = vpop.f32.mrb[131].mxu1  ;;  %v2415_v2 = vpop.f32.mrb[131].mxu0 }
 0x50a   : > { %v2865_v27 = vmax.f32 %v2863_v41, %v2864_v55  ;;  %v2907_v5 = vmax.f32 %v2905_v42, %v2906_v45  ;;  %v2621_v6 = vmax.f32 %v2219_v63, 0.0  ;;  %v2623_v7 = vmax.f32 %v2412_v43, 0.0 }
 0x50b   : > { %v2845_v10 = vrot.slane %v2844_v60, 2  ;;  %v2887_v11 = vrot.slane %v2886_v61, 2  ;;  %v2221_v13 = vadd.f32 %v2220_v58, %v8563_v21  ;;  %v2414_v14 = vadd.f32 %v2413_v44, %v8565_v34 }
 0x50c   : > { %v2866_v15 = vrot.slane %v2865_v27, 2  ;;  %v2908_v16 = vrot.slane %v2907_v5, 2  ;;  %v2223_v46 = vadd.f32 %v2222_v1, %v8569_v25  ;;  %v2416_v17 = vadd.f32 %v2415_v2, %v8571_v32 }
 0x50d   : > { %v2846_v18 = vmax.f32 %v2844_v60, %v2845_v10  ;;  %v2888_v19 = vmax.f32 %v2886_v61, %v2887_v11  ;;  %v2628_v20 = vmax.f32 %v2221_v13, 0.0  ;;  %v2630_v22 = vmax.f32 %v2414_v14, 0.0 }
 0x50e   : > { %v2867_v23 = vmax.f32 %v2865_v27, %v2866_v15  ;;  %v2909_v12 = vmax.f32 %v2907_v5, %v2908_v16  ;;  %v2629_v24 = vmax.f32 %v2223_v46, 0.0  ;;  %v2631_v33 = vmax.f32 %v2416_v17, 0.0  ;;  %v2226_v35 = vpop.f32.mrb[132].mxu1  ;;  %v2419_v36 = vpop.f32.mrb[132].mxu0 }
 0x50f   : > { %v2847_v39 = vrot.slane %v2846_v18, 1  ;;  %v2889_v40 = vrot.slane %v2888_v19, 1  ;;  %v2996_v26 = vmax.f32 %v2620_v62, %v2628_v20  ;;  %v3038_v41 = vmax.f32 %v2622_v48, %v2630_v22  ;;  %v2228_v42 = vpop.f32.mrb[133].mxu1  ;;  %v2421_v52 = vpop.f32.mrb[133].mxu0 }
 0x510   : > { %v2868_v51 = vrot.slane %v2867_v23, 1  ;;  %v2910_v56 = vrot.slane %v2909_v12, 1  ;;  %v3017_v57 = vmax.f32 %v2621_v6, %v2629_v24  ;;  %v3059_v59 = vmax.f32 %v2623_v7, %v2631_v33  ;;  %v2230_v53 = vpop.f32.mrb[134].mxu1  ;;  %v2423_v49 = vpop.f32.mrb[134].mxu0 }
 0x511   : > { %v8657_v54 = vmax.f32 %v2846_v18, %v2847_v39  ;;  %v8659_v55 = vmax.f32 %v2888_v19, %v2889_v40  ;;  %v2227_v45 = vadd.f32 %v2226_v35, %v8563_v21  ;;  %v2420_v63 = vadd.f32 %v2419_v36, %v8565_v34  ;;  %v2232_v43 = vpop.f32.mrb[135].mxu1  ;;  %v2425_v58 = vpop.f32.mrb[135].mxu0 }
 0x512   : > { %v8663_v44 = vmax.f32 %v2867_v23, %v2868_v51  ;;  %v8665_v60 = vmax.f32 %v2909_v12, %v2910_v56  ;;  %v2229_v61 = vadd.f32 %v2228_v42, %v8569_v25  ;;  %v2422_v62 = vadd.f32 %v2421_v52, %v8571_v32 }
 0x513   : > { %v2636_v48 = vmax.f32 %v2227_v45, 0.0  ;;  %v2638_v1 = vmax.f32 %v2420_v63, 0.0  ;;  %v2231_v2 = vadd.f32 %v2230_v53, %v8563_v21  ;;  %v2424_v27 = vadd.f32 %v2423_v49, %v8565_v34 }
 0x514   : > { %v2637_v5 = vmax.f32 %v2229_v61, 0.0  ;;  %v2639_v6 = vmax.f32 %v2422_v62, 0.0  ;;  %v2233_v7 = vadd.f32 %v2232_v43, %v8569_v25  ;;  %v2426_v10 = vadd.f32 %v2425_v58, %v8571_v32 }
 0x515   : > { %v2997_v11 = vmax.f32 %v2996_v26, %v2636_v48  ;;  %v3039_v13 = vmax.f32 %v3038_v41, %v2638_v1  ;;  %v2644_v14 = vmax.f32 %v2231_v2, 0.0  ;;  %v2646_v15 = vmax.f32 %v2424_v27, 0.0 }
 0x516   : > { %v3018_v16 = vmax.f32 %v3017_v57, %v2637_v5  ;;  %v3060_v46 = vmax.f32 %v3059_v59, %v2639_v6  ;;  %v2645_v17 = vmax.f32 %v2233_v7, 0.0  ;;  %v2647_v18 = vmax.f32 %v2426_v10, 0.0  ;;  %v2236_v19 = vpop.f32.mrb[136].mxu1  ;;  %v2429_v20 = vpop.f32.mrb[136].mxu0 }
 0x517   : > { %v2998_v22 = vmax.f32 %v2997_v11, %v2644_v14  ;;  %v3040_v23 = vmax.f32 %v3039_v13, %v2646_v15  ;;  %v2237_v12 = vadd.f32 %v2236_v19, %v8563_v21  ;;  %v2430_v24 = vadd.f32 %v2429_v20, %v8565_v34  ;;  %v2238_v33 = vpop.f32.mrb[137].mxu1  ;;  %v2431_v35 = vpop.f32.mrb[137].mxu0 }
 0x518   : > { %v3019_v36 = vmax.f32 %v3018_v16, %v2645_v17  ;;  %v3061_v39 = vmax.f32 %v3060_v46, %v2647_v18  ;;  %v2239_v40 = vadd.f32 %v2238_v33, %v8569_v25  ;;  %v2432_v26 = vadd.f32 %v2431_v35, %v8571_v32  ;;  %v2240_v41 = vpop.f32.mrb[138].mxu1  ;;  %v2433_v42 = vpop.f32.mrb[138].mxu0 }
 0x519   : > { %v2652_v52 = vmax.f32 %v2237_v12, 0.0  ;;  %v2654_v51 = vmax.f32 %v2430_v24, 0.0  ;;  %v2241_v56 = vadd.f32 %v2240_v41, %v8563_v21  ;;  %v2434_v57 = vadd.f32 %v2433_v42, %v8565_v34  ;;  %v2242_v59 = vpop.f32.mrb[139].mxu1  ;;  %v2435_v53 = vpop.f32.mrb[139].mxu0 }
 0x51a   : > { %v2653_v49 = vmax.f32 %v2239_v40, 0.0  ;;  %v2655_v45 = vmax.f32 %v2432_v26, 0.0  ;;  %v2243_v63 = vadd.f32 %v2242_v59, %v8569_v25  ;;  %v2436_v43 = vadd.f32 %v2435_v53, %v8571_v32 }
 0x51b   : > { %v2999_v58 = vmax.f32 %v2998_v22, %v2652_v52  ;;  %v3041_v61 = vmax.f32 %v3040_v23, %v2654_v51  ;;  %v2660_v62 = vmax.f32 %v2241_v56, 0.0  ;;  %v2662_v48 = vmax.f32 %v2434_v57, 0.0 }
 0x51c   : > { %v3020_v1 = vmax.f32 %v3019_v36, %v2653_v49  ;;  %v3062_v2 = vmax.f32 %v3061_v39, %v2655_v45  ;;  %v2661_v27 = vmax.f32 %v2243_v63, 0.0  ;;  %v2663_v5 = vmax.f32 %v2436_v43, 0.0 }
 0x51d   : > { %v3000_v6 = vmax.f32 %v2999_v58, %v2660_v62  ;;  %v3042_v7 = vmax.f32 %v3041_v61, %v2662_v48 }
 0x51e   : > { %v3021_v10 = vmax.f32 %v3020_v1, %v2661_v27  ;;  %v3063_v11 = vmax.f32 %v3062_v2, %v2663_v5  ;;  %v2246_v13 = vpop.f32.mrb[140].mxu1  ;;  %v2439_v14 = vpop.f32.mrb[140].mxu0 }
 0x51f   : > { %v2247_v15 = vadd.f32 %v2246_v13, %v8563_v21  ;;  %v2440_v16 = vadd.f32 %v2439_v14, %v8565_v34  ;;  %v2248_v46 = vpop.f32.mrb[141].mxu1  ;;  %v2441_v17 = vpop.f32.mrb[141].mxu0 }
 0x520   : > { %v2249_v18 = vadd.f32 %v2248_v46, %v8569_v25  ;;  %v2442_v19 = vadd.f32 %v2441_v17, %v8571_v32  ;;  %v2250_v20 = vpop.f32.mrb[142].mxu1  ;;  %v2443_v22 = vpop.f32.mrb[142].mxu0 }
 0x521   : > { %v2668_v23 = vmax.f32 %v2247_v15, 0.0  ;;  %v2670_v12 = vmax.f32 %v2440_v16, 0.0  ;;  %v2251_v24 = vadd.f32 %v2250_v20, %v8563_v21  ;;  %v2444_v33 = vadd.f32 %v2443_v22, %v8565_v34  ;;  %v2252_v35 = vpop.f32.mrb[143].mxu1  ;;  %v2445_v36 = vpop.f32.mrb[143].mxu0 }
 0x522   : > { %v2669_v39 = vmax.f32 %v2249_v18, 0.0  ;;  %v2671_v40 = vmax.f32 %v2442_v19, 0.0  ;;  %v2253_v26 = vadd.f32 %v2252_v35, %v8569_v25  ;;  %v2446_v41 = vadd.f32 %v2445_v36, %v8571_v32 }
 0x523   : > { %v3001_v42 = vmax.f32 %v3000_v6, %v2668_v23  ;;  %v3043_v52 = vmax.f32 %v3042_v7, %v2670_v12  ;;  %v2676_v51 = vmax.f32 %v2251_v24, 0.0  ;;  %v2678_v56 = vmax.f32 %v2444_v33, 0.0 }
 0x524   : > { %v3022_v57 = vmax.f32 %v3021_v10, %v2669_v39  ;;  %v3064_v59 = vmax.f32 %v3063_v11, %v2671_v40  ;;  %v2677_v53 = vmax.f32 %v2253_v26, 0.0  ;;  %v2679_v49 = vmax.f32 %v2446_v41, 0.0 }
 0x525   : > { %v3002_v45 = vmax.f32 %v3001_v42, %v2676_v51  ;;  %v3044_v63 = vmax.f32 %v3043_v52, %v2678_v56 }
 0x526   : > { %v3023_v43 = vmax.f32 %v3022_v57, %v2677_v53  ;;  %v3065_v58 = vmax.f32 %v3064_v59, %v2679_v49  ;;  %v2256_v61 = vpop.f32.mrb[144].mxu1  ;;  %v2449_v62 = vpop.f32.mrb[144].mxu0 }
 0x527   : > { %v2257_v48 = vadd.f32 %v2256_v61, %v8563_v21  ;;  %v2450_v1 = vadd.f32 %v2449_v62, %v8565_v34  ;;  %v2258_v2 = vpop.f32.mrb[145].mxu1  ;;  %v2451_v27 = vpop.f32.mrb[145].mxu0 }
 0x528   : > { %v2259_v5 = vadd.f32 %v2258_v2, %v8569_v25  ;;  %v2452_v6 = vadd.f32 %v2451_v27, %v8571_v32  ;;  %v2260_v7 = vpop.f32.mrb[146].mxu1  ;;  %v2453_v10 = vpop.f32.mrb[146].mxu0 }
 0x529   : > { %v2684_v11 = vmax.f32 %v2257_v48, 0.0  ;;  %v2686_v13 = vmax.f32 %v2450_v1, 0.0  ;;  %v2261_v14 = vadd.f32 %v2260_v7, %v8563_v21  ;;  %v2454_v15 = vadd.f32 %v2453_v10, %v8565_v34  ;;  %v2262_v16 = vpop.f32.mrb[147].mxu1  ;;  %v2455_v46 = vpop.f32.mrb[147].mxu0 }
 0x52a   : > { %v2685_v17 = vmax.f32 %v2259_v5, 0.0  ;;  %v2687_v18 = vmax.f32 %v2452_v6, 0.0  ;;  %v2263_v19 = vadd.f32 %v2262_v16, %v8569_v25  ;;  %v2456_v20 = vadd.f32 %v2455_v46, %v8571_v32 }
 0x52b   : > { %v3003_v22 = vmax.f32 %v3002_v45, %v2684_v11  ;;  %v3045_v23 = vmax.f32 %v3044_v63, %v2686_v13  ;;  %v2692_v12 = vmax.f32 %v2261_v14, 0.0  ;;  %v2694_v24 = vmax.f32 %v2454_v15, 0.0 }
 0x52c   : > { %v3024_v33 = vmax.f32 %v3023_v43, %v2685_v17  ;;  %v3066_v35 = vmax.f32 %v3065_v58, %v2687_v18  ;;  %v2693_v36 = vmax.f32 %v2263_v19, 0.0  ;;  %v2695_v39 = vmax.f32 %v2456_v20, 0.0 }
 0x52d   : > { %v3004_v40 = vmax.f32 %v3003_v22, %v2692_v12  ;;  %v3046_v26 = vmax.f32 %v3045_v23, %v2694_v24 }
 0x52e   : > { %v3025_v41 = vmax.f32 %v3024_v33, %v2693_v36  ;;  %v3067_v42 = vmax.f32 %v3066_v35, %v2695_v39  ;;  %v2266_v52 = vpop.f32.mrb[148].mxu1  ;;  %v2459_v51 = vpop.f32.mrb[148].mxu0 }
 0x52f   : > { %v2267_v56 = vadd.f32 %v2266_v52, %v8563_v21  ;;  %v2460_v57 = vadd.f32 %v2459_v51, %v8565_v34  ;;  %v2268_v59 = vpop.f32.mrb[149].mxu1  ;;  %v2461_v53 = vpop.f32.mrb[149].mxu0 }
 0x530   : > { %v2269_v49 = vadd.f32 %v2268_v59, %v8569_v25  ;;  %v2462_v45 = vadd.f32 %v2461_v53, %v8571_v32  ;;  %v2270_v63 = vpop.f32.mrb[150].mxu1  ;;  %v2463_v43 = vpop.f32.mrb[150].mxu0 }
 0x531   : > { %v2700_v58 = vmax.f32 %v2267_v56, 0.0  ;;  %v2702_v61 = vmax.f32 %v2460_v57, 0.0  ;;  %v2271_v62 = vadd.f32 %v2270_v63, %v8563_v21  ;;  %v2464_v48 = vadd.f32 %v2463_v43, %v8565_v34  ;;  %v2272_v1 = vpop.f32.mrb[151].mxu1  ;;  %v2465_v2 = vpop.f32.mrb[151].mxu0 }
 0x532   : > { %v2701_v27 = vmax.f32 %v2269_v49, 0.0  ;;  %v2703_v5 = vmax.f32 %v2462_v45, 0.0  ;;  %v2273_v6 = vadd.f32 %v2272_v1, %v8569_v25  ;;  %v2466_v7 = vadd.f32 %v2465_v2, %v8571_v32 }
 0x533   : > { %v3005_v10 = vmax.f32 %v3004_v40, %v2700_v58  ;;  %v3047_v11 = vmax.f32 %v3046_v26, %v2702_v61  ;;  %v2708_v13 = vmax.f32 %v2271_v62, 0.0  ;;  %v2710_v14 = vmax.f32 %v2464_v48, 0.0 }
 0x534   : > { %v3026_v15 = vmax.f32 %v3025_v41, %v2701_v27  ;;  %v3068_v16 = vmax.f32 %v3067_v42, %v2703_v5  ;;  %v2709_v46 = vmax.f32 %v2273_v6, 0.0  ;;  %v2711_v17 = vmax.f32 %v2466_v7, 0.0 }
 0x535   : > { %v3006_v18 = vmax.f32 %v3005_v10, %v2708_v13  ;;  %v3048_v19 = vmax.f32 %v3047_v11, %v2710_v14 }
 0x536   : > { %v3027_v20 = vmax.f32 %v3026_v15, %v2709_v46  ;;  %v3069_v22 = vmax.f32 %v3068_v16, %v2711_v17  ;;  %v2276_v23 = vpop.f32.mrb[152].mxu1  ;;  %v2469_v12 = vpop.f32.mrb[152].mxu0 }
 0x537   : > { %v2277_v24 = vadd.f32 %v2276_v23, %v8563_v21  ;;  %v2470_v33 = vadd.f32 %v2469_v12, %v8565_v34  ;;  %v2278_v35 = vpop.f32.mrb[153].mxu1  ;;  %v2471_v36 = vpop.f32.mrb[153].mxu0 }
 0x538   : > { %v2279_v39 = vadd.f32 %v2278_v35, %v8569_v25  ;;  %v2472_v40 = vadd.f32 %v2471_v36, %v8571_v32  ;;  %v2280_v26 = vpop.f32.mrb[154].mxu1  ;;  %v2473_v41 = vpop.f32.mrb[154].mxu0 }
 0x539   : > { %v2716_v42 = vmax.f32 %v2277_v24, 0.0  ;;  %v2718_v52 = vmax.f32 %v2470_v33, 0.0  ;;  %v2281_v51 = vadd.f32 %v2280_v26, %v8563_v21  ;;  %v2474_v56 = vadd.f32 %v2473_v41, %v8565_v34  ;;  %v2282_v57 = vpop.f32.mrb[155].mxu1  ;;  %v2475_v59 = vpop.f32.mrb[155].mxu0 }
 0x53a   : > { %v2717_v53 = vmax.f32 %v2279_v39, 0.0  ;;  %v2719_v49 = vmax.f32 %v2472_v40, 0.0  ;;  %v2283_v45 = vadd.f32 %v2282_v57, %v8569_v25  ;;  %v2476_v63 = vadd.f32 %v2475_v59, %v8571_v32 }
 0x53b   : > { %v3007_v43 = vmax.f32 %v3006_v18, %v2716_v42  ;;  %v3049_v58 = vmax.f32 %v3048_v19, %v2718_v52  ;;  %v2724_v61 = vmax.f32 %v2281_v51, 0.0  ;;  %v2726_v62 = vmax.f32 %v2474_v56, 0.0 }
 0x53c   : > { %v3028_v48 = vmax.f32 %v3027_v20, %v2717_v53  ;;  %v3070_v1 = vmax.f32 %v3069_v22, %v2719_v49  ;;  %v2725_v2 = vmax.f32 %v2283_v45, 0.0  ;;  %v2727_v27 = vmax.f32 %v2476_v63, 0.0 }
 0x53d   : > { %v3008_v5 = vmax.f32 %v3007_v43, %v2724_v61  ;;  %v3050_v6 = vmax.f32 %v3049_v58, %v2726_v62 }
 0x53e   : > { %v3029_v7 = vmax.f32 %v3028_v48, %v2725_v2  ;;  %v3071_v10 = vmax.f32 %v3070_v1, %v2727_v27  ;;  %v2286_v11 = vpop.f32.mrb[156].mxu1  ;;  %v2479_v13 = vpop.f32.mrb[156].mxu0 }
 0x53f   : > { %v2287_v14 = vadd.f32 %v2286_v11, %v8563_v21  ;;  %v2480_v15 = vadd.f32 %v2479_v13, %v8565_v34  ;;  %v2288_v16 = vpop.f32.mrb[157].mxu1  ;;  %v2481_v46 = vpop.f32.mrb[157].mxu0 }
 0x540   : > { %v2289_v17 = vadd.f32 %v2288_v16, %v8569_v25  ;;  %v2482_v18 = vadd.f32 %v2481_v46, %v8571_v32  ;;  %v2290_v19 = vpop.f32.mrb[158].mxu1  ;;  %v2483_v20 = vpop.f32.mrb[158].mxu0 }
 0x541   : > { %v2732_v22 = vmax.f32 %v2287_v14, 0.0  ;;  %v2734_v23 = vmax.f32 %v2480_v15, 0.0  ;;  %v2291_v12 = vadd.f32 %v2290_v19, %v8563_v21  ;;  %v2484_v24 = vadd.f32 %v2483_v20, %v8565_v34  ;;  %v2292_v33 = vpop.f32.mrb[159].mxu1  ;;  %v2485_v35 = vpop.f32.mrb[159].mxu0 }
 0x542   : > { %v2733_v36 = vmax.f32 %v2289_v17, 0.0  ;;  %v2735_v39 = vmax.f32 %v2482_v18, 0.0  ;;  %v2293_v40 = vadd.f32 %v2292_v33, %v8569_v25  ;;  %v2486_v26 = vadd.f32 %v2485_v35, %v8571_v32 }
 0x543   : > { %v3009_v41 = vmax.f32 %v3008_v5, %v2732_v22  ;;  %v3051_v42 = vmax.f32 %v3050_v6, %v2734_v23  ;;  %v2740_v52 = vmax.f32 %v2291_v12, 0.0  ;;  %v2742_v51 = vmax.f32 %v2484_v24, 0.0 }
 0x544   : > { %v3030_v56 = vmax.f32 %v3029_v7, %v2733_v36  ;;  %v3072_v57 = vmax.f32 %v3071_v10, %v2735_v39  ;;  %v2741_v59 = vmax.f32 %v2293_v40, 0.0  ;;  %v2743_v53 = vmax.f32 %v2486_v26, 0.0 }
 0x545   : > { %v3010_v49 = vmax.f32 %v3009_v41, %v2740_v52  ;;  %v3052_v21 = vmax.f32 %v3051_v42, %v2742_v51  ;;  %v7693_v20 = vmov (!%p6100_p11), -inf  }
 0x546   : > { %v3031_v45 = vmax.f32 %v3030_v56, %v2741_v59  ;;  %v3073_v34 = vmax.f32 %v3072_v57, %v2743_v53  ;;  %3084 = vst [vmem:[#allocation2] sm:$0xff] (!%p6100_p11), %v7693_v20  ;;  %3085 = vst [vmem:[#allocation2 + $0x8] sm:$0xff] (!%p6100_p11), %v7693_v20 }
 0x547   : > { %v3011_v63 = vrot.slane %v3010_v49, 4  ;;  %v3053_v43 = vrot.slane %v3052_v21, 4 }
 0x548   : > { %v3032_v58 = vrot.slane %v3031_v45, 4  ;;  %v3074_v61 = vrot.slane %v3073_v34, 4 }
 0x549   : > { %v3012_v62 = vmax.f32 %v3010_v49, %v3011_v63  ;;  %v3054_v25 = vmax.f32 %v3052_v21, %v3053_v43 }
 0x54a   : > { %v3033_v48 = vmax.f32 %v3031_v45, %v3032_v58  ;;  %v3075_v32 = vmax.f32 %v3073_v34, %v3074_v61 }
 0x54b   : > { %v3013_v1 = vrot.slane %v3012_v62, 2  ;;  %v3055_v2 = vrot.slane %v3054_v25, 2 }
 0x54c   : > { %v3034_v27 = vrot.slane %v3033_v48, 2  ;;  %v3076_v5 = vrot.slane %v3075_v32, 2  ;;  %3083 = sbr.rel (%p6100_p11) target bundleno = 1363 (0x553), region = 108 }
 0x54d   : > { %v3014_v6 = vmax.f32 %v3012_v62, %v3013_v1  ;;  %v3056_v7 = vmax.f32 %v3054_v25, %v3055_v2 }
 0x54e   : > { %v3035_v10 = vmax.f32 %v3033_v48, %v3034_v27  ;;  %v3077_v11 = vmax.f32 %v3075_v32, %v3076_v5 }
 0x54f   : > { %v3015_v13 = vrot.slane %v3014_v6, 1  ;;  %v3057_v14 = vrot.slane %v3056_v7, 1 }
 0x550   : > { %v3036_v15 = vrot.slane %v3035_v10, 1  ;;  %v3078_v16 = vrot.slane %v3077_v11, 1 }
 0x551   : > { %v3016_v46 = vmax.f32 %v3014_v6, %v3015_v13  ;;  %v3058_v17 = vmax.f32 %v3056_v7, %v3057_v14 }
 0x552   : > { %v3037_v18 = vmax.f32 %v3035_v10, %v3036_v15  ;;  %v3079_v19 = vmax.f32 %v3077_v11, %v3078_v16 }
 0x553 PF: > { %v7694_v22 = vmov 1983009808   ;;  %v3104_v12 = vcombine.low %v8498_v30, %v8504_v37  ;;  %v3105_v24 = vcombine.low %v8500_v31, %v8506_v38  ;;  %v3138_v35 = vcombine.low %v8585_v0, %v8591_v3  ;;  %v3086_v57 = vld [vmem:[#allocation2] sm:$0xff]  ;;  %v3087_v21 = vld [vmem:[#allocation2 + $0x8] sm:$0xff]  ;;  %s8959_s22 = sld [smem:[#allocation24_spill]] }
 0x554   : > { %v3107_v23 = vunpack.c.l.s4 %v7694_v22  ;;  %v3139_v36 = vcombine.low %v8587_v47, %v8593_v4  ;;  %v3121_v39 = vcombine.low %v8657_v54, %v8663_v44  ;;  %v3122_v40 = vcombine.low %v8659_v55, %v8665_v60 }
 0x555   : > { %v3155_v26 = vcombine.low %v3016_v46, %v3037_v18  ;;  %v3156_v41 = vcombine.low %v3058_v17, %v3079_v19  ;;  %vm3177_vm3 = vcmask 1041409   ;;  %vm3179_vm4 = vcmask 1043459  }
 0x556   : > { %v3108_v33 = vunpack.c.0.s8 %v3107_v23  ;;  %vm3181_vm5 = vcmask 1045509   ;;  %vm3183_vm6 = vcmask 1047559  }
 0x558   : > { %v8736_v30 = vsub.s32 %v3108_v33, %v8375_v8 }
 0x559   : > { %p6101_p8 = scmp.ne.s32.totalorder %s8959_s22, 1 }
 0x55a   : > { %v3112_v31 = vrot.slane %v3104_v12, %v8736_v30  ;;  %v3119_v37 = vrot.slane %v3105_v24, %v8736_v30  ;;  %v3146_v38 = vrot.slane %v3138_v35, %v8736_v30  ;;  %v3153_v0 = vrot.slane %v3139_v36, %v8736_v30  ;;  %v6812_v62 = vld [vmem:[#allocation12 + $0x4] ss:$16 sps:$4 sm:$0xff] (!%p6101_p8)   ;;  %v6816_v48 = vld [vmem:[#allocation12] ss:$16 sps:$4 sm:$0xff] (!%p6101_p8)   ;;  %s8960_s23 = sld [smem:[#allocation35_spill]] (!%p6101_p8)  ;;  %v7309_v8 = vld [vmem:[#allocation15 + $0x38] sm:$0xff] (!%p6101_p8)  }
 0x55b   : > { %v3129_v47 = vrot.slane %v3121_v39, %v8736_v30  ;;  %v3136_v3 = vrot.slane %v3122_v40, %v8736_v30  ;;  %v3163_v4 = vrot.slane %v3155_v26, %v8736_v30  ;;  %v3170_v54 = vrot.slane %v3156_v41, %v8736_v30  ;;  %v6814_v25 = vld [vmem:[#allocation12 + $0x204] ss:$16 sps:$4 sm:$0xff] (!%p6101_p8)   ;;  %4814 = vmatprep.subr.bf16.mxu1 (!%p6101_p8), %v6812_v62  ;;  %v6817_v32 = vld [vmem:[#allocation12 + $0x200] ss:$16 sps:$4 sm:$0xff] (!%p6101_p8)   ;;  %s8961_s3 = sld [smem:[#allocation37_spill]] (!%p6101_p8)  ;;  %s8962_s4 = sld [smem:[#allocation38_spill]] (!%p6101_p8) }
 0x55c   : > { %v3120_v55 = vcombine.low %v3112_v31, %v3119_v37  ;;  %v3154_v44 = vcombine.low %v3146_v38, %v3153_v0  ;;  %4855 = vmatprep.subr.bf16.mxu0 (!%p6101_p8), %v6814_v25  ;;  %v6818_v1 = vld [vmem:[#allocation12 + $0x24] ss:$16 sps:$4 sm:$0xff] (!%p6101_p8)   ;;  %4815 = vmatpush1.bf16.msra.mxu1 (!%p6101_p8), %v6816_v48  ;;  %v6822_v27 = vld [vmem:[#allocation12 + $0x20] ss:$16 sps:$4 sm:$0xff] (!%p6101_p8)  }
 0x55d   : > { %v3137_v60 = vcombine.low %v3129_v47, %v3136_v3  ;;  %v3171_v42 = vcombine.low %v3163_v4, %v3170_v54  ;;  %4856 = vmatpush1.bf16.msra.mxu0 (!%p6101_p8), %v6817_v32  ;;  %v6820_v2 = vld [vmem:[#allocation12 + $0x224] ss:$16 sps:$4 sm:$0xff] (!%p6101_p8)   ;;  %4816 = vmatprep.subr.bf16.mxu1 (!%p6101_p8), %v6818_v1  ;;  %v6823_v5 = vld [vmem:[#allocation12 + $0x220] ss:$16 sps:$4 sm:$0xff] (!%p6101_p8)  }
 0x55e   : > { %v3176_v52 = vrot.slane %v3154_v44, 7  ;;  %4857 = vmatprep.subr.bf16.mxu0 (!%p6101_p8), %v6820_v2  ;;  %v6824_v6 = vld [vmem:[#allocation12 + $0x44] ss:$16 sps:$4 sm:$0xff] (!%p6101_p8)   ;;  %v6828_v10 = vld [vmem:[#allocation12 + $0x40] ss:$16 sps:$4 sm:$0xff] (!%p6101_p8)  }
 0x55f   : > { %v3187_v51 = vrot.slane %v3171_v42, 7  ;;  %v6826_v7 = vld [vmem:[#allocation12 + $0x244] ss:$16 sps:$4 sm:$0xff] (!%p6101_p8)   ;;  %v6829_v11 = vld [vmem:[#allocation12 + $0x240] ss:$16 sps:$4 sm:$0xff] (!%p6101_p8)  }
 0x560   : > { %v3178_v56 = vsel %vm3177_vm3, %v3176_v52, %v3120_v55  ;;  %4817 = vmatpush1.bf16.msra.mxu1 (!%p6101_p8), %v6822_v27  ;;  %v6830_v13 = vld [vmem:[#allocation12 + $0x64] ss:$16 sps:$4 sm:$0xff] (!%p6101_p8)   ;;  %v6834_v15 = vld [vmem:[#allocation12 + $0x60] ss:$16 sps:$4 sm:$0xff] (!%p6101_p8)  }
 0x561   : > { %v3180_v59 = vsel %vm3179_vm4, %v3176_v52, %v3178_v56  ;;  %v3188_v53 = vsel %vm3177_vm3, %v3187_v51, %v3137_v60  ;;  %3201 = sbr.rel (%p6101_p8) target bundleno = 2349 (0x92d), region = 112  ;;  %4858 = vmatpush1.bf16.msra.mxu0 (!%p6101_p8), %v6823_v5  ;;  %4818 = vmatprep.subr.bf16.mxu1 (!%p6101_p8), %v6824_v6  ;;  %v6832_v14 = vld [vmem:[#allocation12 + $0x264] ss:$16 sps:$4 sm:$0xff] (!%p6101_p8)   ;;  %v6835_v16 = vld [vmem:[#allocation12 + $0x260] ss:$16 sps:$4 sm:$0xff] (!%p6101_p8)  }
 0x562   : > { %v3182_v49 = vsel %vm3181_vm5, %v3176_v52, %v3180_v59  ;;  %v3189_v45 = vsel %vm3179_vm4, %v3187_v51, %v3188_v53  ;;  %4859 = vmatprep.subr.bf16.mxu0 (!%p6101_p8), %v6826_v7  ;;  %v6836_v46 = vld [vmem:[#allocation12 + $0x84] ss:$16 sps:$4 sm:$0xff] (!%p6101_p8)   ;;  %v6840_v18 = vld [vmem:[#allocation12 + $0x80] ss:$16 sps:$4 sm:$0xff] (!%p6101_p8)  }
 0x563   : > { %v3184_v34 = vsel %vm3183_vm6, %v3176_v52, %v3182_v49  ;;  %v3190_v63 = vsel %vm3181_vm5, %v3187_v51, %v3189_v45  ;;  %v6838_v17 = vld [vmem:[#allocation12 + $0x284] ss:$16 sps:$4 sm:$0xff] (!%p6101_p8)   ;;  %v6841_v19 = vld [vmem:[#allocation12 + $0x280] ss:$16 sps:$4 sm:$0xff] (!%p6101_p8)  }
 0x564   : > { %v3194_v43 = vmax.f32 %v3086_v57, %v3184_v34  ;;  %v3191_v58 = vsel %vm3183_vm6, %v3187_v51, %v3190_v63  ;;  %4819 = vmatpush1.bf16.msra.mxu1 (!%p6101_p8), %v6828_v10  ;;  %v6842_v20 = vld [vmem:[#allocation12 + $0xa4] ss:$16 sps:$4 sm:$0xff] (!%p6101_p8)   ;;  %v6846_v23 = vld [vmem:[#allocation12 + $0xa0] ss:$16 sps:$4 sm:$0xff] (!%p6101_p8)  }
 0x565   : > { %v3195_v61 = vmax.f32 %v3087_v21, %v3191_v58  ;;  %4860 = vmatpush1.bf16.msra.mxu0 (!%p6101_p8), %v6829_v11  ;;  %4820 = vmatprep.subr.bf16.mxu1 (!%p6101_p8), %v6830_v13  ;;  %v6844_v22 = vld [vmem:[#allocation12 + $0x2a4] ss:$16 sps:$4 sm:$0xff] (!%p6101_p8)   ;;  %v6847_v12 = vld [vmem:[#allocation12 + $0x2a0] ss:$16 sps:$4 sm:$0xff] (!%p6101_p8)  }
 0x566   : > { %3196 = vst [vmem:[#allocation2] sm:$0xff] %v3194_v43  ;;  %4861 = vmatprep.subr.bf16.mxu0 (!%p6101_p8), %v6832_v14  ;;  %v6848_v24 = vld [vmem:[#allocation12 + $0xc4] ss:$16 sps:$4 sm:$0xff] (!%p6101_p8)   ;;  %v6852_v35 = vld [vmem:[#allocation12 + $0xc0] ss:$16 sps:$4 sm:$0xff] (!%p6101_p8)  }
 0x567   : > { %3197 = vst [vmem:[#allocation2 + $0x8] sm:$0xff] %v3195_v61  ;;  %v6850_v33 = vld [vmem:[#allocation12 + $0x2c4] ss:$16 sps:$4 sm:$0xff] (!%p6101_p8)   ;;  %v6853_v36 = vld [vmem:[#allocation12 + $0x2c0] ss:$16 sps:$4 sm:$0xff] (!%p6101_p8)  }
 0x568   : > { %4821 = vmatpush1.bf16.msra.mxu1 %v6834_v15  ;;  %v6854_v39 = vld [vmem:[#allocation12 + $0xe4] ss:$16 sps:$4 sm:$0xff]   ;;  %v6858_v26 = vld [vmem:[#allocation12 + $0xe0] ss:$16 sps:$4 sm:$0xff]  }
 0x569   : > { %4862 = vmatpush1.bf16.msra.mxu0 %v6835_v16  ;;  %4822 = vmatprep.subr.bf16.mxu1 %v6836_v46  ;;  %v6856_v40 = vld [vmem:[#allocation12 + $0x2e4] ss:$16 sps:$4 sm:$0xff]   ;;  %v6859_v41 = vld [vmem:[#allocation12 + $0x2e0] ss:$16 sps:$4 sm:$0xff]   ;;  %v6914_v16 = vld [vmem:[#allocation12 + $0xc] ss:$16 sps:$4 sm:$0xff]  }
 0x56a   : > { %4863 = vmatprep.subr.bf16.mxu0 %v6838_v17  ;;  %v6860_v31 = vld [vmem:[#allocation12 + $0x104] ss:$16 sps:$4 sm:$0xff]   ;;  %v6864_v38 = vld [vmem:[#allocation12 + $0x100] ss:$16 sps:$4 sm:$0xff]  }
 0x56b   : > { %v6862_v37 = vld [vmem:[#allocation12 + $0x304] ss:$16 sps:$4 sm:$0xff]   ;;  %v6865_v0 = vld [vmem:[#allocation12 + $0x300] ss:$16 sps:$4 sm:$0xff]  }
 0x56c   : > { %4823 = vmatpush1.bf16.msra.mxu1 %v6840_v18  ;;  %v6866_v47 = vld [vmem:[#allocation12 + $0x124] ss:$16 sps:$4 sm:$0xff]   ;;  %v6870_v4 = vld [vmem:[#allocation12 + $0x120] ss:$16 sps:$4 sm:$0xff]  }
 0x56d   : > { %4864 = vmatpush1.bf16.msra.mxu0 %v6841_v19  ;;  %4824 = vmatprep.subr.bf16.mxu1 %v6842_v20  ;;  %v6868_v3 = vld [vmem:[#allocation12 + $0x324] ss:$16 sps:$4 sm:$0xff]   ;;  %v6871_v54 = vld [vmem:[#allocation12 + $0x320] ss:$16 sps:$4 sm:$0xff]   ;;  %v6912_v19 = vld [vmem:[#allocation12 + $0x8] ss:$16 sps:$4 sm:$0xff]  }
 0x56e   : > { %4865 = vmatprep.subr.bf16.mxu0 %v6844_v22  ;;  %v6872_v55 = vld [vmem:[#allocation12 + $0x144] ss:$16 sps:$4 sm:$0xff]   ;;  %v6876_v60 = vld [vmem:[#allocation12 + $0x140] ss:$16 sps:$4 sm:$0xff]   ;;  %v6920_v22 = vld [vmem:[#allocation12 + $0x2c] ss:$16 sps:$4 sm:$0xff]  }
 0x56f   : > { %v6874_v44 = vld [vmem:[#allocation12 + $0x344] ss:$16 sps:$4 sm:$0xff]   ;;  %v6877_v42 = vld [vmem:[#allocation12 + $0x340] ss:$16 sps:$4 sm:$0xff]  }
 0x570   : > { %4825 = vmatpush1.bf16.msra.mxu1 %v6846_v23  ;;  %v6878_v52 = vld [vmem:[#allocation12 + $0x164] ss:$16 sps:$4 sm:$0xff]   ;;  %v3202_v56 = vld [vmem:[#allocation2] sm:$0xff] }
 0x571   : > { %4866 = vmatpush1.bf16.msra.mxu0 %v6847_v12  ;;  %4826 = vmatprep.subr.bf16.mxu1 %v6848_v24  ;;  %v6880_v51 = vld [vmem:[#allocation12 + $0x364] ss:$16 sps:$4 sm:$0xff]   ;;  %v6882_v57 = vld [vmem:[#allocation12 + $0x160] ss:$16 sps:$4 sm:$0xff]   ;;  %v3213_v59 = vrot.slane %v3202_v56, %v8736_v30  ;;  %v3206_v53 = vcombine.high %v3202_v56, %v3202_v56  ;;  %v6918_v12 = vld [vmem:[#allocation12 + $0x28] ss:$16 sps:$4 sm:$0xff]  }
 0x572   : > { %4867 = vmatprep.subr.bf16.mxu0 %v6850_v33  ;;  %v6883_v49 = vld [vmem:[#allocation12 + $0x360] ss:$16 sps:$4 sm:$0xff]   ;;  %v6884_v21 = vld [vmem:[#allocation12 + $0x184] ss:$16 sps:$4 sm:$0xff]   ;;  %v6926_v33 = vld [vmem:[#allocation12 + $0x4c] ss:$16 sps:$4 sm:$0xff]  }
 0x573   : > { %v6886_v45 = vld [vmem:[#allocation12 + $0x384] ss:$16 sps:$4 sm:$0xff]   ;;  %v3221_v34 = vcombine.high %v3213_v59, %v3213_v59  ;;  %v3220_v63 = vrot.slane %v3206_v53, %v8736_v30  ;;  %v6888_v43 = vld [vmem:[#allocation12 + $0x180] ss:$16 sps:$4 sm:$0xff]   ;;  %v8752_v46 = vpack.c.bf16 %v3213_v59, %v3213_v59  ;;  %v6956_v59 = vld [vmem:[#allocation12 + $0xec] ss:$16 sps:$4 sm:$0xff]  }
 0x574   : > { %4827 = vmatpush1.bf16.msra.mxu1 %v6852_v35  ;;  %v6889_v62 = vld [vmem:[#allocation12 + $0x380] ss:$16 sps:$4 sm:$0xff]   ;;  %v6890_v25 = vld [vmem:[#allocation12 + $0x1a4] ss:$16 sps:$4 sm:$0xff]  }
 0x575   : > { %4868 = vmatpush1.bf16.msra.mxu0 %v6853_v36  ;;  %4828 = vmatprep.subr.bf16.mxu1 %v6854_v39  ;;  %v3249_v58 = vpack.c.bf16 %v3221_v34, %v3221_v34  ;;  %v3222_v61 = vcombine.high %v3220_v63, %v3220_v63  ;;  %v6892_v48 = vld [vmem:[#allocation12 + $0x3a4] ss:$16 sps:$4 sm:$0xff]   ;;  %v6894_v1 = vld [vmem:[#allocation12 + $0x1a0] ss:$16 sps:$4 sm:$0xff]   ;;  %v8754_v18 = vpack.c.bf16 %v3220_v63, %v3220_v63  ;;  %v6924_v36 = vld [vmem:[#allocation12 + $0x48] ss:$16 sps:$4 sm:$0xff]  }
 0x576   : > { %4869 = vmatprep.subr.bf16.mxu0 %v6856_v40  ;;  %v6895_v2 = vld [vmem:[#allocation12 + $0x3a0] ss:$16 sps:$4 sm:$0xff]   ;;  %v6896_v27 = vld [vmem:[#allocation12 + $0x1c4] ss:$16 sps:$4 sm:$0xff]   ;;  %v6932_v40 = vld [vmem:[#allocation12 + $0x6c] ss:$16 sps:$4 sm:$0xff]  }
 0x577   : > { %v8749_v32 = vpack.c.bf16 %v3222_v61, %v3222_v61  ;;  %4846 = vmatprep.mubr.bf16.mxu1 %v3249_v58  ;;  %v6898_v5 = vld [vmem:[#allocation12 + $0x3c4] ss:$16 sps:$4 sm:$0xff]   ;;  %v6900_v6 = vld [vmem:[#allocation12 + $0x1c0] ss:$16 sps:$4 sm:$0xff]   ;;  %v6962_v34 = vld [vmem:[#allocation12 + $0x10c] ss:$16 sps:$4 sm:$0xff]  }
 0x578   : > { %4829 = vmatpush1.bf16.msra.mxu1 %v6858_v26  ;;  %v6901_v7 = vld [vmem:[#allocation12 + $0x3c0] ss:$16 sps:$4 sm:$0xff]   ;;  %v6902_v10 = vld [vmem:[#allocation12 + $0x1e4] ss:$16 sps:$4 sm:$0xff]   ;;  %v6968_v61 = vld [vmem:[#allocation12 + $0x12c] ss:$16 sps:$4 sm:$0xff]  }
 0x579   : > { %4870 = vmatpush1.bf16.msra.mxu0 %v6859_v41  ;;  %4830 = vmatprep.subr.bf16.mxu1 %v6860_v31  ;;  %v6904_v11 = vld [vmem:[#allocation12 + $0x3e4] ss:$16 sps:$4 sm:$0xff]   ;;  %v6906_v13 = vld [vmem:[#allocation12 + $0x1e0] ss:$16 sps:$4 sm:$0xff]   ;;  %v6930_v41 = vld [vmem:[#allocation12 + $0x68] ss:$16 sps:$4 sm:$0xff]  }
 0x57a   : > { %4871 = vmatprep.subr.bf16.mxu0 %v6862_v37  ;;  %4887 = vmatprep.mubr.bf16.mxu0 %v8749_v32  ;;  %v6907_v14 = vld [vmem:[#allocation12 + $0x3e0] ss:$16 sps:$4 sm:$0xff]   ;;  %v6911_v15 = vld [vmem:[#allocation12 + $0x404] ss:$16 sps:$4 sm:$0xff]   ;;  %v6938_v37 = vld [vmem:[#allocation12 + $0x8c] ss:$16 sps:$4 sm:$0xff]  }
 0x57b   : > { %v6909_v17 = vld [vmem:[#allocation12 + $0x400] ss:$16 sps:$4 sm:$0xff]   ;;  %v6917_v20 = vld [vmem:[#allocation12 + $0x424] ss:$16 sps:$4 sm:$0xff]  }
 0x57c   : > { %4831 = vmatpush1.bf16.msra.mxu1 %v6864_v38  ;;  %v6915_v23 = vld [vmem:[#allocation12 + $0x420] ss:$16 sps:$4 sm:$0xff]   ;;  %v6923_v24 = vld [vmem:[#allocation12 + $0x444] ss:$16 sps:$4 sm:$0xff]  }
 0x57d   : > { %4872 = vmatpush1.bf16.msra.mxu0 %v6865_v0  ;;  %4832 = vmatprep.subr.bf16.mxu1 %v6866_v47  ;;  %v6921_v35 = vld [vmem:[#allocation12 + $0x440] ss:$16 sps:$4 sm:$0xff]   ;;  %v6929_v39 = vld [vmem:[#allocation12 + $0x464] ss:$16 sps:$4 sm:$0xff]   ;;  %v6936_v0 = vld [vmem:[#allocation12 + $0x88] ss:$16 sps:$4 sm:$0xff]  }
 0x57e   : > { %4873 = vmatprep.subr.bf16.mxu0 %v6868_v3  ;;  %v6927_v26 = vld [vmem:[#allocation12 + $0x460] ss:$16 sps:$4 sm:$0xff]   ;;  %v6935_v31 = vld [vmem:[#allocation12 + $0x484] ss:$16 sps:$4 sm:$0xff]   ;;  %v6944_v3 = vld [vmem:[#allocation12 + $0xac] ss:$16 sps:$4 sm:$0xff]  }
 0x57f   : > { %v6933_v38 = vld [vmem:[#allocation12 + $0x480] ss:$16 sps:$4 sm:$0xff]   ;;  %v6941_v47 = vld [vmem:[#allocation12 + $0x4a4] ss:$16 sps:$4 sm:$0xff]  }
 0x580   : > { %4833 = vmatpush1.bf16.msra.mxu1 %v6870_v4  ;;  %v6939_v4 = vld [vmem:[#allocation12 + $0x4a0] ss:$16 sps:$4 sm:$0xff]  }
 0x581   : > { %4874 = vmatpush1.bf16.msra.mxu0 %v6871_v54  ;;  %4834 = vmatprep.subr.bf16.mxu1 %v6872_v55  ;;  %v6942_v54 = vld [vmem:[#allocation12 + $0xa8] ss:$16 sps:$4 sm:$0xff]   ;;  %v6947_v55 = vld [vmem:[#allocation12 + $0x4c4] ss:$16 sps:$4 sm:$0xff]   ;;  %v6957_v63 = vld [vmem:[#allocation12 + $0x500] ss:$16 sps:$4 sm:$0xff]  }
 0x582   : > { %4875 = vmatprep.subr.bf16.mxu0 %v6874_v44  ;;  %v6950_v44 = vld [vmem:[#allocation12 + $0xcc] ss:$16 sps:$4 sm:$0xff]  }
 0x584   : > { %4835 = vmatpush1.bf16.msra.mxu1 %v6876_v60  ;;  %v8758_v60 = vld [vmem:[#allocation2 + $0x8] sm:$0xff] }
 0x585   : > { %4876 = vmatpush1.bf16.msra.mxu0 %v6877_v42  ;;  %4836 = vmatprep.subr.bf16.mxu1 %v6878_v52  ;;  %v8762_v42 = vrot.slane %v8758_v60, %v8736_v30  ;;  %v6945_v52 = vld [vmem:[#allocation12 + $0x4c0] ss:$16 sps:$4 sm:$0xff]  }
 0x586   : > { %4877 = vmatprep.subr.bf16.mxu0 %v6880_v51  ;;  %v6948_v51 = vld [vmem:[#allocation12 + $0xc8] ss:$16 sps:$4 sm:$0xff]  }
 0x587   : > { %v3238_v56 = vcombine.high %v8762_v42, %v8762_v42 }
 0x588   : > { %4837 = vmatpush1.bf16.msra.mxu1 %v6882_v57  ;;  %v6953_v57 = vld [vmem:[#allocation12 + $0x4e4] ss:$16 sps:$4 sm:$0xff]  }
 0x589   : > { %4878 = vmatpush1.bf16.msra.mxu0 %v6883_v49  ;;  %4838 = vmatprep.subr.bf16.mxu1 %v6884_v21  ;;  %v8766_v53 = vpack.c.bf16 %v3238_v56, %v3238_v56  ;;  %v6951_v49 = vld [vmem:[#allocation12 + $0x4e0] ss:$16 sps:$4 sm:$0xff]   ;;  %v6954_v21 = vld [vmem:[#allocation12 + $0xe8] ss:$16 sps:$4 sm:$0xff]  }
 0x58a   : > { %4879 = vmatprep.subr.bf16.mxu0 %v6886_v45  ;;  %v6959_v45 = vld [vmem:[#allocation12 + $0x504] ss:$16 sps:$4 sm:$0xff]   ;;  %v7023_v56 = vld [vmem:[#allocation12 + $0x660] ss:$16 sps:$4 sm:$0xff]  }
 0x58c   : > { %4839 = vmatpush1.bf16.msra.mxu1 %v6888_v43  ;;  %v6960_v43 = vld [vmem:[#allocation12 + $0x108] ss:$16 sps:$4 sm:$0xff]  }
 0x58d   : > { %4880 = vmatpush1.bf16.msra.mxu0 %v6889_v62  ;;  %4840 = vmatprep.subr.bf16.mxu1 %v6890_v25  ;;  %v6963_v62 = vld [vmem:[#allocation12 + $0x520] ss:$16 sps:$4 sm:$0xff]   ;;  %v6966_v25 = vld [vmem:[#allocation12 + $0x128] ss:$16 sps:$4 sm:$0xff]  }
 0x58e   : > { %4881 = vmatprep.subr.bf16.mxu0 %v6892_v48  ;;  %v6971_v48 = vld [vmem:[#allocation12 + $0x544] ss:$16 sps:$4 sm:$0xff]  }
 0x590   : > { %4841 = vmatpush1.bf16.msra.mxu1 %v6894_v1  ;;  %v6974_v1 = vld [vmem:[#allocation12 + $0x14c] ss:$16 sps:$4 sm:$0xff]  }
 0x591   : > { %4882 = vmatpush1.bf16.msra.mxu0 %v6895_v2  ;;  %4842 = vmatprep.subr.bf16.mxu1 %v6896_v27  ;;  %v6969_v2 = vld [vmem:[#allocation12 + $0x540] ss:$16 sps:$4 sm:$0xff]   ;;  %v6972_v27 = vld [vmem:[#allocation12 + $0x148] ss:$16 sps:$4 sm:$0xff]  }
 0x592   : > { %4883 = vmatprep.subr.bf16.mxu0 %v6898_v5  ;;  %v6977_v5 = vld [vmem:[#allocation12 + $0x564] ss:$16 sps:$4 sm:$0xff]  }
 0x594   : > { %4843 = vmatpush1.bf16.msra.mxu1 %v6900_v6  ;;  %v6980_v6 = vld [vmem:[#allocation12 + $0x16c] ss:$16 sps:$4 sm:$0xff]  }
 0x595   : > { %4884 = vmatpush1.bf16.msra.mxu0 %v6901_v7  ;;  %4844 = vmatprep.subr.bf16.mxu1 %v6902_v10  ;;  %v6975_v7 = vld [vmem:[#allocation12 + $0x560] ss:$16 sps:$4 sm:$0xff]   ;;  %v6978_v10 = vld [vmem:[#allocation12 + $0x168] ss:$16 sps:$4 sm:$0xff]  }
 0x596   : > { %4885 = vmatprep.subr.bf16.mxu0 %v6904_v11  ;;  %v6983_v11 = vld [vmem:[#allocation12 + $0x584] ss:$16 sps:$4 sm:$0xff]  }
 0x598   : > { %4845 = vmatpush1.bf16.msra.mxu1 %v6906_v13  ;;  %v6986_v13 = vld [vmem:[#allocation12 + $0x18c] ss:$16 sps:$4 sm:$0xff]  }
 0x599   : > { %4886 = vmatpush1.bf16.msra.mxu0 %v6907_v14  ;;  %4978 = vmatprep.subr.bf16.mxu1 %v6914_v16  ;;  %v6981_v14 = vld [vmem:[#allocation12 + $0x580] ss:$16 sps:$4 sm:$0xff]   ;;  %v6989_v16 = vld [vmem:[#allocation12 + $0x5a4] ss:$16 sps:$4 sm:$0xff]  }
 0x59a   : > { %4896 = vmatprep.subr.bf16.mxu0 %v6911_v15  ;;  %v6984_v15 = vld [vmem:[#allocation12 + $0x188] ss:$16 sps:$4 sm:$0xff]  }
 0x59b   : > { %4847 = vmatmul.mubr.bf16.vlgmr.msra.gmra.mrb[0].mxu1 %v8752_v46 }
 0x59c   : > { %4888 = vmatmul.mubr.bf16.vlgmr.msra.gmra.mrb[0].mxu0 %v8754_v18  ;;  %4979 = vmatpush1.bf16.msra.mxu1 %v6912_v19  ;;  %v6987_v19 = vld [vmem:[#allocation12 + $0x5a0] ss:$16 sps:$4 sm:$0xff]  }
 0x59d   : > { %4897 = vmatpush1.bf16.msra.mxu0 %v6909_v17  ;;  %4980 = vmatprep.subr.bf16.mxu1 %v6920_v22  ;;  %v6992_v17 = vld [vmem:[#allocation12 + $0x1ac] ss:$16 sps:$4 sm:$0xff]   ;;  %v6995_v22 = vld [vmem:[#allocation12 + $0x5c4] ss:$16 sps:$4 sm:$0xff]  }
 0x59e   : > { %4898 = vmatprep.subr.bf16.mxu0 %v6917_v20  ;;  %5010 = vmatprep.mubr.bf16.mxu1 %v3249_v58  ;;  %v6965_v58 = vld [vmem:[#allocation12 + $0x524] ss:$16 sps:$4 sm:$0xff]   ;;  %v6990_v20 = vld [vmem:[#allocation12 + $0x1a8] ss:$16 sps:$4 sm:$0xff]  }
 0x59f   : > { %4928 = vmatprep.mubr.bf16.mxu0 %v8766_v53 }
 0x5a0   : > { %4981 = vmatpush1.bf16.msra.mxu1 %v6918_v12  ;;  %v3223_v12 = vcombine.high %v8758_v60, %v8758_v60  ;;  %v7022_v60 = vld [vmem:[#allocation12 + $0x24c] ss:$16 sps:$4 sm:$0xff]  }
 0x5a1   : > { %4899 = vmatpush1.bf16.msra.mxu0 %v6915_v23  ;;  %4982 = vmatprep.subr.bf16.mxu1 %v6926_v33  ;;  %v6998_v23 = vld [vmem:[#allocation12 + $0x1cc] ss:$16 sps:$4 sm:$0xff]   ;;  %v6996_v33 = vld [vmem:[#allocation12 + $0x1c8] ss:$16 sps:$4 sm:$0xff]  }
 0x5a2   : > { %4900 = vmatprep.subr.bf16.mxu0 %v6923_v24  ;;  %v6993_v24 = vld [vmem:[#allocation12 + $0x5c0] ss:$16 sps:$4 sm:$0xff]  }
 0x5a4   : > { %4983 = vmatpush1.bf16.msra.mxu1 %v6924_v36  ;;  %v7004_v36 = vld [vmem:[#allocation12 + $0x1ec] ss:$16 sps:$4 sm:$0xff]  }
 0x5a5   : > { %4901 = vmatpush1.bf16.msra.mxu0 %v6921_v35  ;;  %4984 = vmatprep.subr.bf16.mxu1 %v6932_v40  ;;  %v7001_v35 = vld [vmem:[#allocation12 + $0x5e4] ss:$16 sps:$4 sm:$0xff]   ;;  %v6999_v40 = vld [vmem:[#allocation12 + $0x5e0] ss:$16 sps:$4 sm:$0xff]  }
 0x5a6   : > { %4902 = vmatprep.subr.bf16.mxu0 %v6929_v39  ;;  %v8772_v39 = vrot.slane %v3223_v12, %v8736_v30  ;;  %v7008_v30 = vld [vmem:[#allocation12 + $0x208] ss:$16 sps:$4 sm:$0xff]   ;;  %v7071_v12 = vld [vmem:[#allocation12 + $0x760] ss:$16 sps:$4 sm:$0xff]  }
 0x5a8   : > { %4985 = vmatpush1.bf16.msra.mxu1 %v6930_v41  ;;  %v7007_v41 = vld [vmem:[#allocation12 + $0x604] ss:$16 sps:$4 sm:$0xff]  }
 0x5a9   : > { %4903 = vmatpush1.bf16.msra.mxu0 %v6927_v26  ;;  %4986 = vmatprep.subr.bf16.mxu1 %v6938_v37  ;;  %v7002_v26 = vld [vmem:[#allocation12 + $0x1e8] ss:$16 sps:$4 sm:$0xff]   ;;  %v3239_v37 = vcombine.high %v8772_v39, %v8772_v39 }
 0x5aa   : > { %4904 = vmatprep.subr.bf16.mxu0 %v6935_v31  ;;  %v7010_v31 = vld [vmem:[#allocation12 + $0x20c] ss:$16 sps:$4 sm:$0xff]  }
 0x5ac   : > { %4987 = vmatpush1.bf16.msra.mxu1 %v6936_v0  ;;  %v7005_v0 = vld [vmem:[#allocation12 + $0x600] ss:$16 sps:$4 sm:$0xff]  }
 0x5ad   : > { %4905 = vmatpush1.bf16.msra.mxu0 %v6933_v38  ;;  %4988 = vmatprep.subr.bf16.mxu1 %v6944_v3  ;;  %v8778_v38 = vpack.c.bf16 %v8762_v42, %v8762_v42  ;;  %v7016_v3 = vld [vmem:[#allocation12 + $0x22c] ss:$16 sps:$4 sm:$0xff]   ;;  %v7017_v42 = vld [vmem:[#allocation12 + $0x640] ss:$16 sps:$4 sm:$0xff]  }
 0x5ae   : > { %4906 = vmatprep.subr.bf16.mxu0 %v6941_v47  ;;  %v7013_v47 = vld [vmem:[#allocation12 + $0x624] ss:$16 sps:$4 sm:$0xff]  }
 0x5b0   : > { %4989 = vmatpush1.bf16.msra.mxu1 %v6942_v54  ;;  %v7011_v54 = vld [vmem:[#allocation12 + $0x620] ss:$16 sps:$4 sm:$0xff]  }
 0x5b1   : > { %4907 = vmatpush1.bf16.msra.mxu0 %v6939_v4  ;;  %4990 = vmatprep.subr.bf16.mxu1 %v6950_v44  ;;  %v8780_v4 = vpack.c.bf16 %v3239_v37, %v3239_v37  ;;  %v7019_v44 = vld [vmem:[#allocation12 + $0x644] ss:$16 sps:$4 sm:$0xff]   ;;  %v7086_v37 = vld [vmem:[#allocation12 + $0x3a8] ss:$16 sps:$4 sm:$0xff]  }
 0x5b2   : > { %4908 = vmatprep.subr.bf16.mxu0 %v6947_v55  ;;  %v7014_v55 = vld [vmem:[#allocation12 + $0x228] ss:$16 sps:$4 sm:$0xff]  }
 0x5b4   : > { %4991 = vmatpush1.bf16.msra.mxu1 %v6948_v51  ;;  %v7025_v51 = vld [vmem:[#allocation12 + $0x664] ss:$16 sps:$4 sm:$0xff]  }
 0x5b5   : > { %4909 = vmatpush1.bf16.msra.mxu0 %v6945_v52  ;;  %4992 = vmatprep.subr.bf16.mxu1 %v6956_v59  ;;  %v7020_v52 = vld [vmem:[#allocation12 + $0x248] ss:$16 sps:$4 sm:$0xff]   ;;  %v7031_v59 = vld [vmem:[#allocation12 + $0x684] ss:$16 sps:$4 sm:$0xff]  }
 0x5b6   : > { %4910 = vmatprep.subr.bf16.mxu0 %v6953_v57  ;;  %v7026_v57 = vld [vmem:[#allocation12 + $0x268] ss:$16 sps:$4 sm:$0xff]  }
 0x5b8   : > { %4993 = vmatpush1.bf16.msra.mxu1 %v6954_v21  ;;  %v7029_v21 = vld [vmem:[#allocation12 + $0x680] ss:$16 sps:$4 sm:$0xff]  }
 0x5b9   : > { %4911 = vmatpush1.bf16.msra.mxu0 %v6951_v49  ;;  %4994 = vmatprep.subr.bf16.mxu1 %v6962_v34  ;;  %v7034_v49 = vld [vmem:[#allocation12 + $0x28c] ss:$16 sps:$4 sm:$0xff]  }
 0x5ba   : > { %4912 = vmatprep.subr.bf16.mxu0 %v6959_v45  ;;  %v7037_v45 = vld [vmem:[#allocation12 + $0x6a4] ss:$16 sps:$4 sm:$0xff]   ;;  %v7040_v34 = vld [vmem:[#allocation12 + $0x2ac] ss:$16 sps:$4 sm:$0xff]  }
 0x5bc   : > { %4995 = vmatpush1.bf16.msra.mxu1 %v6960_v43  ;;  %v7038_v43 = vld [vmem:[#allocation12 + $0x2a8] ss:$16 sps:$4 sm:$0xff]  }
 0x5bd   : > { %4913 = vmatpush1.bf16.msra.mxu0 %v6957_v63  ;;  %4996 = vmatprep.subr.bf16.mxu1 %v6968_v61  ;;  %v7035_v63 = vld [vmem:[#allocation12 + $0x6a0] ss:$16 sps:$4 sm:$0xff]   ;;  %v7046_v61 = vld [vmem:[#allocation12 + $0x2cc] ss:$16 sps:$4 sm:$0xff]  }
 0x5be   : > { %4914 = vmatprep.subr.bf16.mxu0 %v6965_v58  ;;  %v7043_v58 = vld [vmem:[#allocation12 + $0x6c4] ss:$16 sps:$4 sm:$0xff]  }
 0x5c0   : > { %4997 = vmatpush1.bf16.msra.mxu1 %v6966_v25  ;;  %v7044_v25 = vld [vmem:[#allocation12 + $0x2c8] ss:$16 sps:$4 sm:$0xff]  }
 0x5c1   : > { %4915 = vmatpush1.bf16.msra.mxu0 %v6963_v62  ;;  %4998 = vmatprep.subr.bf16.mxu1 %v6974_v1  ;;  %v7041_v62 = vld [vmem:[#allocation12 + $0x6c0] ss:$16 sps:$4 sm:$0xff]   ;;  %v7052_v1 = vld [vmem:[#allocation12 + $0x2ec] ss:$16 sps:$4 sm:$0xff]  }
 0x5c2   : > { %4916 = vmatprep.subr.bf16.mxu0 %v6971_v48  ;;  %v7049_v48 = vld [vmem:[#allocation12 + $0x6e4] ss:$16 sps:$4 sm:$0xff]  }
 0x5c4   : > { %4999 = vmatpush1.bf16.msra.mxu1 %v6972_v27  ;;  %v7050_v27 = vld [vmem:[#allocation12 + $0x2e8] ss:$16 sps:$4 sm:$0xff]  }
 0x5c5   : > { %4917 = vmatpush1.bf16.msra.mxu0 %v6969_v2  ;;  %5000 = vmatprep.subr.bf16.mxu1 %v6980_v6  ;;  %v7047_v2 = vld [vmem:[#allocation12 + $0x6e0] ss:$16 sps:$4 sm:$0xff]   ;;  %v7058_v6 = vld [vmem:[#allocation12 + $0x30c] ss:$16 sps:$4 sm:$0xff]  }
 0x5c6   : > { %4918 = vmatprep.subr.bf16.mxu0 %v6977_v5  ;;  %v7055_v5 = vld [vmem:[#allocation12 + $0x704] ss:$16 sps:$4 sm:$0xff]  }
 0x5c8   : > { %5001 = vmatpush1.bf16.msra.mxu1 %v6978_v10  ;;  %v7056_v10 = vld [vmem:[#allocation12 + $0x308] ss:$16 sps:$4 sm:$0xff]  }
 0x5c9   : > { %4919 = vmatpush1.bf16.msra.mxu0 %v6975_v7  ;;  %5002 = vmatprep.subr.bf16.mxu1 %v6986_v13  ;;  %v7053_v7 = vld [vmem:[#allocation12 + $0x700] ss:$16 sps:$4 sm:$0xff]   ;;  %v7064_v13 = vld [vmem:[#allocation12 + $0x32c] ss:$16 sps:$4 sm:$0xff]  }
 0x5ca   : > { %4920 = vmatprep.subr.bf16.mxu0 %v6983_v11  ;;  %v7061_v11 = vld [vmem:[#allocation12 + $0x724] ss:$16 sps:$4 sm:$0xff]  }
 0x5cc   : > { %5003 = vmatpush1.bf16.msra.mxu1 %v6984_v15  ;;  %v7062_v15 = vld [vmem:[#allocation12 + $0x328] ss:$16 sps:$4 sm:$0xff]  }
 0x5cd   : > { %4921 = vmatpush1.bf16.msra.mxu0 %v6981_v14  ;;  %5004 = vmatprep.subr.bf16.mxu1 %v6992_v17  ;;  %v7059_v14 = vld [vmem:[#allocation12 + $0x720] ss:$16 sps:$4 sm:$0xff]   ;;  %v7070_v17 = vld [vmem:[#allocation12 + $0x34c] ss:$16 sps:$4 sm:$0xff]  }
 0x5ce   : > { %4922 = vmatprep.subr.bf16.mxu0 %v6989_v16  ;;  %v7067_v16 = vld [vmem:[#allocation12 + $0x744] ss:$16 sps:$4 sm:$0xff]  }
 0x5d0   : > { %5005 = vmatpush1.bf16.msra.mxu1 %v6990_v20  ;;  %v7068_v20 = vld [vmem:[#allocation12 + $0x348] ss:$16 sps:$4 sm:$0xff]  }
 0x5d1   : > { %4923 = vmatpush1.bf16.msra.mxu0 %v6987_v19  ;;  %5006 = vmatprep.subr.bf16.mxu1 %v6998_v23  ;;  %v7065_v19 = vld [vmem:[#allocation12 + $0x740] ss:$16 sps:$4 sm:$0xff]   ;;  %v7076_v23 = vld [vmem:[#allocation12 + $0x36c] ss:$16 sps:$4 sm:$0xff]  }
 0x5d2   : > { %4924 = vmatprep.subr.bf16.mxu0 %v6995_v22  ;;  %v7073_v22 = vld [vmem:[#allocation12 + $0x764] ss:$16 sps:$4 sm:$0xff]  }
 0x5d4   : > { %5007 = vmatpush1.bf16.msra.mxu1 %v6996_v33  ;;  %v7079_v33 = vld [vmem:[#allocation12 + $0x784] ss:$16 sps:$4 sm:$0xff]  }
 0x5d5   : > { %4925 = vmatpush1.bf16.msra.mxu0 %v6993_v24  ;;  %5008 = vmatprep.subr.bf16.mxu1 %v7004_v36  ;;  %v7074_v24 = vld [vmem:[#allocation12 + $0x368] ss:$16 sps:$4 sm:$0xff]   ;;  %v7077_v36 = vld [vmem:[#allocation12 + $0x780] ss:$16 sps:$4 sm:$0xff]  }
 0x5d6   : > { %4926 = vmatprep.subr.bf16.mxu0 %v7001_v35  ;;  %v7082_v35 = vld [vmem:[#allocation12 + $0x38c] ss:$16 sps:$4 sm:$0xff]  }
 0x5d8   : > { %5009 = vmatpush1.bf16.msra.mxu1 %v7002_v26  ;;  %v7085_v26 = vld [vmem:[#allocation12 + $0x7a4] ss:$16 sps:$4 sm:$0xff]  }
 0x5d9   : > { %4927 = vmatpush1.bf16.msra.mxu0 %v6999_v40  ;;  %5019 = vmatprep.subr.bf16.mxu1 %v7010_v31  ;;  %v7080_v40 = vld [vmem:[#allocation12 + $0x388] ss:$16 sps:$4 sm:$0xff]   ;;  %v7083_v31 = vld [vmem:[#allocation12 + $0x7a0] ss:$16 sps:$4 sm:$0xff]  }
 0x5da   : > { %4937 = vmatprep.subr.bf16.mxu0 %v7007_v41  ;;  %v7088_v41 = vld [vmem:[#allocation12 + $0x3ac] ss:$16 sps:$4 sm:$0xff]  }
 0x5db   : > { %5011 = vmatmul.mubr.bf16.vlgmr.msra.gmra.mrb[4].mxu1 %v8752_v46  ;;  %v7028_v46 = vld [vmem:[#allocation12 + $0x26c] ss:$16 sps:$4 sm:$0xff]  }
 0x5dc   : > { %4929 = vmatmul.mubr.bf16.vlgmr.msra.gmra.mrb[0].mxu0 %v8778_v38  ;;  %5020 = vmatpush1.bf16.msra.mxu1 %v7008_v30  ;;  %v7094_v30 = vld [vmem:[#allocation12 + $0x3cc] ss:$16 sps:$4 sm:$0xff]  }
 0x5dd   : > { %4938 = vmatpush1.bf16.msra.mxu0 %v7005_v0  ;;  %5021 = vmatprep.subr.bf16.mxu1 %v7016_v3  ;;  %v7091_v0 = vld [vmem:[#allocation12 + $0x7c4] ss:$16 sps:$4 sm:$0xff]   ;;  %v7092_v3 = vld [vmem:[#allocation12 + $0x3c8] ss:$16 sps:$4 sm:$0xff]  }
 0x5de   : > { %4939 = vmatprep.subr.bf16.mxu0 %v7013_v47  ;;  %4969 = vmatprep.mubr.bf16.mxu0 %v8780_v4  ;;  %v7089_v47 = vld [vmem:[#allocation12 + $0x7c0] ss:$16 sps:$4 sm:$0xff]  }
 0x5df   : > { %5051 = vmatprep.mubr.bf16.mxu1 %v8749_v32  ;;  %v7032_v32 = vld [vmem:[#allocation12 + $0x288] ss:$16 sps:$4 sm:$0xff]  }
 0x5e0   : > { %5022 = vmatpush1.bf16.msra.mxu1 %v7014_v55  ;;  %v7100_v55 = vld [vmem:[#allocation12 + $0x3ec] ss:$16 sps:$4 sm:$0xff]  }
 0x5e1   : > { %4940 = vmatpush1.bf16.msra.mxu0 %v7011_v54  ;;  %5023 = vmatprep.subr.bf16.mxu1 %v7022_v60  ;;  %v7097_v54 = vld [vmem:[#allocation12 + $0x7e4] ss:$16 sps:$4 sm:$0xff]   ;;  %v7098_v60 = vld [vmem:[#allocation12 + $0x3e8] ss:$16 sps:$4 sm:$0xff]  }
 0x5e2   : > { %4941 = vmatprep.subr.bf16.mxu0 %v7019_v44  ;;  %v7095_v44 = vld [vmem:[#allocation12 + $0x7e0] ss:$16 sps:$4 sm:$0xff]  }
 0x5e4   : > { %5024 = vmatpush1.bf16.msra.mxu1 %v7020_v52  ;;  %v7102_v52 = vld [vmem:[#allocation12 + $0x408] ss:$16 sps:$4 sm:$0xff]  }
 0x5e5   : > { %4942 = vmatpush1.bf16.msra.mxu0 %v7017_v42  ;;  %5025 = vmatprep.subr.bf16.mxu1 %v7028_v46  ;;  %v7104_v42 = vld [vmem:[#allocation12 + $0x40c] ss:$16 sps:$4 sm:$0xff]  }
 0x5e6   : > { %4943 = vmatprep.subr.bf16.mxu0 %v7025_v51  ;;  %v8788_v51 = vpack.c.bf16 %v8772_v39, %v8772_v39  ;;  %v7107_v46 = vld [vmem:[#allocation12 + $0x42c] ss:$16 sps:$4 sm:$0xff]   ;;  %v7201_v39 = vld [vmem:[#allocation14 + $0x10] ss:$8 sps:$4 sm:$0xff]  }
 0x5e8   : > { %5026 = vmatpush1.bf16.msra.mxu1 %v7026_v57  ;;  %v7200_v57 = vld [vmem:[#allocation14 + $0x4] ss:$8 sps:$4 sm:$0xff]  }
 0x5e9   : > { %4944 = vmatpush1.bf16.msra.mxu0 %v7023_v56  ;;  %5027 = vmatprep.subr.bf16.mxu1 %v7034_v49  ;;  %v7198_v56 = vld [vmem:[#allocation14] ss:$8 sps:$4 sm:$0xff]   ;;  %v7203_v49 = vld [vmem:[#allocation14 + $0x14] ss:$8 sps:$4 sm:$0xff]  }
 0x5ea   : > { %4945 = vmatprep.subr.bf16.mxu0 %v7031_v59  ;;  %v7105_v59 = vld [vmem:[#allocation12 + $0x428] ss:$16 sps:$4 sm:$0xff]  }
 0x5ec   : > { %5028 = vmatpush1.bf16.msra.mxu1 %v7032_v32  ;;  %v7206_v32 = vld [vmem:[#allocation14 + $0x24] ss:$8 sps:$4 sm:$0xff]  }
 0x5ed   : > { %4946 = vmatpush1.bf16.msra.mxu0 %v7029_v21  ;;  %5029 = vmatprep.subr.bf16.mxu1 %v7040_v34  ;;  %v7110_v21 = vld [vmem:[#allocation12 + $0x44c] ss:$16 sps:$4 sm:$0xff]  }
 0x5ee   : > { %4947 = vmatprep.subr.bf16.mxu0 %v7037_v45  ;;  %v7108_v45 = vld [vmem:[#allocation12 + $0x448] ss:$16 sps:$4 sm:$0xff]   ;;  %v7113_v34 = vld [vmem:[#allocation12 + $0x46c] ss:$16 sps:$4 sm:$0xff]  }
 0x5f0   : > { %5030 = vmatpush1.bf16.msra.mxu1 %v7038_v43  ;;  %v7116_v43 = vld [vmem:[#allocation12 + $0x48c] ss:$16 sps:$4 sm:$0xff]  }
 0x5f1   : > { %4948 = vmatpush1.bf16.msra.mxu0 %v7035_v63  ;;  %5031 = vmatprep.subr.bf16.mxu1 %v7046_v61  ;;  %v7111_v63 = vld [vmem:[#allocation12 + $0x468] ss:$16 sps:$4 sm:$0xff]   ;;  %v7212_v61 = vld [vmem:[#allocation14 + $0x44] ss:$8 sps:$4 sm:$0xff]  }
 0x5f2   : > { %4949 = vmatprep.subr.bf16.mxu0 %v7043_v58  ;;  %v7209_v58 = vld [vmem:[#allocation14 + $0x34] ss:$8 sps:$4 sm:$0xff]  }
 0x5f4   : > { %5032 = vmatpush1.bf16.msra.mxu1 %v7044_v25  ;;  %v7119_v25 = vld [vmem:[#allocation12 + $0x4ac] ss:$16 sps:$4 sm:$0xff]  }
 0x5f5   : > { %4950 = vmatpush1.bf16.msra.mxu0 %v7041_v62  ;;  %5033 = vmatprep.subr.bf16.mxu1 %v7052_v1  ;;  %v7114_v62 = vld [vmem:[#allocation12 + $0x488] ss:$16 sps:$4 sm:$0xff]   ;;  %v7215_v1 = vld [vmem:[#allocation14 + $0x54] ss:$8 sps:$4 sm:$0xff]  }
 0x5f6   : > { %4951 = vmatprep.subr.bf16.mxu0 %v7049_v48  ;;  %v7210_v48 = vld [vmem:[#allocation14 + $0x40] ss:$8 sps:$4 sm:$0xff]  }
 0x5f8   : > { %5034 = vmatpush1.bf16.msra.mxu1 %v7050_v27  ;;  %v7122_v27 = vld [vmem:[#allocation12 + $0x4cc] ss:$16 sps:$4 sm:$0xff]  }
 0x5f9   : > { %4952 = vmatpush1.bf16.msra.mxu0 %v7047_v2  ;;  %5035 = vmatprep.subr.bf16.mxu1 %v7058_v6  ;;  %v7117_v2 = vld [vmem:[#allocation12 + $0x4a8] ss:$16 sps:$4 sm:$0xff]   ;;  %v7218_v6 = vld [vmem:[#allocation14 + $0x64] ss:$8 sps:$4 sm:$0xff]  }
 0x5fa   : > { %4953 = vmatprep.subr.bf16.mxu0 %v7055_v5  ;;  %v7213_v5 = vld [vmem:[#allocation14 + $0x50] ss:$8 sps:$4 sm:$0xff]  }
 0x5fc   : > { %5036 = vmatpush1.bf16.msra.mxu1 %v7056_v10  ;;  %v7125_v10 = vld [vmem:[#allocation12 + $0x4ec] ss:$16 sps:$4 sm:$0xff]  }
 0x5fd   : > { %4954 = vmatpush1.bf16.msra.mxu0 %v7053_v7  ;;  %5037 = vmatprep.subr.bf16.mxu1 %v7064_v13  ;;  %v7120_v7 = vld [vmem:[#allocation12 + $0x4c8] ss:$16 sps:$4 sm:$0xff]   ;;  %v7221_v13 = vld [vmem:[#allocation14 + $0x74] ss:$8 sps:$4 sm:$0xff]  }
 0x5fe   : > { %4955 = vmatprep.subr.bf16.mxu0 %v7061_v11  ;;  %v7216_v11 = vld [vmem:[#allocation14 + $0x60] ss:$8 sps:$4 sm:$0xff]  }
 0x600   : > { %5038 = vmatpush1.bf16.msra.mxu1 %v7062_v15  ;;  %v7128_v15 = vld [vmem:[#allocation12 + $0x50c] ss:$16 sps:$4 sm:$0xff]  }
 0x601   : > { %4956 = vmatpush1.bf16.msra.mxu0 %v7059_v14  ;;  %5039 = vmatprep.subr.bf16.mxu1 %v7070_v17  ;;  %v7123_v14 = vld [vmem:[#allocation12 + $0x4e8] ss:$16 sps:$4 sm:$0xff]   ;;  %v7224_v17 = vld [vmem:[#allocation14 + $0x84] ss:$8 sps:$4 sm:$0xff]  }
 0x602   : > { %4957 = vmatprep.subr.bf16.mxu0 %v7067_v16  ;;  %v7219_v16 = vld [vmem:[#allocation14 + $0x70] ss:$8 sps:$4 sm:$0xff]  }
 0x604   : > { %5040 = vmatpush1.bf16.msra.mxu1 %v7068_v20  ;;  %v7131_v20 = vld [vmem:[#allocation12 + $0x52c] ss:$16 sps:$4 sm:$0xff]  }
 0x605   : > { %4958 = vmatpush1.bf16.msra.mxu0 %v7065_v19  ;;  %5041 = vmatprep.subr.bf16.mxu1 %v7076_v23  ;;  %v7126_v19 = vld [vmem:[#allocation12 + $0x508] ss:$16 sps:$4 sm:$0xff]   ;;  %v7227_v23 = vld [vmem:[#allocation14 + $0x94] ss:$8 sps:$4 sm:$0xff]  }
 0x606   : > { %4959 = vmatprep.subr.bf16.mxu0 %v7073_v22  ;;  %v7222_v22 = vld [vmem:[#allocation14 + $0x80] ss:$8 sps:$4 sm:$0xff]  }
 0x608   : > { %5042 = vmatpush1.bf16.msra.mxu1 %v7074_v24  ;;  %v7134_v24 = vld [vmem:[#allocation12 + $0x54c] ss:$16 sps:$4 sm:$0xff]  }
 0x609   : > { %4960 = vmatpush1.bf16.msra.mxu0 %v7071_v12  ;;  %5043 = vmatprep.subr.bf16.mxu1 %v7082_v35  ;;  %v7129_v12 = vld [vmem:[#allocation12 + $0x528] ss:$16 sps:$4 sm:$0xff]   ;;  %v7230_v35 = vld [vmem:[#allocation14 + $0xa4] ss:$8 sps:$4 sm:$0xff]  }
 0x60a   : > { %4961 = vmatprep.subr.bf16.mxu0 %v7079_v33  ;;  %v7225_v33 = vld [vmem:[#allocation14 + $0x90] ss:$8 sps:$4 sm:$0xff]  }
 0x60c   : > { %5044 = vmatpush1.bf16.msra.mxu1 %v7080_v40  ;;  %v7137_v40 = vld [vmem:[#allocation12 + $0x56c] ss:$16 sps:$4 sm:$0xff]  }
 0x60d   : > { %4962 = vmatpush1.bf16.msra.mxu0 %v7077_v36  ;;  %5045 = vmatprep.subr.bf16.mxu1 %v7088_v41  ;;  %v7132_v36 = vld [vmem:[#allocation12 + $0x548] ss:$16 sps:$4 sm:$0xff]   ;;  %v7233_v41 = vld [vmem:[#allocation14 + $0xb4] ss:$8 sps:$4 sm:$0xff]  }
 0x60e   : > { %4963 = vmatprep.subr.bf16.mxu0 %v7085_v26  ;;  %v7228_v26 = vld [vmem:[#allocation14 + $0xa0] ss:$8 sps:$4 sm:$0xff]  }
 0x610   : > { %5046 = vmatpush1.bf16.msra.mxu1 %v7086_v37  ;;  %v7140_v37 = vld [vmem:[#allocation12 + $0x58c] ss:$16 sps:$4 sm:$0xff]  }
 0x611   : > { %4964 = vmatpush1.bf16.msra.mxu0 %v7083_v31  ;;  %5047 = vmatprep.subr.bf16.mxu1 %v7094_v30  ;;  %v7135_v31 = vld [vmem:[#allocation12 + $0x568] ss:$16 sps:$4 sm:$0xff]   ;;  %v7236_v30 = vld [vmem:[#allocation14 + $0xc4] ss:$8 sps:$4 sm:$0xff]  }
 0x612   : > { %4965 = vmatprep.subr.bf16.mxu0 %v7091_v0  ;;  %v7231_v0 = vld [vmem:[#allocation14 + $0xb0] ss:$8 sps:$4 sm:$0xff]  }
 0x614   : > { %5048 = vmatpush1.bf16.msra.mxu1 %v7092_v3  ;;  %v7143_v3 = vld [vmem:[#allocation12 + $0x5ac] ss:$16 sps:$4 sm:$0xff]  }
 0x615   : > { %4966 = vmatpush1.bf16.msra.mxu0 %v7089_v47  ;;  %5049 = vmatprep.subr.bf16.mxu1 %v7100_v55  ;;  %v7138_v47 = vld [vmem:[#allocation12 + $0x588] ss:$16 sps:$4 sm:$0xff]   ;;  %v7239_v55 = vld [vmem:[#allocation14 + $0xd4] ss:$8 sps:$4 sm:$0xff]  }
 0x616   : > { %4967 = vmatprep.subr.bf16.mxu0 %v7097_v54  ;;  %v7234_v54 = vld [vmem:[#allocation14 + $0xc0] ss:$8 sps:$4 sm:$0xff]  }
 0x618   : > { %5050 = vmatpush1.bf16.msra.mxu1 %v7098_v60  ;;  %v7146_v60 = vld [vmem:[#allocation12 + $0x5cc] ss:$16 sps:$4 sm:$0xff]  }
 0x619   : > { %4968 = vmatpush1.bf16.msra.mxu0 %v7095_v44  ;;  %5060 = vmatprep.subr.bf16.mxu1 %v7104_v42  ;;  %v7141_v44 = vld [vmem:[#allocation12 + $0x5a8] ss:$16 sps:$4 sm:$0xff]  }
 0x61a   : > { %5546 = vmatprep.subr.bf16.mxu0 %v7200_v57  ;;  %v7237_v42 = vld [vmem:[#allocation14 + $0xd0] ss:$8 sps:$4 sm:$0xff]   ;;  %v7152_v57 = vld [vmem:[#allocation12 + $0x60c] ss:$16 sps:$4 sm:$0xff]  }
 0x61b   : > { %5052 = vmatmul.mubr.bf16.vlgmr.msra.gmra.mrb[4].mxu1 %v8754_v18  ;;  %v7204_v18 = vld [vmem:[#allocation14 + $0x20] ss:$8 sps:$4 sm:$0xff]  }
 0x61c   : > { %4970 = vmatmul.mubr.bf16.vlgmr.msra.gmra.mrb[0].mxu0 %v8788_v51  ;;  %5061 = vmatpush1.bf16.msra.mxu1 %v7102_v52  ;;  %v7144_v52 = vld [vmem:[#allocation12 + $0x5c8] ss:$16 sps:$4 sm:$0xff]  }
 0x61d   : > { %5092 = vmatprep.mubr.bf16.mxu1 %v8766_v53  ;;  %5062 = vmatprep.subr.bf16.mxu1 %v7107_v46  ;;  %v7207_v53 = vld [vmem:[#allocation14 + $0x30] ss:$8 sps:$4 sm:$0xff]   ;;  %v7149_v46 = vld [vmem:[#allocation12 + $0x5ec] ss:$16 sps:$4 sm:$0xff]  }
 0x61e   : > { %5547 = vmatpush1.bf16.msra.mxu0 %v7198_v56  ;;  %v7147_v56 = vld [vmem:[#allocation12 + $0x5e8] ss:$16 sps:$4 sm:$0xff]  }
 0x61f   : > { %5548 = vmatprep.subr.bf16.mxu0 %v7203_v49  ;;  %v7155_v49 = vld [vmem:[#allocation12 + $0x62c] ss:$16 sps:$4 sm:$0xff]  }
 0x620   : > { %5063 = vmatpush1.bf16.msra.mxu1 %v7105_v59  ;;  %v7150_v59 = vld [vmem:[#allocation12 + $0x608] ss:$16 sps:$4 sm:$0xff]  }
 0x621   : > { %5064 = vmatprep.subr.bf16.mxu1 %v7110_v21  ;;  %v7153_v21 = vld [vmem:[#allocation12 + $0x628] ss:$16 sps:$4 sm:$0xff]  }
 0x622   : > { %5549 = vmatpush1.bf16.msra.mxu0 %v7201_v39  ;;  %v7158_v39 = vld [vmem:[#allocation12 + $0x64c] ss:$16 sps:$4 sm:$0xff]  }
 0x623   : > { %5550 = vmatprep.subr.bf16.mxu0 %v7206_v32  ;;  %v7156_v32 = vld [vmem:[#allocation12 + $0x648] ss:$16 sps:$4 sm:$0xff]  }
 0x624   : > { %5065 = vmatpush1.bf16.msra.mxu1 %v7108_v45  ;;  %v7161_v45 = vld [vmem:[#allocation12 + $0x66c] ss:$16 sps:$4 sm:$0xff]  }
 0x625   : > { %5066 = vmatprep.subr.bf16.mxu1 %v7113_v34  ;;  %v7159_v34 = vld [vmem:[#allocation12 + $0x668] ss:$16 sps:$4 sm:$0xff]  }
 0x626   : > { %5551 = vmatpush1.bf16.msra.mxu0 %v7204_v18  ;;  %v7164_v18 = vld [vmem:[#allocation12 + $0x68c] ss:$16 sps:$4 sm:$0xff]  }
 0x627   : > { %5552 = vmatprep.subr.bf16.mxu0 %v7209_v58  ;;  %v7170_v58 = vld [vmem:[#allocation12 + $0x6cc] ss:$16 sps:$4 sm:$0xff]  }
 0x628   : > { %5067 = vmatpush1.bf16.msra.mxu1 %v7111_v63  ;;  %v7162_v63 = vld [vmem:[#allocation12 + $0x688] ss:$16 sps:$4 sm:$0xff]  }
 0x629   : > { %5068 = vmatprep.subr.bf16.mxu1 %v7116_v43  ;;  %v7167_v43 = vld [vmem:[#allocation12 + $0x6ac] ss:$16 sps:$4 sm:$0xff]  }
 0x62a   : > { %5553 = vmatpush1.bf16.msra.mxu0 %v7207_v53  ;;  %v7242_v53 = vld [vmem:[#allocation14 + $0xe4] ss:$8 sps:$4 sm:$0xff]  }
 0x62b   : > { %5554 = vmatprep.subr.bf16.mxu0 %v7212_v61  ;;  %v7240_v61 = vld [vmem:[#allocation14 + $0xe0] ss:$8 sps:$4 sm:$0xff]  }
 0x62c   : > { %5069 = vmatpush1.bf16.msra.mxu1 %v7114_v62 }
 0x62d   : > { %5070 = vmatprep.subr.bf16.mxu1 %v7119_v25 }
 0x62e   : > { %5555 = vmatpush1.bf16.msra.mxu0 %v7210_v48  ;;  %v7168_v48 = vld [vmem:[#allocation12 + $0x6c8] ss:$16 sps:$4 sm:$0xff]  }
 0x62f   : > { %5556 = vmatprep.subr.bf16.mxu0 %v7215_v1 }
 0x630   : > { %5071 = vmatpush1.bf16.msra.mxu1 %v7117_v2  ;;  %v7173_v2 = vld [vmem:[#allocation12 + $0x6ec] ss:$16 sps:$4 sm:$0xff]  }
 0x631   : > { %5072 = vmatprep.subr.bf16.mxu1 %v7122_v27  ;;  %v7245_v27 = vld [vmem:[#allocation14 + $0xf4] ss:$8 sps:$4 sm:$0xff]  }
 0x632   : > { %5557 = vmatpush1.bf16.msra.mxu0 %v7213_v5  ;;  %v7243_v5 = vld [vmem:[#allocation14 + $0xf0] ss:$8 sps:$4 sm:$0xff]  }
 0x633   : > { %5558 = vmatprep.subr.bf16.mxu0 %v7218_v6  ;;  %v7171_v6 = vld [vmem:[#allocation12 + $0x6e8] ss:$16 sps:$4 sm:$0xff]  }
 0x634   : > { %5073 = vmatpush1.bf16.msra.mxu1 %v7120_v7  ;;  %v7176_v7 = vld [vmem:[#allocation12 + $0x70c] ss:$16 sps:$4 sm:$0xff]  }
 0x635   : > { %5074 = vmatprep.subr.bf16.mxu1 %v7125_v10  ;;  %v7248_v10 = vld [vmem:[#allocation14 + $0x104] ss:$8 sps:$4 sm:$0xff]  }
 0x636   : > { %5559 = vmatpush1.bf16.msra.mxu0 %v7216_v11  ;;  %v7174_v11 = vld [vmem:[#allocation12 + $0x708] ss:$16 sps:$4 sm:$0xff]  }
 0x637   : > { %5560 = vmatprep.subr.bf16.mxu0 %v7221_v13  ;;  %v7179_v13 = vld [vmem:[#allocation12 + $0x72c] ss:$16 sps:$4 sm:$0xff]  }
 0x638   : > { %5075 = vmatpush1.bf16.msra.mxu1 %v7123_v14  ;;  %v7177_v14 = vld [vmem:[#allocation12 + $0x728] ss:$16 sps:$4 sm:$0xff]  }
 0x639   : > { %5076 = vmatprep.subr.bf16.mxu1 %v7128_v15  ;;  %v7182_v15 = vld [vmem:[#allocation12 + $0x74c] ss:$16 sps:$4 sm:$0xff]  }
 0x63a   : > { %5561 = vmatpush1.bf16.msra.mxu0 %v7219_v16  ;;  %v7180_v16 = vld [vmem:[#allocation12 + $0x748] ss:$16 sps:$4 sm:$0xff]  }
 0x63b   : > { %5562 = vmatprep.subr.bf16.mxu0 %v7224_v17  ;;  %v7185_v17 = vld [vmem:[#allocation12 + $0x76c] ss:$16 sps:$4 sm:$0xff]  }
 0x63c   : > { %5077 = vmatpush1.bf16.msra.mxu1 %v7126_v19  ;;  %v7183_v19 = vld [vmem:[#allocation12 + $0x768] ss:$16 sps:$4 sm:$0xff]  }
 0x63d   : > { %5078 = vmatprep.subr.bf16.mxu1 %v7131_v20  ;;  %v7188_v20 = vld [vmem:[#allocation12 + $0x78c] ss:$16 sps:$4 sm:$0xff]  }
 0x63e   : > { %5563 = vmatpush1.bf16.msra.mxu0 %v7222_v22  ;;  %v7186_v22 = vld [vmem:[#allocation12 + $0x788] ss:$16 sps:$4 sm:$0xff]  }
 0x63f   : > { %5564 = vmatprep.subr.bf16.mxu0 %v7227_v23  ;;  %v7191_v23 = vld [vmem:[#allocation12 + $0x7ac] ss:$16 sps:$4 sm:$0xff]  }
 0x640   : > { %5079 = vmatpush1.bf16.msra.mxu1 %v7129_v12  ;;  %v7189_v12 = vld [vmem:[#allocation12 + $0x7a8] ss:$16 sps:$4 sm:$0xff]  }
 0x641   : > { %5080 = vmatprep.subr.bf16.mxu1 %v7134_v24  ;;  %v7194_v24 = vld [vmem:[#allocation12 + $0x7cc] ss:$16 sps:$4 sm:$0xff]  }
 0x642   : > { %5565 = vmatpush1.bf16.msra.mxu0 %v7225_v33  ;;  %v7192_v33 = vld [vmem:[#allocation12 + $0x7c8] ss:$16 sps:$4 sm:$0xff]  }
 0x643   : > { %5566 = vmatprep.subr.bf16.mxu0 %v7230_v35  ;;  %v7197_v35 = vld [vmem:[#allocation12 + $0x7ec] ss:$16 sps:$4 sm:$0xff]  }
 0x644   : > { %5081 = vmatpush1.bf16.msra.mxu1 %v7132_v36  ;;  %v7195_v36 = vld [vmem:[#allocation12 + $0x7e8] ss:$16 sps:$4 sm:$0xff]  }
 0x645   : > { %5082 = vmatprep.subr.bf16.mxu1 %v7137_v40  ;;  %v8799_v40 = vld [vmem:[%s8960_s23] sm:$0xf] }
 0x646   : > { %5567 = vmatpush1.bf16.msra.mxu0 %v7228_v26  ;;  %v3517_v26 = vrot.slane %v8799_v40, %v8380_v9 }
 0x647   : > { %5568 = vmatprep.subr.bf16.mxu0 %v7233_v41  ;;  %v3521_v41 = vrot.slane %v8799_v40, %v8387_v28 }
 0x648   : > { %5083 = vmatpush1.bf16.msra.mxu1 %v7135_v31 }
 0x649   : > { %5084 = vmatprep.subr.bf16.mxu1 %v7140_v37 }
 0x64a   : > { %5569 = vmatpush1.bf16.msra.mxu0 %v7231_v0 }
 0x64b   : > { %5570 = vmatprep.subr.bf16.mxu0 %v7236_v30 }
 0x64c   : > { %5085 = vmatpush1.bf16.msra.mxu1 %v7138_v47 }
 0x64d   : > { %5086 = vmatprep.subr.bf16.mxu1 %v7143_v3 }
 0x64e   : > { %5571 = vmatpush1.bf16.msra.mxu0 %v7234_v54 }
 0x64f   : > { %5572 = vmatprep.subr.bf16.mxu0 %v7239_v55 }
 0x650   : > { %5087 = vmatpush1.bf16.msra.mxu1 %v7141_v44 }
 0x651   : > { %5088 = vmatprep.subr.bf16.mxu1 %v7146_v60 }
 0x652   : > { %5573 = vmatpush1.bf16.msra.mxu0 %v7237_v42  ;;  %v7246_v42 = vld [vmem:[#allocation14 + $0x100] ss:$8 sps:$4 sm:$0xff]  }
 0x653   : > { %5574 = vmatprep.subr.bf16.mxu0 %v7242_v53  ;;  %v7302_v53 = vld [vmem:[#allocation15 + $0x60] sm:$0xff]  }
 0x654   : > { %5089 = vmatpush1.bf16.msra.mxu1 %v7144_v52 }
 0x655   : > { %5090 = vmatprep.subr.bf16.mxu1 %v7149_v46  ;;  %v7251_v46 = vld [vmem:[#allocation14 + $0x114] ss:$8 sps:$4 sm:$0xff]  }
 0x656   : > { %5575 = vmatpush1.bf16.msra.mxu0 %v7240_v61  ;;  %v7263_v61 = vld [vmem:[#allocation14 + $0x154] ss:$8 sps:$4 sm:$0xff]  }
 0x657   : > { %5576 = vmatprep.subr.bf16.mxu0 %v7245_v27  ;;  %v7264_v27 = vld [vmem:[#allocation14 + $0x160] ss:$8 sps:$4 sm:$0xff]  }
 0x658   : > { %5091 = vmatpush1.bf16.msra.mxu1 %v7147_v56  ;;  %v7294_v56 = vld [vmem:[#allocation15 + $0x40] sm:$0xff]  }
 0x659   : > { %5101 = vmatprep.subr.bf16.mxu1 %v7152_v57  ;;  %v7295_v57 = vld [vmem:[#allocation15] sm:$0xff]  }
 0x65a   : > { %5577 = vmatpush1.bf16.msra.mxu0 %v7243_v5  ;;  %v7269_v5 = vld [vmem:[#allocation14 + $0x174] ss:$8 sps:$4 sm:$0xff]  }
 0x65b   : > { %5093 = vmatmul.mubr.bf16.vlgmr.msra.gmra.mrb[4].mxu1 %v8778_v38  ;;  %v7165_v38 = vld [vmem:[#allocation12 + $0x6a8] ss:$16 sps:$4 sm:$0xff]   ;;  %5587 = vmatprep.subr.bf16.mxu0 %v7248_v10 }
 0x65c   : > { %5102 = vmatpush1.bf16.msra.mxu1 %v7150_v59  ;;  %5133 = vmatprep.mubr.bf16.mxu1 %v8780_v4  ;;  %v7296_v59 = vld [vmem:[#allocation15 + $0x48] sm:$0xff]  }
 0x65d   : > { %5103 = vmatprep.subr.bf16.mxu1 %v7155_v49  ;;  %v7249_v49 = vld [vmem:[#allocation14 + $0x110] ss:$8 sps:$4 sm:$0xff]   ;;  %v7270_v10 = vld [vmem:[#allocation14 + $0x180] ss:$8 sps:$4 sm:$0xff]  }
 0x660   : > { %5104 = vmatpush1.bf16.msra.mxu1 %v7153_v21  ;;  %v7254_v21 = vld [vmem:[#allocation14 + $0x124] ss:$8 sps:$4 sm:$0xff]  }
 0x661   : > { %5105 = vmatprep.subr.bf16.mxu1 %v7158_v39  ;;  %v7297_v39 = vld [vmem:[#allocation15 + $0x8] sm:$0xff]  }
 0x664   : > { %5106 = vmatpush1.bf16.msra.mxu1 %v7156_v32  ;;  %v7298_v32 = vld [vmem:[#allocation15 + $0x50] sm:$0xff]  }
 0x665   : > { %5107 = vmatprep.subr.bf16.mxu1 %v7161_v45  ;;  %v7252_v45 = vld [vmem:[#allocation14 + $0x120] ss:$8 sps:$4 sm:$0xff]  }
 0x668   : > { %5108 = vmatpush1.bf16.msra.mxu1 %v7159_v34  ;;  %v7257_v34 = vld [vmem:[#allocation14 + $0x134] ss:$8 sps:$4 sm:$0xff]  }
 0x669   : > { %5109 = vmatprep.subr.bf16.mxu1 %v7164_v18  ;;  %v7299_v18 = vld [vmem:[#allocation15 + $0x10] sm:$0xff]  }
 0x66c   : > { %5110 = vmatpush1.bf16.msra.mxu1 %v7162_v63  ;;  %v7300_v63 = vld [vmem:[#allocation15 + $0x58] sm:$0xff]  }
 0x66d   : > { %5111 = vmatprep.subr.bf16.mxu1 %v7167_v43  ;;  %v7255_v43 = vld [vmem:[#allocation14 + $0x130] ss:$8 sps:$4 sm:$0xff]  }
 0x66e   : > { %v4848_v4 = vpop.f32.mrb[0].mxu1 }
 0x66f   : > { %v4850_v62 = vpop.f32.mrb[1].mxu1  ;;  %v4849_v31 = vadd.f32 %v4848_v4, %v3517_v26  ;;  %v7258_v4 = vld [vmem:[#allocation14 + $0x140] ss:$8 sps:$4 sm:$0xff]   ;;  %v3529_v26 = vrot.slane %v8799_v40, %v1370_v29 }
 0x670   : > { %v4852_v25 = vpop.f32.mrb[2].mxu1  ;;  %5112 = vmatpush1.bf16.msra.mxu1 %v7165_v38  ;;  %v4851_v37 = vadd.f32 %v4850_v62, %v3521_v41  ;;  %v7260_v38 = vld [vmem:[#allocation14 + $0x144] ss:$8 sps:$4 sm:$0xff]   ;;  %v5214_v29 = vld [vmem:[%s8961_s3] sm:$0x3] }
 0x671   : > { %v4853_v1 = vpop.f32.mrb[3].mxu1  ;;  %5113 = vmatprep.subr.bf16.mxu1 %v7170_v58  ;;  %v7301_v58 = vld [vmem:[#allocation15 + $0x18] sm:$0xff]   ;;  %v7303_v62 = vld [vmem:[#allocation15 + $0x20] sm:$0xff]   ;;  %v7304_v25 = vld [vmem:[#allocation15 + $0x68] sm:$0xff]  }
 0x672   : > { %v7266_v1 = vld [vmem:[#allocation14 + $0x164] ss:$8 sps:$4 sm:$0xff]  }
 0x674   : > { %5114 = vmatpush1.bf16.msra.mxu1 %v7168_v48  ;;  %v7261_v48 = vld [vmem:[#allocation14 + $0x150] ss:$8 sps:$4 sm:$0xff]  }
 0x675   : > { %5115 = vmatprep.subr.bf16.mxu1 %v7173_v2  ;;  %v7305_v2 = vld [vmem:[#allocation15 + $0x28] sm:$0xff]  }
 0x678   : > { %5116 = vmatpush1.bf16.msra.mxu1 %v7171_v6  ;;  %v7267_v6 = vld [vmem:[#allocation14 + $0x170] ss:$8 sps:$4 sm:$0xff]  }
 0x679   : > { %5117 = vmatprep.subr.bf16.mxu1 %v7176_v7  ;;  %v7272_v7 = vld [vmem:[#allocation14 + $0x184] ss:$8 sps:$4 sm:$0xff]  }
 0x67c   : > { %5118 = vmatpush1.bf16.msra.mxu1 %v7174_v11  ;;  %v7275_v11 = vld [vmem:[#allocation14 + $0x194] ss:$8 sps:$4 sm:$0xff]  }
 0x67d   : > { %5119 = vmatprep.subr.bf16.mxu1 %v7179_v13  ;;  %v7273_v13 = vld [vmem:[#allocation14 + $0x190] ss:$8 sps:$4 sm:$0xff]  }
 0x680   : > { %5120 = vmatpush1.bf16.msra.mxu1 %v7177_v14  ;;  %v7278_v14 = vld [vmem:[#allocation14 + $0x1a4] ss:$8 sps:$4 sm:$0xff]  }
 0x681   : > { %5121 = vmatprep.subr.bf16.mxu1 %v7182_v15  ;;  %v7276_v15 = vld [vmem:[#allocation14 + $0x1a0] ss:$8 sps:$4 sm:$0xff]  }
 0x684   : > { %5122 = vmatpush1.bf16.msra.mxu1 %v7180_v16  ;;  %v7281_v16 = vld [vmem:[#allocation14 + $0x1b4] ss:$8 sps:$4 sm:$0xff]  }
 0x685   : > { %5123 = vmatprep.subr.bf16.mxu1 %v7185_v17  ;;  %v7279_v17 = vld [vmem:[#allocation14 + $0x1b0] ss:$8 sps:$4 sm:$0xff]  }
 0x688   : > { %5124 = vmatpush1.bf16.msra.mxu1 %v7183_v19  ;;  %v7284_v19 = vld [vmem:[#allocation14 + $0x1c4] ss:$8 sps:$4 sm:$0xff]  }
 0x689   : > { %5125 = vmatprep.subr.bf16.mxu1 %v7188_v20  ;;  %v7282_v20 = vld [vmem:[#allocation14 + $0x1c0] ss:$8 sps:$4 sm:$0xff]  }
 0x68c   : > { %5126 = vmatpush1.bf16.msra.mxu1 %v7186_v22  ;;  %v7287_v22 = vld [vmem:[#allocation14 + $0x1d4] ss:$8 sps:$4 sm:$0xff]  }
 0x68d   : > { %5127 = vmatprep.subr.bf16.mxu1 %v7191_v23  ;;  %v7285_v23 = vld [vmem:[#allocation14 + $0x1d0] ss:$8 sps:$4 sm:$0xff]  }
 0x690   : > { %5128 = vmatpush1.bf16.msra.mxu1 %v7189_v12  ;;  %v7290_v12 = vld [vmem:[#allocation14 + $0x1e4] ss:$8 sps:$4 sm:$0xff]  }
 0x691   : > { %5129 = vmatprep.subr.bf16.mxu1 %v7194_v24  ;;  %v7288_v24 = vld [vmem:[#allocation14 + $0x1e0] ss:$8 sps:$4 sm:$0xff]  }
 0x694   : > { %5130 = vmatpush1.bf16.msra.mxu1 %v7192_v33  ;;  %v7293_v33 = vld [vmem:[#allocation14 + $0x1f4] ss:$8 sps:$4 sm:$0xff]  }
 0x695   : > { %5131 = vmatprep.subr.bf16.mxu1 %v7197_v35  ;;  %v7291_v35 = vld [vmem:[#allocation14 + $0x1f0] ss:$8 sps:$4 sm:$0xff]  }
 0x698   : > { %5132 = vmatpush1.bf16.msra.mxu1 %v7195_v36  ;;  %v3525_v36 = vrot.slane %v8799_v40, %v1366_v50  ;;  %v7308_v50 = vld [vmem:[#allocation15 + $0x78] sm:$0xff]   ;;  %v5219_v40 = vrot.slane %v5214_v29, %v8380_v9  ;;  %v6422_v9 = vld [vmem:[%s8962_s4] ss:$0 sm:$0xff] }
 0x699   : > { %6482 = vmatprep.subr.bf16.mxu1 %v7294_v56 }
 0x69b   : > { %5134 = vmatmul.mubr.bf16.vlgmr.msra.gmra.mrb[4].mxu1 %v8788_v51 }
 0x69c   : > { %6483 = vmatpush3.bf16.msra.mxu1 %v7295_v57 }
 0x69d   : > { %6484 = vmatprep.subr.bf16.mxu1 %v7296_v59 }
 0x6a0   : > { %6485 = vmatpush3.bf16.msra.mxu1 %v7297_v39 }
 0x6a1   : > { %6486 = vmatprep.subr.bf16.mxu1 %v7298_v32 }
 0x6a4   : > { %6487 = vmatpush3.bf16.msra.mxu1 %v7299_v18 }
 0x6a5   : > { %6488 = vmatprep.subr.bf16.mxu1 %v7300_v63 }
 0x6a8   : > { %6489 = vmatpush3.bf16.msra.mxu1 %v7301_v58 }
 0x6a9   : > { %6490 = vmatprep.subr.bf16.mxu1 %v7302_v53 }
 0x6ac   : > { %6491 = vmatpush3.bf16.msra.mxu1 %v7303_v62 }
 0x6ad   : > { %6492 = vmatprep.subr.bf16.mxu1 %v7304_v25 }
 0x6b0   : > { %6493 = vmatpush3.bf16.msra.mxu1 %v7305_v2 }
 0x6ef   : > { %v4971_v0 = vpop.f32.mrb[0].mxu0 }
 0x6f0   : > { %v6589_v30 = vadd.f32 %v4971_v0, %v4849_v31  ;;  %v4973_v47 = vpop.f32.mrb[1].mxu0 }
 0x6f1   : > { %v6591_v3 = vadd.f32 %v4973_v47, %v4851_v37  ;;  %v4975_v54 = vpop.f32.mrb[2].mxu0 }
 0x6f2   : > { %v5142_v55 = vmax.f32 %v6589_v30, 0.0  ;;  %v4976_v51 = vpop.f32.mrb[3].mxu0 }
 0x6f3   : > { %v5143_v44 = vmax.f32 %v6591_v3, 0.0 }
 0x6f4   : > { %v5146_v52 = vpack.c.bf16 %v5142_v55, %v5142_v55 }
 0x6f5   : > { %v5147_v60 = vpack.c.bf16 %v5143_v44, %v5143_v44  ;;  %v7306_v44 = vld [vmem:[#allocation15 + $0x70] sm:$0xff]  }
 0x6f6   : > { %6494 = vmatprep.subr.bf16.mxu1 %v7306_v44 }
 0x6f7   : > { %5578 = vmatprep.mubr.bf16.mxu0 %v5147_v60  ;;  %v7307_v60 = vld [vmem:[#allocation15 + $0x30] sm:$0xff]  }
 0x6f8   : > { %5579 = vmatmul.mubr.bf16.vlgmr.msra.gmra.mrb[4].mxu0 %v5146_v52  ;;  %6495 = vmatpush3.bf16.msra.mxu1 %v7307_v60 }
 0x6f9   : > { %5588 = vmatpush1.bf16.msra.mxu0 %v7246_v42  ;;  %6496 = vmatprep.subr.bf16.mxu1 %v7308_v50  ;;  %v5223_v42 = vrot.slane %v5214_v29, %v8387_v28 }
 0x6fa   : > { %5589 = vmatprep.subr.bf16.mxu0 %v7251_v46 }
 0x6fc   : > { %6497 = vmatpush3.bf16.msra.mxu1 %v7309_v8 }
 0x6fd   : > { %5590 = vmatpush1.bf16.msra.mxu0 %v7249_v49 }
 0x6fe   : > { %5591 = vmatprep.subr.bf16.mxu0 %v7254_v21 }
 0x701   : > { %5592 = vmatpush1.bf16.msra.mxu0 %v7252_v45 }
 0x702   : > { %5593 = vmatprep.subr.bf16.mxu0 %v7257_v34 }
 0x705   : > { %5594 = vmatpush1.bf16.msra.mxu0 %v7255_v43 }
 0x706   : > { %5595 = vmatprep.subr.bf16.mxu0 %v7260_v38 }
 0x709   : > { %5596 = vmatpush1.bf16.msra.mxu0 %v7258_v4 }
 0x70a   : > { %5597 = vmatprep.subr.bf16.mxu0 %v7263_v61 }
 0x70d   : > { %5598 = vmatpush1.bf16.msra.mxu0 %v7261_v48 }
 0x70e   : > { %5599 = vmatprep.subr.bf16.mxu0 %v7266_v1 }
 0x711   : > { %5600 = vmatpush1.bf16.msra.mxu0 %v7264_v27 }
 0x712   : > { %5601 = vmatprep.subr.bf16.mxu0 %v7269_v5 }
 0x715   : > { %5602 = vmatpush1.bf16.msra.mxu0 %v7267_v6 }
 0x716   : > { %5603 = vmatprep.subr.bf16.mxu0 %v7272_v7 }
 0x719   : > { %5604 = vmatpush1.bf16.msra.mxu0 %v7270_v10 }
 0x71a   : > { %5605 = vmatprep.subr.bf16.mxu0 %v7275_v11 }
 0x71d   : > { %5606 = vmatpush1.bf16.msra.mxu0 %v7273_v13 }
 0x71e   : > { %5607 = vmatprep.subr.bf16.mxu0 %v7278_v14 }
 0x721   : > { %5608 = vmatpush1.bf16.msra.mxu0 %v7276_v15 }
 0x722   : > { %5609 = vmatprep.subr.bf16.mxu0 %v7281_v16 }
 0x725   : > { %5610 = vmatpush1.bf16.msra.mxu0 %v7279_v17 }
 0x726   : > { %5611 = vmatprep.subr.bf16.mxu0 %v7284_v19 }
 0x729   : > { %5612 = vmatpush1.bf16.msra.mxu0 %v7282_v20 }
 0x72a   : > { %5613 = vmatprep.subr.bf16.mxu0 %v7287_v22 }
 0x72d   : > { %5614 = vmatpush1.bf16.msra.mxu0 %v7285_v23 }
 0x72e   : > { %5615 = vmatprep.subr.bf16.mxu0 %v7290_v12 }
 0x731   : > { %5616 = vmatpush1.bf16.msra.mxu0 %v7288_v24 }
 0x732   : > { %5617 = vmatprep.subr.bf16.mxu0 %v7293_v33 }
 0x735   : > { %5618 = vmatpush1.bf16.msra.mxu0 %v7291_v35 }
 0x76e   : > { %v5135_v41 = vpop.f32.mrb[4].mxu1 }
 0x76f   : > { %v6592_v31 = vadd.f32 %v5135_v41, %v3525_v36  ;;  %v5137_v37 = vpop.f32.mrb[5].mxu1 }
 0x770   : > { %v6593_v0 = vadd.f32 %v5137_v37, %v3529_v26  ;;  %v5139_v30 = vpop.f32.mrb[6].mxu1 }
 0x771   : > { %v5144_v47 = vmax.f32 %v6592_v31, 0.0  ;;  %v5140_v3 = vpop.f32.mrb[7].mxu1 }
 0x772   : > { %v5145_v54 = vmax.f32 %v6593_v0, 0.0 }
 0x773   : > { %v5148_v51 = vpack.c.bf16 %v5144_v47, %v5144_v47 }
 0x774   : > { %v5149_v55 = vpack.c.bf16 %v5145_v54, %v5145_v54 }
 0x776   : > { %5619 = vmatprep.mubr.bf16.mxu0 %v5149_v55 }
 0x777   : > { %5620 = vmatmul.mubr.bf16.vlgmr.msra.gmra.mrb[4].mxu0 %v5148_v51 }
 0x84a   : > { %v5621_v52 = vpop.f32.mrb[4].mxu0 }
 0x84b   : > { %v6594_v46 = vadd.f32 %v5621_v52, %v5219_v40  ;;  %v5623_v56 = vpop.f32.mrb[5].mxu0 }
 0x84c   : > { %v6595_v57 = vadd.f32 %v5623_v56, %v5223_v42  ;;  %v5625_v59 = vpop.f32.mrb[6].mxu0 }
 0x84d   : > { %v5628_v49 = vmax.f32 %v6594_v46, 0.0  ;;  %v5626_v21 = vpop.f32.mrb[7].mxu0 }
 0x84e   : > { %v5629_v39 = vmax.f32 %v6595_v57, 0.0 }
 0x84f   : > { %v5630_v45 = vpack.c.bf16 %v5628_v49, %v5628_v49 }
 0x850   : > { %v5631_v32 = vpack.c.bf16 %v5629_v39, %v5629_v39 }
 0x852   : > { %5799 = vmatprep.mubr.bf16.mxu1 %v5631_v32 }
 0x853   : > { %5800 = vmatmul.mubr.bf16.vlgmr.msra.gmra.mrb[8].mxu1 %v5630_v45 }
 0x926   : > { %v6498_v34 = vpop.f32.mrb[8].mxu1 }
 0x927   : > { %v6499_v18 = vpop.f32.mrb[9].mxu1 }
 0x928   : > { %v6500_v28 = vadd.f32 %v6499_v18, %v6498_v34  ;;  %v6501_v63 = vpop.f32.mrb[10].mxu1 }
 0x929   : > { %v6502_v43 = vpop.f32.mrb[11].mxu1 }
 0x92a   : > { %v5802_v38 = vadd.f32 %v6500_v28, %v6422_v9 }
 0x92c   : > { %5807 = vst [vmem:[%s572_s19] sm:$0x3] %v5802_v38 }
 0x92d PF: > { %s8963_s22 = sld [smem:[#allocation25_spill]]  ;;  %s8964_s12 = sld [smem:[#allocation39_spill]] }
 0x92e   : > { %s5822_s3 = sshll.u32 %s572_s19, 4  ;;  %s5809_s15 = scalar_lea.sflag [#allocation5], %s570_s7  ;;  %s5823_s3 = int_to_ptr.vmem [resolvable:$true] %s5822_s3 }
 0x92f   : > { %s7536_s0 = scalar_lea.vmem %s5823_s3, 32  ;;  %p8965_p12 = scmp.ne.s32.totalorder %s8946_s28, 0 }
 0x930   : > { %p7537_p9 = scmp.ne.s32.totalorder %s5823_s3, %s7536_s0  ;;  %s7695_s4 = smov [#allocation17]  }
 0x931   : > { %s7540_s5 = sshll.u32 %s7695_s4, 4  ;;  %s7541_s5 = int_to_ptr.vmem [resolvable:$false] %s7540_s5 }
 0x932   : > { %p7538_p2 = pnand %p7537_p9, %p8965_p12  ;;  %s7542_s9 = scalar_lea.vmem %s7541_s5, 64 }
 0x933   : > { %s6440_s13 = sshll.u32 %s8963_s22, 5  ;;  %p7543_p6 = scmp.lt.s32.totalorder %s5823_s3, %s7541_s5 }
 0x934   : > { %s8825_s1 = scalar_lea.hbm %s8964_s12, %s6440_s13  ;;  %p7539_p7 = pneg %p7538_p2 }
 0x935   : > { %p7544_p1 = scmp.lt.s32.totalorder %s7542_s9, %s7536_s0 }
 0x937   : > { %p7545_p10 = por %p7544_p1, %p7543_p6 }
 0x939   : > { %p7546_p5 = pnand %p7545_p10, %p7539_p7 }
 0x93b   : > { %7549 = shalt.err (!%p7546_p5)
}
 0x93c   : > { %s7550_s7 = scalar_lea.hbm %s8825_s1, 32  ;;  %s7554_s22 = scalar_lea.hbm %s8964_s12, 64 }
 0x93d   : > { %p7551_p13 = scmp.ne.s32.totalorder %s8825_s1, %s7550_s7  ;;  %p7555_p4 = scmp.lt.u32.totalorder %s8825_s1, %s8964_s12 }
 0x93e   : > { %p7556_p11 = scmp.lt.u32.totalorder %s7554_s22, %s7550_s7  ;;  %p7558_p9 = scmp.lt.u32.totalorder %s7550_s7, %s8825_s1 }
 0x93f   : > { %p7552_p0 = pnand %p7551_p13, %p8965_p12 }
 0x940   : > { %p7557_p8 = por %p7556_p11, %p7555_p4 }
 0x941   : > { %p7553_p3 = pneg %p7552_p0 }
 0x942   : > { %p7559_p2 = por %p7558_p9, %p7557_p8 }
 0x944   : > { %p7560_p7 = pnand %p7559_p2, %p7553_p3 }
 0x946   : > { %7563 = shalt.err (!%p7560_p7)
}
 0x947   : > { %6652 = dma.vmem_to_hbm [thread:$0]  (%p8965_p12), %s5823_s3, 32, %s8825_s1, %s5809_s15  }
 0x948 PF: > { %p6699_p6 = scmp.ge.s32.totalorder %s7674_s18, 2  ;;  %s5834_s9 = sand.u32 1, %s7634_s25  }
 0x949   : > { %p8966_p1 = scmp.ne.s32.totalorder %s8947_s2, 0  ;;  %s5835_s20 = scalar_lea.sflag [#allocation5], %s5834_s9 }
 0x94b   : > { %p6681_p10 = pnand %p6699_p6, %p8966_p1 }
 0x94d   : > { %7629 = dma.done.wait (!%p6681_p10), %s5835_s20, 32  }
 0x94e   : > { %7631 = vsyncadd (!%p6681_p10), %s5835_s20, 4294967264  ;;  %s33_s18 = sadd.s32 1, %s7674_s18   ;;  %s8967_s25 = smov %s7638_s26 }
 0x94f   : > { %p30_p5 = scmp.ge.s32.totalorder %s33_s18, 6   ;;  %s8968_s26 = smov %s7642_s27 }
 0x950   : > { %s8969_s27 = smov %s8040_s6  ;;  %s8970_s28 = smov %s7650_s29 }
 0x951   : > { %s8971_s29 = smov %s7654_s30  ;;  %s8972_s30 = smov %s8043_s21 }
 0x952   : > { %s8973_s14 = smov %s7666_s16  ;;  %s8974_s15 = smov %s7670_s17 }
 0x953   : > { %s8975_s16 = smov %s8978_s24  ;;  %s8976_s17 = smov %s8982_s8 }
 0x954   :  { %32 = sbr.rel (!%p30_p5) target bundleno = 27 (0x1b), region = 154 }
 0x95b   :  { %5840 = vsyncpa [#allocation4], 1 }
 0x95c   :  { %5842 = vsyncpa [#allocation4 + $0x1], 1 }
 0x95d   :  { %5843 = vsyncpa [#allocation7], 1 }
 0x95e   :  { %5844 = vsyncpa [#allocation10], 1 }
 0x95f   :  { %5845 = vsyncpa [#allocation13], 1 }
 0x960   :  { %5846 = vsyncpa [#allocation16], 1 }
 0x961   :  { %5847 = vsyncpa [#allocation5], 1 }
 0x962   :  { %5849 = vsyncpa [#allocation5 + $0x1], 1 }

</bundles_post_ra>
